<compile_context>
chip_gen: v7x
topology: tpu7x:2x2x1
jax: 0.10.0
libtpu: 0.0.40
codegen_flags: <defaults>
</compile_context>

<pallas_src>
import functools

import jax
import jax.numpy as jnp
from jax.experimental import pallas as pl
from jax.experimental.pallas import tpu as pltpu

EPS = 1e-5
LANE = 128


def _round_up(x, m):
    return ((x + m - 1) // m) * m


def _vmem_limit_bytes():
    """VMEM budget per TPU generation (~64 MiB on v7x, 128 MiB on v5e/v6e)."""
    cap = 64 * 1024 * 1024
    try:
        cap = int(getattr(pltpu.get_tpu_info(), "vmem_capacity_bytes", cap))
    except Exception:
        pass
    # leave headroom for compiler scratch; never request more than ~112 MiB.
    return int(min(cap * 0.8, 112 * 1024 * 1024))


# ----------------------------------------------------------------------------
# in-kernel helpers
# ----------------------------------------------------------------------------
def _conv3x3(x, w_ref, *, fused):
    """3x3 'SAME' conv of one NHWC bf16 image tile against a prepped weight ref.

    x:     (n, H, W, C) bf16 values.
    w_ref: fused : (3, 3*C, Cop)  -- rows inside a kh block ordered kw*C + c
           !fused: (9, C,   Cop)  -- tap index kh*3 + kw
    Returns (n*H*W, Cop) float32 (MXU accumulation in f32).
    """
    n, H, W, C = x.shape
    # 1-wide zero halo built by concatenation (no full-buffer zero fill).
    zr = jnp.zeros((n, 1, W, C), x.dtype)
    xp = jnp.concatenate([zr, x, zr], axis=1)                  # (n, H+2, W, C)
    zc = jnp.zeros((n, H + 2, 1, C), x.dtype)
    xp = jnp.concatenate([zc, xp, zc], axis=2)                 # (n, H+2, W+2, C)

    acc = None
    if fused:
        # kh-decomposed im2col: concatenate ONLY the 3 kw taps (lane-aligned,
        # C % 128 == 0) -> K = 3*C; kh is a free leading-dim slice; 3
        # accumulating matmuls instead of one K = 9*C matmul.
        # TODO(synk): generate the kw taps with pltpu.roll on the XLU (+ edge
        # masking) instead of sublane-misaligned value slices.
        cols = jnp.concatenate(
            [xp[:, :, kw:kw + W, :] for kw in range(3)], axis=-1)  # (n,H+2,W,3C)
        for kh in range(3):
            ck = cols[:, kh:kh + H].reshape(n * H * W, 3 * C)
            part = jnp.dot(ck, w_ref[kh], preferred_element_type=jnp.float32)
            acc = part if acc is None else acc + part
    else:
        # Small / lane-unaligned C (UNet stem): keep the input at native C
        # (no 9-32x channel-pad DMA/MXU blow-up); 9 tiny-K per-tap matmuls.
        for kh in range(3):
            for kw in range(3):
                tap = xp[:, kh:kh + H, kw:kw + W, :].reshape(n * H * W, C)
                part = jnp.dot(tap, w_ref[kh * 3 + kw],
                               preferred_element_type=jnp.float32)
                acc = part if acc is None else acc + part
    return acc


def _store_y_and_stats(y, y_ref, s_ref, ss_ref):
    # y: (M, Cop) f32 pre-BN conv output for this batch element.
    y_ref[...] = y.reshape(y_ref.shape).astype(y_ref.dtype)
    # One-pass stats (sum / sum-of-squares); the wrapper clamps
    # var = E[y^2] - mean^2 at >= 0 (fine at these magnitudes).
    s_ref[...] = jnp.sum(y, axis=0, keepdims=True).reshape(s_ref.shape)
    ss_ref[...] = jnp.sum(y * y, axis=0, keepdims=True).reshape(ss_ref.shape)


# ----------------------------------------------------------------------------
# kernels (one grid step == one batch element)
# ----------------------------------------------------------------------------
def _conv_stats_kernel(x_ref, w_ref, y_ref, s_ref, ss_ref, *, fused):
    y = _conv3x3(x_ref[...], w_ref, fused=fused)
    _store_y_and_stats(y, y_ref, s_ref, ss_ref)


def _bn_relu_conv_stats_kernel(x_ref, sc_ref, sh_ref, w_ref,
                               y_ref, s_ref, ss_ref, *, fused):
    # Fused BN affine (y*scale + shift) + ReLU: 2 VALU passes instead of 3.
    a = jnp.maximum(x_ref[...].astype(jnp.float32) * sc_ref[...] + sh_ref[...],
                    0.0)
    y = _conv3x3(a.astype(jnp.bfloat16), w_ref, fused=fused)
    _store_y_and_stats(y, y_ref, s_ref, ss_ref)


def _bn_relu_out_kernel(x_ref, sc_ref, sh_ref, o_ref, *, cout):
    a = jnp.maximum(x_ref[...].astype(jnp.float32) * sc_ref[...] + sh_ref[...],
                    0.0)
    o_ref[...] = a[..., :cout].astype(o_ref.dtype)


# ----------------------------------------------------------------------------
# host-side wrapper
# ----------------------------------------------------------------------------
def _prep_w(w, ci_pad, co_pad, fused):
    """(O, I, 3, 3) torch layout -> MXU-friendly bf16 tap matrix."""
    co, ci = w.shape[0], w.shape[1]
    w = jnp.pad(w.astype(jnp.float32),
                ((0, co_pad - co), (0, ci_pad - ci), (0, 0), (0, 0)))
    w = jnp.transpose(w, (2, 3, 1, 0))                   # (kh, kw, I, O)
    if fused:
        w = w.reshape(3, 3 * ci_pad, co_pad)             # row = kw*I + i
    else:
        w = w.reshape(9, ci_pad, co_pad)                 # tap = kh*3 + kw
    return w.astype(jnp.bfloat16)


@jax.jit
def double_conv_pallas(x_nchw, params):
    """x_nchw: (N, Cin, H, W) f32 -> (N, Cout, H, W) f32.

    (conv3x3 -> BatchNorm(training stats) -> ReLU) x 2.  Conv biases b1/b2 are
    dropped: a per-channel constant added before training-mode BN is exactly
    cancelled by the batch-mean subtraction.
    """
    w1, b1, g1, be1, w2, b2, g2, be2 = params
    del b1, b2
    N, Cin, H, W = x_nchw.shape
    Cout = w1.shape[0]
    Cop = _round_up(Cout, LANE)
    inv_cnt = 1.0 / float(N * H * W)
    vmem_limit = _vmem_limit_bytes()

    # NCHW -> NHWC + bf16 cast (fused by XLA under jit); input channels are
    # NOT padded to 128 — conv1 runs at native Cin.
    x_nhwc = jnp.transpose(x_nchw, (0, 2, 3, 1)).astype(jnp.bfloat16)

    fused1 = (Cin % LANE == 0)
    w1_k = _prep_w(w1, Cin, Cop, fused1)
    w2_k = _prep_w(w2, Cop, Cop, True)

    def finalize(sum_out, sumsq_out, g, be):
        # tiny per-channel "finalize" step of accumulate/finalize BN, in XLA.
        s1 = jnp.sum(sum_out, axis=0)                    # (1, Cop)
        s2 = jnp.sum(sumsq_out, axis=0)                  # (1, Cop)
        mean = s1 * inv_cnt
        var = jnp.maximum(s2 * inv_cnt - mean * mean, 0.0)
        gp = jnp.pad(g.astype(jnp.float32), (0, Cop - Cout)).reshape(1, Cop)
        bp = jnp.pad(be.astype(jnp.float32), (0, Cop - Cout)).reshape(1, Cop)
        scale = gp * jax.lax.rsqrt(var + EPS)            # padded lanes: gp=0 -> 0
        shift = bp - mean * scale
        return scale, shift

    cparams = pltpu.CompilerParams(
        dimension_semantics=("parallel",),               # megacore over batch
        vmem_limit_bytes=vmem_limit)

    def w_spec(shape):
        return pl.BlockSpec(shape, lambda n: (0,) * len(shape))

    def act_spec(c):
        return pl.BlockSpec((1, H, W, c), lambda n: (n, 0, 0, 0))

    vec_spec = pl.BlockSpec((1, Cop), lambda n: (0, 0))
    stat_spec = pl.BlockSpec((1, 1, Cop), lambda n: (n, 0, 0))
    stat_shape = jax.ShapeDtypeStruct((N, 1, Cop), jnp.float32)

    # --- pass 1: conv1 per batch element + per-element BN1 partial sums -----
    y1_pre, s1, ss1 = pl.pallas_call(
        functools.partial(_conv_stats_kernel, fused=fused1),
        grid=(N,),
        in_specs=[act_spec(Cin), w_spec(w1_k.shape)],
        out_specs=(act_spec(Cop), stat_spec, stat_spec),
        out_shape=(jax.ShapeDtypeStruct((N, H, W, Cop), jnp.bfloat16),
                   stat_shape, stat_shape),
        compiler_params=cparams,
    )(x_nhwc, w1_k)
    scale1, shift1 = finalize(s1, ss1, g1, be1)

    # --- pass 2: BN1 + ReLU -> conv2 + per-element BN2 partial sums ---------
    y2_pre, s2, ss2 = pl.pallas_call(
        functools.partial(_bn_relu_conv_stats_kernel, fused=True),
        grid=(N,),
        in_specs=[act_spec(Cop), vec_spec, vec_spec, w_spec(w2_k.shape)],
        out_specs=(act_spec(Cop), stat_spec, stat_spec),
        out_shape=(jax.ShapeDtypeStruct((N, H, W, Cop), jnp.bfloat16),
                   stat_shape, stat_shape),
        compiler_params=cparams,
    )(y1_pre, scale1, shift1, w2_k)
    scale2, shift2 = finalize(s2, ss2, g2, be2)

    # --- pass 3: BN2 + ReLU; write only the real Cout channels in f32 -------
    out_nhwc = pl.pallas_call(
        functools.partial(_bn_relu_out_kernel, cout=Cout),
        grid=(N,),
        in_specs=[act_spec(Cop), vec_spec, vec_spec],
        out_specs=act_spec(Cout),
        out_shape=jax.ShapeDtypeStruct((N, H, W, Cout), jnp.float32),
        compiler_params=cparams,
    )(y2_pre, scale2, shift2)

    # back to NCHW for the PyTorch-facing interface.
    return jnp.transpose(out_nhwc, (0, 3, 1, 2))


# ----------------------------------------------------------------------------
# pure-JAX f32 reference (mirrors PyTorch training-mode forward)
# ----------------------------------------------------------------------------
def double_conv_ref(x_nchw, params):
    w1, b1, g1, be1, w2, b2, g2, be2 = params

    def block(x, w, b, g, be):
        y = jax.lax.conv_general_dilated(
            x, w, window_strides=(1, 1), padding="SAME",
            dimension_numbers=("NCHW", "OIHW", "NCHW"))
        y = y + b[None, :, None, None]
        mean = jnp.mean(y, axis=(0, 2, 3), keepdims=True)
        var = jnp.mean((y - mean) ** 2, axis=(0, 2, 3), keepdims=True)
        y = (y - mean) * jax.lax.rsqrt(var + EPS) * g[None, :, None, None] \
            + be[None, :, None, None]
        return jnp.maximum(y, 0.0)

    return block(block(x_nchw, w1, b1, g1, be1), w2, b2, g2, be2)


def init_params(key, in_ch, out_ch):
    ks = jax.random.split(key, 8)
    w1 = jax.random.normal(ks[0], (out_ch, in_ch, 3, 3), jnp.float32) * 0.2
    b1 = jax.random.normal(ks[1], (out_ch,), jnp.float32) * 0.1
    g1 = 1.0 + 0.3 * jax.random.normal(ks[2], (out_ch,), jnp.float32)
    be1 = jax.random.normal(ks[3], (out_ch,), jnp.float32) * 0.1
    w2 = jax.random.normal(ks[4], (out_ch, out_ch, 3, 3), jnp.float32) * 0.2
    b2 = jax.random.normal(ks[5], (out_ch,), jnp.float32) * 0.1
    g2 = 1.0 + 0.3 * jax.random.normal(ks[6], (out_ch,), jnp.float32)
    be2 = jax.random.normal(ks[7], (out_ch,), jnp.float32) * 0.1
    return (w1, b1, g1, be1, w2, b2, g2, be2)


if __name__ == "__main__":
    key = jax.random.PRNGKey(0)
    k_x, k_p = jax.random.split(key)

    N, C_IN, C_OUT, H, W = 2, 4, 8, 16, 16
    x = jax.random.normal(k_x, (N, C_IN, H, W), jnp.float32)
    params = init_params(k_p, C_IN, C_OUT)

    out = jax.block_until_ready(double_conv_pallas(x, params))
    ref = jax.block_until_ready(double_conv_ref(x, params))

    assert out.shape == (N, C_OUT, H, W)
    # bf16 MXU operands + bf16 HBM intermediates (f32 accumulation throughout),
    # so compare at bf16-level tolerance against the f32 reference.
    err_max = float(jnp.max(jnp.abs(out - ref)))
    err_rms = float(jnp.sqrt(jnp.mean((out - ref) ** 2)))
    ref_rms = float(jnp.sqrt(jnp.mean(ref ** 2)))
    assert err_rms <= 2.5e-2 * (ref_rms + 1e-6) and err_max <= 2.5e-1, \
        f"max abs err {err_max}, rms err {err_rms}, ref rms {ref_rms}"

    print("KERNEL_OK")
</pallas_src>

<mosaic_0001>
module attributes {stable_mosaic.version = 11 : i64} {
  func.func @_conv_stats_kernel(%arg0: i32, %arg1: memref<1x16x16x4xbf16, #tpu.memory_space<vmem>>, %arg2: memref<9x4x128xbf16, #tpu.memory_space<vmem>>, %arg3: memref<1x16x16x128xbf16, #tpu.memory_space<vmem>>, %arg4: memref<1x1x128xf32, #tpu.memory_space<vmem>>, %arg5: memref<1x1x128xf32, #tpu.memory_space<vmem>>) attributes {dimension_semantics = [#tpu.dimension_semantics<parallel>], iteration_bounds = array<i64: 2>, scalar_prefetch = 0 : i64, scratch_operands = 0 : i64, tpu.core_type = #tpu.core_type<tc>, window_params = [{transform_indices = @transform_0, window_bounds = array<i64: 1, 16, 16, 4>}, {pipeline_mode = #tpu.pipeline_mode<synchronous>, transform_indices = @transform_1, window_bounds = array<i64: 9, 4, 128>}, {transform_indices = @transform_2, window_bounds = array<i64: 1, 16, 16, 128>}, {transform_indices = @transform_3, window_bounds = array<i64: 1, 1, 128>}, {transform_indices = @transform_4, window_bounds = array<i64: 1, 1, 128>}]} {
    %c0 = arith.constant 0 : index
    %c0_0 = arith.constant 0 : index
    %c0_1 = arith.constant 0 : index
    %c0_2 = arith.constant 0 : index
    %0 = vector.load %arg1[%c0, %c0_0, %c0_1, %c0_2] : memref<1x16x16x4xbf16, #tpu.memory_space<vmem>>, vector<1x16x16x4xbf16>
    %cst = arith.constant 0.000000e+00 : bf16
    %1 = vector.broadcast %cst : bf16 to vector<1x1x16x4xbf16>
    %2 = tpu.concatenate %1, %0, %1 in 1 : vector<1x1x16x4xbf16>, vector<1x16x16x4xbf16>, vector<1x1x16x4xbf16> -> vector<1x18x16x4xbf16>
    %cst_3 = arith.constant 0.000000e+00 : bf16
    %3 = vector.broadcast %cst_3 : bf16 to vector<1x18x1x4xbf16>
    %4 = tpu.concatenate %3, %2, %3 in 2 : vector<1x18x1x4xbf16>, vector<1x18x16x4xbf16>, vector<1x18x1x4xbf16> -> vector<1x18x18x4xbf16>
    %5 = vector.extract_strided_slice %4 {offsets = [0, 0, 0, 0], sizes = [1, 16, 16, 4], strides = [1, 1, 1, 1]} : vector<1x18x18x4xbf16> to vector<1x16x16x4xbf16>
    %6 = vector.shape_cast %5 : vector<1x16x16x4xbf16> to vector<256x4xbf16>
    %c0_4 = arith.constant 0 : index
    %c0_5 = arith.constant 0 : index
    %c0_6 = arith.constant 0 : index
    %7 = vector.load %arg2[%c0_4, %c0_5, %c0_6] : memref<9x4x128xbf16, #tpu.memory_space<vmem>>, vector<1x4x128xbf16>
    %8 = vector.shape_cast %7 : vector<1x4x128xbf16> to vector<4x128xbf16>
    %cst_7 = arith.constant dense<0.000000e+00> : vector<256x128xf32>
    %9 = tpu.matmul %6, %8, %cst_7 {dimension_numbers = #tpu.dot_dimension_numbers<[1], [0], [0], [1], [0, 0, 1, 1], [], []>} : vector<256x4xbf16>, vector<4x128xbf16>, vector<256x128xf32> -> vector<256x128xf32>
    %10 = vector.extract_strided_slice %4 {offsets = [0, 0, 1, 0], sizes = [1, 16, 16, 4], strides = [1, 1, 1, 1]} : vector<1x18x18x4xbf16> to vector<1x16x16x4xbf16>
    %11 = vector.shape_cast %10 : vector<1x16x16x4xbf16> to vector<256x4xbf16>
    %c1 = arith.constant 1 : index
    %c0_8 = arith.constant 0 : index
    %c0_9 = arith.constant 0 : index
    %12 = vector.load %arg2[%c1, %c0_8, %c0_9] : memref<9x4x128xbf16, #tpu.memory_space<vmem>>, vector<1x4x128xbf16>
    %13 = vector.shape_cast %12 : vector<1x4x128xbf16> to vector<4x128xbf16>
    %cst_10 = arith.constant dense<0.000000e+00> : vector<256x128xf32>
    %14 = tpu.matmul %11, %13, %cst_10 {dimension_numbers = #tpu.dot_dimension_numbers<[1], [0], [0], [1], [0, 0, 1, 1], [], []>} : vector<256x4xbf16>, vector<4x128xbf16>, vector<256x128xf32> -> vector<256x128xf32>
    %15 = arith.addf %9, %14 : vector<256x128xf32>
    %16 = vector.extract_strided_slice %4 {offsets = [0, 0, 2, 0], sizes = [1, 16, 16, 4], strides = [1, 1, 1, 1]} : vector<1x18x18x4xbf16> to vector<1x16x16x4xbf16>
    %17 = vector.shape_cast %16 : vector<1x16x16x4xbf16> to vector<256x4xbf16>
    %c2 = arith.constant 2 : index
    %c0_11 = arith.constant 0 : index
    %c0_12 = arith.constant 0 : index
    %18 = vector.load %arg2[%c2, %c0_11, %c0_12] : memref<9x4x128xbf16, #tpu.memory_space<vmem>>, vector<1x4x128xbf16>
    %19 = vector.shape_cast %18 : vector<1x4x128xbf16> to vector<4x128xbf16>
    %cst_13 = arith.constant dense<0.000000e+00> : vector<256x128xf32>
    %20 = tpu.matmul %17, %19, %cst_13 {dimension_numbers = #tpu.dot_dimension_numbers<[1], [0], [0], [1], [0, 0, 1, 1], [], []>} : vector<256x4xbf16>, vector<4x128xbf16>, vector<256x128xf32> -> vector<256x128xf32>
    %21 = arith.addf %15, %20 : vector<256x128xf32>
    %22 = vector.extract_strided_slice %4 {offsets = [0, 1, 0, 0], sizes = [1, 16, 16, 4], strides = [1, 1, 1, 1]} : vector<1x18x18x4xbf16> to vector<1x16x16x4xbf16>
    %23 = vector.shape_cast %22 : vector<1x16x16x4xbf16> to vector<256x4xbf16>
    %c3 = arith.constant 3 : index
    %c0_14 = arith.constant 0 : index
    %c0_15 = arith.constant 0 : index
    %24 = vector.load %arg2[%c3, %c0_14, %c0_15] : memref<9x4x128xbf16, #tpu.memory_space<vmem>>, vector<1x4x128xbf16>
    %25 = vector.shape_cast %24 : vector<1x4x128xbf16> to vector<4x128xbf16>
    %cst_16 = arith.constant dense<0.000000e+00> : vector<256x128xf32>
    %26 = tpu.matmul %23, %25, %cst_16 {dimension_numbers = #tpu.dot_dimension_numbers<[1], [0], [0], [1], [0, 0, 1, 1], [], []>} : vector<256x4xbf16>, vector<4x128xbf16>, vector<256x128xf32> -> vector<256x128xf32>
    %27 = arith.addf %21, %26 : vector<256x128xf32>
    %28 = vector.extract_strided_slice %4 {offsets = [0, 1, 1, 0], sizes = [1, 16, 16, 4], strides = [1, 1, 1, 1]} : vector<1x18x18x4xbf16> to vector<1x16x16x4xbf16>
    %29 = vector.shape_cast %28 : vector<1x16x16x4xbf16> to vector<256x4xbf16>
    %c4 = arith.constant 4 : index
    %c0_17 = arith.constant 0 : index
    %c0_18 = arith.constant 0 : index
    %30 = vector.load %arg2[%c4, %c0_17, %c0_18] : memref<9x4x128xbf16, #tpu.memory_space<vmem>>, vector<1x4x128xbf16>
    %31 = vector.shape_cast %30 : vector<1x4x128xbf16> to vector<4x128xbf16>
    %cst_19 = arith.constant dense<0.000000e+00> : vector<256x128xf32>
    %32 = tpu.matmul %29, %31, %cst_19 {dimension_numbers = #tpu.dot_dimension_numbers<[1], [0], [0], [1], [0, 0, 1, 1], [], []>} : vector<256x4xbf16>, vector<4x128xbf16>, vector<256x128xf32> -> vector<256x128xf32>
    %33 = arith.addf %27, %32 : vector<256x128xf32>
    %34 = vector.extract_strided_slice %4 {offsets = [0, 1, 2, 0], sizes = [1, 16, 16, 4], strides = [1, 1, 1, 1]} : vector<1x18x18x4xbf16> to vector<1x16x16x4xbf16>
    %35 = vector.shape_cast %34 : vector<1x16x16x4xbf16> to vector<256x4xbf16>
    %c5 = arith.constant 5 : index
    %c0_20 = arith.constant 0 : index
    %c0_21 = arith.constant 0 : index
    %36 = vector.load %arg2[%c5, %c0_20, %c0_21] : memref<9x4x128xbf16, #tpu.memory_space<vmem>>, vector<1x4x128xbf16>
    %37 = vector.shape_cast %36 : vector<1x4x128xbf16> to vector<4x128xbf16>
    %cst_22 = arith.constant dense<0.000000e+00> : vector<256x128xf32>
    %38 = tpu.matmul %35, %37, %cst_22 {dimension_numbers = #tpu.dot_dimension_numbers<[1], [0], [0], [1], [0, 0, 1, 1], [], []>} : vector<256x4xbf16>, vector<4x128xbf16>, vector<256x128xf32> -> vector<256x128xf32>
    %39 = arith.addf %33, %38 : vector<256x128xf32>
    %40 = vector.extract_strided_slice %4 {offsets = [0, 2, 0, 0], sizes = [1, 16, 16, 4], strides = [1, 1, 1, 1]} : vector<1x18x18x4xbf16> to vector<1x16x16x4xbf16>
    %41 = vector.shape_cast %40 : vector<1x16x16x4xbf16> to vector<256x4xbf16>
    %c6 = arith.constant 6 : index
    %c0_23 = arith.constant 0 : index
    %c0_24 = arith.constant 0 : index
    %42 = vector.load %arg2[%c6, %c0_23, %c0_24] : memref<9x4x128xbf16, #tpu.memory_space<vmem>>, vector<1x4x128xbf16>
    %43 = vector.shape_cast %42 : vector<1x4x128xbf16> to vector<4x128xbf16>
    %cst_25 = arith.constant dense<0.000000e+00> : vector<256x128xf32>
    %44 = tpu.matmul %41, %43, %cst_25 {dimension_numbers = #tpu.dot_dimension_numbers<[1], [0], [0], [1], [0, 0, 1, 1], [], []>} : vector<256x4xbf16>, vector<4x128xbf16>, vector<256x128xf32> -> vector<256x128xf32>
    %45 = arith.addf %39, %44 : vector<256x128xf32>
    %46 = vector.extract_strided_slice %4 {offsets = [0, 2, 1, 0], sizes = [1, 16, 16, 4], strides = [1, 1, 1, 1]} : vector<1x18x18x4xbf16> to vector<1x16x16x4xbf16>
    %47 = vector.shape_cast %46 : vector<1x16x16x4xbf16> to vector<256x4xbf16>
    %c7 = arith.constant 7 : index
    %c0_26 = arith.constant 0 : index
    %c0_27 = arith.constant 0 : index
    %48 = vector.load %arg2[%c7, %c0_26, %c0_27] : memref<9x4x128xbf16, #tpu.memory_space<vmem>>, vector<1x4x128xbf16>
    %49 = vector.shape_cast %48 : vector<1x4x128xbf16> to vector<4x128xbf16>
    %cst_28 = arith.constant dense<0.000000e+00> : vector<256x128xf32>
    %50 = tpu.matmul %47, %49, %cst_28 {dimension_numbers = #tpu.dot_dimension_numbers<[1], [0], [0], [1], [0, 0, 1, 1], [], []>} : vector<256x4xbf16>, vector<4x128xbf16>, vector<256x128xf32> -> vector<256x128xf32>
    %51 = arith.addf %45, %50 : vector<256x128xf32>
    %52 = vector.extract_strided_slice %4 {offsets = [0, 2, 2, 0], sizes = [1, 16, 16, 4], strides = [1, 1, 1, 1]} : vector<1x18x18x4xbf16> to vector<1x16x16x4xbf16>
    %53 = vector.shape_cast %52 : vector<1x16x16x4xbf16> to vector<256x4xbf16>
    %c8 = arith.constant 8 : index
    %c0_29 = arith.constant 0 : index
    %c0_30 = arith.constant 0 : index
    %54 = vector.load %arg2[%c8, %c0_29, %c0_30] : memref<9x4x128xbf16, #tpu.memory_space<vmem>>, vector<1x4x128xbf16>
    %55 = vector.shape_cast %54 : vector<1x4x128xbf16> to vector<4x128xbf16>
    %cst_31 = arith.constant dense<0.000000e+00> : vector<256x128xf32>
    %56 = tpu.matmul %53, %55, %cst_31 {dimension_numbers = #tpu.dot_dimension_numbers<[1], [0], [0], [1], [0, 0, 1, 1], [], []>} : vector<256x4xbf16>, vector<4x128xbf16>, vector<256x128xf32> -> vector<256x128xf32>
    %57 = arith.addf %51, %56 : vector<256x128xf32>
    %58 = vector.shape_cast %57 : vector<256x128xf32> to vector<1x16x16x128xf32>
    %59 = arith.truncf %58 : vector<1x16x16x128xf32> to vector<1x16x16x128xbf16>
    %c0_32 = arith.constant 0 : index
    %c0_33 = arith.constant 0 : index
    %c0_34 = arith.constant 0 : index
    %c0_35 = arith.constant 0 : index
    %60 = vector.load %arg3[%c0_32, %c0_33, %c0_34, %c0_35] : memref<1x16x16x128xbf16, #tpu.memory_space<vmem>>, vector<1x16x16x128xbf16>
    tpu.vector_store %arg3[%c0_32, %c0_33, %c0_34, %c0_35], %59 {strides = array<i32>} : memref<1x16x16x128xbf16, #tpu.memory_space<vmem>>, vector<1x16x16x128xbf16>,
    %cst_36 = arith.constant dense<0.000000e+00> : vector<128xf32>
    %61 = vector.multi_reduction <add>, %57, %cst_36 [0] : vector<256x128xf32> to vector<128xf32>
    %62 = vector.shape_cast %61 : vector<128xf32> to vector<1x128xf32>
    %63 = vector.shape_cast %62 : vector<1x128xf32> to vector<1x1x128xf32>
    %c0_37 = arith.constant 0 : index
    %c0_38 = arith.constant 0 : index
    %c0_39 = arith.constant 0 : index
    %64 = vector.load %arg4[%c0_37, %c0_38, %c0_39] : memref<1x1x128xf32, #tpu.memory_space<vmem>>, vector<1x1x128xf32>
    tpu.vector_store %arg4[%c0_37, %c0_38, %c0_39], %63 {strides = array<i32>} : memref<1x1x128xf32, #tpu.memory_space<vmem>>, vector<1x1x128xf32>,
    %65 = arith.mulf %57, %57 : vector<256x128xf32>
    %cst_40 = arith.constant dense<0.000000e+00> : vector<128xf32>
    %66 = vector.multi_reduction <add>, %65, %cst_40 [0] : vector<256x128xf32> to vector<128xf32>
    %67 = vector.shape_cast %66 : vector<128xf32> to vector<1x128xf32>
    %68 = vector.shape_cast %67 : vector<1x128xf32> to vector<1x1x128xf32>
    %c0_41 = arith.constant 0 : index
    %c0_42 = arith.constant 0 : index
    %c0_43 = arith.constant 0 : index
    %69 = vector.load %arg5[%c0_41, %c0_42, %c0_43] : memref<1x1x128xf32, #tpu.memory_space<vmem>>, vector<1x1x128xf32>
    tpu.vector_store %arg5[%c0_41, %c0_42, %c0_43], %68 {strides = array<i32>} : memref<1x1x128xf32, #tpu.memory_space<vmem>>, vector<1x1x128xf32>,
    return
  }
  func.func @transform_0(%arg0: i32) -> (i32, i32, i32, i32) {
    %c0_i32 = arith.constant 0 : i32
    %c0_i32_0 = arith.constant 0 : i32
    %c0_i32_1 = arith.constant 0 : i32
    %c0_i32_2 = arith.constant 0 : i32
    return %arg0, %c0_i32, %c0_i32_0, %c0_i32_1 : i32, i32, i32, i32
  }
  func.func @transform_1(%arg0: i32) -> (i32, i32, i32) {
    %c0_i32 = arith.constant 0 : i32
    %c0_i32_0 = arith.constant 0 : i32
    %c0_i32_1 = arith.constant 0 : i32
    %c0_i32_2 = arith.constant 0 : i32
    return %c0_i32, %c0_i32_0, %c0_i32_1 : i32, i32, i32
  }
  func.func @transform_2(%arg0: i32) -> (i32, i32, i32, i32) {
    %c0_i32 = arith.constant 0 : i32
    %c0_i32_0 = arith.constant 0 : i32
    %c0_i32_1 = arith.constant 0 : i32
    %c0_i32_2 = arith.constant 0 : i32
    return %arg0, %c0_i32, %c0_i32_0, %c0_i32_1 : i32, i32, i32, i32
  }
  func.func @transform_3(%arg0: i32) -> (i32, i32, i32) {
    %c0_i32 = arith.constant 0 : i32
    %c0_i32_0 = arith.constant 0 : i32
    %c0_i32_1 = arith.constant 0 : i32
    return %arg0, %c0_i32, %c0_i32_0 : i32, i32, i32
  }
  func.func @transform_4(%arg0: i32) -> (i32, i32, i32) {
    %c0_i32 = arith.constant 0 : i32
    %c0_i32_0 = arith.constant 0 : i32
    %c0_i32_1 = arith.constant 0 : i32
    return %arg0, %c0_i32, %c0_i32_0 : i32, i32, i32
  }
}

module attributes {stable_mosaic.version = 11 : i64} {
  func.func @_bn_relu_conv_stats_kernel(%arg0: i32, %arg1: memref<1x16x16x128xbf16, #tpu.memory_space<vmem>>, %arg2: memref<1x128xf32, #tpu.memory_space<vmem>>, %arg3: memref<1x128xf32, #tpu.memory_space<vmem>>, %arg4: memref<3x384x128xbf16, #tpu.memory_space<vmem>>, %arg5: memref<1x16x16x128xbf16, #tpu.memory_space<vmem>>, %arg6: memref<1x1x128xf32, #tpu.memory_space<vmem>>, %arg7: memref<1x1x128xf32, #tpu.memory_space<vmem>>) attributes {dimension_semantics = [#tpu.dimension_semantics<parallel>], iteration_bounds = array<i64: 2>, scalar_prefetch = 0 : i64, scratch_operands = 0 : i64, tpu.core_type = #tpu.core_type<tc>, window_params = [{transform_indices = @transform_0, window_bounds = array<i64: 1, 16, 16, 128>}, {pipeline_mode = #tpu.pipeline_mode<synchronous>, transform_indices = @transform_1, window_bounds = array<i64: 1, 128>}, {pipeline_mode = #tpu.pipeline_mode<synchronous>, transform_indices = @transform_2, window_bounds = array<i64: 1, 128>}, {pipeline_mode = #tpu.pipeline_mode<synchronous>, transform_indices = @transform_3, window_bounds = array<i64: 3, 384, 128>}, {transform_indices = @transform_4, window_bounds = array<i64: 1, 16, 16, 128>}, {transform_indices = @transform_5, window_bounds = array<i64: 1, 1, 128>}, {transform_indices = @transform_6, window_bounds = array<i64: 1, 1, 128>}]} {
    %c0 = arith.constant 0 : index
    %c0_0 = arith.constant 0 : index
    %c0_1 = arith.constant 0 : index
    %c0_2 = arith.constant 0 : index
    %0 = vector.load %arg1[%c0, %c0_0, %c0_1, %c0_2] : memref<1x16x16x128xbf16, #tpu.memory_space<vmem>>, vector<1x16x16x128xbf16>
    %1 = arith.extf %0 : vector<1x16x16x128xbf16> to vector<1x16x16x128xf32>
    %c0_3 = arith.constant 0 : index
    %c0_4 = arith.constant 0 : index
    %2 = vector.load %arg2[%c0_3, %c0_4] : memref<1x128xf32, #tpu.memory_space<vmem>>, vector<1x128xf32>
    %3 = vector.shape_cast %2 : vector<1x128xf32> to vector<1x1x1x128xf32>
    %4 = vector.broadcast %3 : vector<1x1x1x128xf32> to vector<1x16x16x128xf32>
    %5 = arith.mulf %1, %4 : vector<1x16x16x128xf32>
    %c0_5 = arith.constant 0 : index
    %c0_6 = arith.constant 0 : index
    %6 = vector.load %arg3[%c0_5, %c0_6] : memref<1x128xf32, #tpu.memory_space<vmem>>, vector<1x128xf32>
    %7 = vector.shape_cast %6 : vector<1x128xf32> to vector<1x1x1x128xf32>
    %8 = vector.broadcast %7 : vector<1x1x1x128xf32> to vector<1x16x16x128xf32>
    %9 = arith.addf %5, %8 : vector<1x16x16x128xf32>
    %cst = arith.constant 0.000000e+00 : f32
    %10 = vector.broadcast %cst : f32 to vector<1x16x16x128xf32>
    %11 = arith.maximumf %9, %10 : vector<1x16x16x128xf32>
    %12 = arith.truncf %11 : vector<1x16x16x128xf32> to vector<1x16x16x128xbf16>
    %cst_7 = arith.constant 0.000000e+00 : bf16
    %13 = vector.broadcast %cst_7 : bf16 to vector<1x1x16x128xbf16>
    %14 = tpu.concatenate %13, %12, %13 in 1 : vector<1x1x16x128xbf16>, vector<1x16x16x128xbf16>, vector<1x1x16x128xbf16> -> vector<1x18x16x128xbf16>
    %cst_8 = arith.constant 0.000000e+00 : bf16
    %15 = vector.broadcast %cst_8 : bf16 to vector<1x18x1x128xbf16>
    %16 = tpu.concatenate %15, %14, %15 in 2 : vector<1x18x1x128xbf16>, vector<1x18x16x128xbf16>, vector<1x18x1x128xbf16> -> vector<1x18x18x128xbf16>
    %17 = vector.extract_strided_slice %16 {offsets = [0, 0, 0, 0], sizes = [1, 18, 16, 128], strides = [1, 1, 1, 1]} : vector<1x18x18x128xbf16> to vector<1x18x16x128xbf16>
    %18 = vector.extract_strided_slice %16 {offsets = [0, 0, 1, 0], sizes = [1, 18, 16, 128], strides = [1, 1, 1, 1]} : vector<1x18x18x128xbf16> to vector<1x18x16x128xbf16>
    %19 = vector.extract_strided_slice %16 {offsets = [0, 0, 2, 0], sizes = [1, 18, 16, 128], strides = [1, 1, 1, 1]} : vector<1x18x18x128xbf16> to vector<1x18x16x128xbf16>
    %20 = tpu.concatenate %17, %18, %19 in 3 : vector<1x18x16x128xbf16>, vector<1x18x16x128xbf16>, vector<1x18x16x128xbf16> -> vector<1x18x16x384xbf16>
    %21 = vector.extract_strided_slice %20 {offsets = [0, 0, 0, 0], sizes = [1, 16, 16, 384], strides = [1, 1, 1, 1]} : vector<1x18x16x384xbf16> to vector<1x16x16x384xbf16>
    %22 = vector.shape_cast %21 : vector<1x16x16x384xbf16> to vector<256x384xbf16>
    %c0_9 = arith.constant 0 : index
    %c0_10 = arith.constant 0 : index
    %c0_11 = arith.constant 0 : index
    %23 = vector.load %arg4[%c0_9, %c0_10, %c0_11] : memref<3x384x128xbf16, #tpu.memory_space<vmem>>, vector<1x384x128xbf16>
    %24 = vector.shape_cast %23 : vector<1x384x128xbf16> to vector<384x128xbf16>
    %cst_12 = arith.constant dense<0.000000e+00> : vector<256x128xf32>
    %25 = tpu.matmul %22, %24, %cst_12 {dimension_numbers = #tpu.dot_dimension_numbers<[1], [0], [0], [1], [0, 0, 1, 1], [], []>} : vector<256x384xbf16>, vector<384x128xbf16>, vector<256x128xf32> -> vector<256x128xf32>
    %26 = vector.extract_strided_slice %20 {offsets = [0, 1, 0, 0], sizes = [1, 16, 16, 384], strides = [1, 1, 1, 1]} : vector<1x18x16x384xbf16> to vector<1x16x16x384xbf16>
    %27 = vector.shape_cast %26 : vector<1x16x16x384xbf16> to vector<256x384xbf16>
    %c1 = arith.constant 1 : index
    %c0_13 = arith.constant 0 : index
    %c0_14 = arith.constant 0 : index
    %28 = vector.load %arg4[%c1, %c0_13, %c0_14] : memref<3x384x128xbf16, #tpu.memory_space<vmem>>, vector<1x384x128xbf16>
    %29 = vector.shape_cast %28 : vector<1x384x128xbf16> to vector<384x128xbf16>
    %cst_15 = arith.constant dense<0.000000e+00> : vector<256x128xf32>
    %30 = tpu.matmul %27, %29, %cst_15 {dimension_numbers = #tpu.dot_dimension_numbers<[1], [0], [0], [1], [0, 0, 1, 1], [], []>} : vector<256x384xbf16>, vector<384x128xbf16>, vector<256x128xf32> -> vector<256x128xf32>
    %31 = arith.addf %25, %30 : vector<256x128xf32>
    %32 = vector.extract_strided_slice %20 {offsets = [0, 2, 0, 0], sizes = [1, 16, 16, 384], strides = [1, 1, 1, 1]} : vector<1x18x16x384xbf16> to vector<1x16x16x384xbf16>
    %33 = vector.shape_cast %32 : vector<1x16x16x384xbf16> to vector<256x384xbf16>
    %c2 = arith.constant 2 : index
    %c0_16 = arith.constant 0 : index
    %c0_17 = arith.constant 0 : index
    %34 = vector.load %arg4[%c2, %c0_16, %c0_17] : memref<3x384x128xbf16, #tpu.memory_space<vmem>>, vector<1x384x128xbf16>
    %35 = vector.shape_cast %34 : vector<1x384x128xbf16> to vector<384x128xbf16>
    %cst_18 = arith.constant dense<0.000000e+00> : vector<256x128xf32>
    %36 = tpu.matmul %33, %35, %cst_18 {dimension_numbers = #tpu.dot_dimension_numbers<[1], [0], [0], [1], [0, 0, 1, 1], [], []>} : vector<256x384xbf16>, vector<384x128xbf16>, vector<256x128xf32> -> vector<256x128xf32>
    %37 = arith.addf %31, %36 : vector<256x128xf32>
    %38 = vector.shape_cast %37 : vector<256x128xf32> to vector<1x16x16x128xf32>
    %39 = arith.truncf %38 : vector<1x16x16x128xf32> to vector<1x16x16x128xbf16>
    %c0_19 = arith.constant 0 : index
    %c0_20 = arith.constant 0 : index
    %c0_21 = arith.constant 0 : index
    %c0_22 = arith.constant 0 : index
    %40 = vector.load %arg5[%c0_19, %c0_20, %c0_21, %c0_22] : memref<1x16x16x128xbf16, #tpu.memory_space<vmem>>, vector<1x16x16x128xbf16>
    tpu.vector_store %arg5[%c0_19, %c0_20, %c0_21, %c0_22], %39 {strides = array<i32>} : memref<1x16x16x128xbf16, #tpu.memory_space<vmem>>, vector<1x16x16x128xbf16>,
    %cst_23 = arith.constant dense<0.000000e+00> : vector<128xf32>
    %41 = vector.multi_reduction <add>, %37, %cst_23 [0] : vector<256x128xf32> to vector<128xf32>
    %42 = vector.shape_cast %41 : vector<128xf32> to vector<1x128xf32>
    %43 = vector.shape_cast %42 : vector<1x128xf32> to vector<1x1x128xf32>
    %c0_24 = arith.constant 0 : index
    %c0_25 = arith.constant 0 : index
    %c0_26 = arith.constant 0 : index
    %44 = vector.load %arg6[%c0_24, %c0_25, %c0_26] : memref<1x1x128xf32, #tpu.memory_space<vmem>>, vector<1x1x128xf32>
    tpu.vector_store %arg6[%c0_24, %c0_25, %c0_26], %43 {strides = array<i32>} : memref<1x1x128xf32, #tpu.memory_space<vmem>>, vector<1x1x128xf32>,
    %45 = arith.mulf %37, %37 : vector<256x128xf32>
    %cst_27 = arith.constant dense<0.000000e+00> : vector<128xf32>
    %46 = vector.multi_reduction <add>, %45, %cst_27 [0] : vector<256x128xf32> to vector<128xf32>
    %47 = vector.shape_cast %46 : vector<128xf32> to vector<1x128xf32>
    %48 = vector.shape_cast %47 : vector<1x128xf32> to vector<1x1x128xf32>
    %c0_28 = arith.constant 0 : index
    %c0_29 = arith.constant 0 : index
    %c0_30 = arith.constant 0 : index
    %49 = vector.load %arg7[%c0_28, %c0_29, %c0_30] : memref<1x1x128xf32, #tpu.memory_space<vmem>>, vector<1x1x128xf32>
    tpu.vector_store %arg7[%c0_28, %c0_29, %c0_30], %48 {strides = array<i32>} : memref<1x1x128xf32, #tpu.memory_space<vmem>>, vector<1x1x128xf32>,
    return
  }
  func.func @transform_0(%arg0: i32) -> (i32, i32, i32, i32) {
    %c0_i32 = arith.constant 0 : i32
    %c0_i32_0 = arith.constant 0 : i32
    %c0_i32_1 = arith.constant 0 : i32
    %c0_i32_2 = arith.constant 0 : i32
    return %arg0, %c0_i32, %c0_i32_0, %c0_i32_1 : i32, i32, i32, i32
  }
  func.func @transform_1(%arg0: i32) -> (i32, i32) {
    %c0_i32 = arith.constant 0 : i32
    %c0_i32_0 = arith.constant 0 : i32
    %c0_i32_1 = arith.constant 0 : i32
    return %c0_i32, %c0_i32_0 : i32, i32
  }
  func.func @transform_2(%arg0: i32) -> (i32, i32) {
    %c0_i32 = arith.constant 0 : i32
    %c0_i32_0 = arith.constant 0 : i32
    %c0_i32_1 = arith.constant 0 : i32
    return %c0_i32, %c0_i32_0 : i32, i32
  }
  func.func @transform_3(%arg0: i32) -> (i32, i32, i32) {
    %c0_i32 = arith.constant 0 : i32
    %c0_i32_0 = arith.constant 0 : i32
    %c0_i32_1 = arith.constant 0 : i32
    %c0_i32_2 = arith.constant 0 : i32
    return %c0_i32, %c0_i32_0, %c0_i32_1 : i32, i32, i32
  }
  func.func @transform_4(%arg0: i32) -> (i32, i32, i32, i32) {
    %c0_i32 = arith.constant 0 : i32
    %c0_i32_0 = arith.constant 0 : i32
    %c0_i32_1 = arith.constant 0 : i32
    %c0_i32_2 = arith.constant 0 : i32
    return %arg0, %c0_i32, %c0_i32_0, %c0_i32_1 : i32, i32, i32, i32
  }
  func.func @transform_5(%arg0: i32) -> (i32, i32, i32) {
    %c0_i32 = arith.constant 0 : i32
    %c0_i32_0 = arith.constant 0 : i32
    %c0_i32_1 = arith.constant 0 : i32
    return %arg0, %c0_i32, %c0_i32_0 : i32, i32, i32
  }
  func.func @transform_6(%arg0: i32) -> (i32, i32, i32) {
    %c0_i32 = arith.constant 0 : i32
    %c0_i32_0 = arith.constant 0 : i32
    %c0_i32_1 = arith.constant 0 : i32
    return %arg0, %c0_i32, %c0_i32_0 : i32, i32, i32
  }
}

module attributes {stable_mosaic.version = 11 : i64} {
  func.func @_bn_relu_out_kernel(%arg0: i32, %arg1: memref<1x16x16x128xbf16, #tpu.memory_space<vmem>>, %arg2: memref<1x128xf32, #tpu.memory_space<vmem>>, %arg3: memref<1x128xf32, #tpu.memory_space<vmem>>, %arg4: memref<1x16x16x8xf32, #tpu.memory_space<vmem>>) attributes {dimension_semantics = [#tpu.dimension_semantics<parallel>], iteration_bounds = array<i64: 2>, scalar_prefetch = 0 : i64, scratch_operands = 0 : i64, tpu.core_type = #tpu.core_type<tc>, window_params = [{transform_indices = @transform_0, window_bounds = array<i64: 1, 16, 16, 128>}, {pipeline_mode = #tpu.pipeline_mode<synchronous>, transform_indices = @transform_1, window_bounds = array<i64: 1, 128>}, {pipeline_mode = #tpu.pipeline_mode<synchronous>, transform_indices = @transform_2, window_bounds = array<i64: 1, 128>}, {transform_indices = @transform_3, window_bounds = array<i64: 1, 16, 16, 8>}]} {
    %c0 = arith.constant 0 : index
    %c0_0 = arith.constant 0 : index
    %c0_1 = arith.constant 0 : index
    %c0_2 = arith.constant 0 : index
    %0 = vector.load %arg1[%c0, %c0_0, %c0_1, %c0_2] : memref<1x16x16x128xbf16, #tpu.memory_space<vmem>>, vector<1x16x16x128xbf16>
    %1 = arith.extf %0 : vector<1x16x16x128xbf16> to vector<1x16x16x128xf32>
    %c0_3 = arith.constant 0 : index
    %c0_4 = arith.constant 0 : index
    %2 = vector.load %arg2[%c0_3, %c0_4] : memref<1x128xf32, #tpu.memory_space<vmem>>, vector<1x128xf32>
    %3 = vector.shape_cast %2 : vector<1x128xf32> to vector<1x1x1x128xf32>
    %4 = vector.broadcast %3 : vector<1x1x1x128xf32> to vector<1x16x16x128xf32>
    %5 = arith.mulf %1, %4 : vector<1x16x16x128xf32>
    %c0_5 = arith.constant 0 : index
    %c0_6 = arith.constant 0 : index
    %6 = vector.load %arg3[%c0_5, %c0_6] : memref<1x128xf32, #tpu.memory_space<vmem>>, vector<1x128xf32>
    %7 = vector.shape_cast %6 : vector<1x128xf32> to vector<1x1x1x128xf32>
    %8 = vector.broadcast %7 : vector<1x1x1x128xf32> to vector<1x16x16x128xf32>
    %9 = arith.addf %5, %8 : vector<1x16x16x128xf32>
    %cst = arith.constant 0.000000e+00 : f32
    %10 = vector.broadcast %cst : f32 to vector<1x16x16x128xf32>
    %11 = arith.maximumf %9, %10 : vector<1x16x16x128xf32>
    %12 = vector.extract_strided_slice %11 {offsets = [0, 0, 0, 0], sizes = [1, 16, 16, 8], strides = [1, 1, 1, 1]} : vector<1x16x16x128xf32> to vector<1x16x16x8xf32>
    %c0_7 = arith.constant 0 : index
    %c0_8 = arith.constant 0 : index
    %c0_9 = arith.constant 0 : index
    %c0_10 = arith.constant 0 : index
    %13 = vector.load %arg4[%c0_7, %c0_8, %c0_9, %c0_10] : memref<1x16x16x8xf32, #tpu.memory_space<vmem>>, vector<1x16x16x8xf32>
    tpu.vector_store %arg4[%c0_7, %c0_8, %c0_9, %c0_10], %12 {strides = array<i32>} : memref<1x16x16x8xf32, #tpu.memory_space<vmem>>, vector<1x16x16x8xf32>,
    return
  }
  func.func @transform_0(%arg0: i32) -> (i32, i32, i32, i32) {
    %c0_i32 = arith.constant 0 : i32
    %c0_i32_0 = arith.constant 0 : i32
    %c0_i32_1 = arith.constant 0 : i32
    %c0_i32_2 = arith.constant 0 : i32
    return %arg0, %c0_i32, %c0_i32_0, %c0_i32_1 : i32, i32, i32, i32
  }
  func.func @transform_1(%arg0: i32) -> (i32, i32) {
    %c0_i32 = arith.constant 0 : i32
    %c0_i32_0 = arith.constant 0 : i32
    %c0_i32_1 = arith.constant 0 : i32
    return %c0_i32, %c0_i32_0 : i32, i32
  }
  func.func @transform_2(%arg0: i32) -> (i32, i32) {
    %c0_i32 = arith.constant 0 : i32
    %c0_i32_0 = arith.constant 0 : i32
    %c0_i32_1 = arith.constant 0 : i32
    return %c0_i32, %c0_i32_0 : i32, i32
  }
  func.func @transform_3(%arg0: i32) -> (i32, i32, i32, i32) {
    %c0_i32 = arith.constant 0 : i32
    %c0_i32_0 = arith.constant 0 : i32
    %c0_i32_1 = arith.constant 0 : i32
    %c0_i32_2 = arith.constant 0 : i32
    return %arg0, %c0_i32, %c0_i32_0, %c0_i32_1 : i32, i32, i32, i32
  }
}

</mosaic_0001>

<bundles_post_ra>
// kernel: double_conv_pallas.5
= control target key start
LH: loop header
LB: loop body
LE: loop exit
PB: predicated region body
PF: predicated region fallthrough
CT: control target
= control target key end

     0   :  { %s563_s12 = smov 0   ;;  %s742_s0 = inlined_call_operand.vmem [shape: bf16[2,16,16,128], index: 0, kind: input, shape index: {}]   ;;  %s743_s1 = inlined_call_operand.vmem [shape: f32[1,128], index: 1, kind: input, shape index: {}]   ;;  %s744_s2 = inlined_call_operand.vmem [shape: f32[1,128], index: 2, kind: input, shape index: {}]   ;;  %s745_s3 = inlined_call_operand.vmem [shape: f32[2,16,16,8], index: 3, kind: output, shape index: {}]  }
   0x1 LB: > { %s433_s13 = sadd.s32 4294967295, %s541_s12   ;;  %p437_p0 = scmp.ge.s32.totalorder %s541_s12, 1  ;;  %s541_s12 = sphi %s563_s12, %s13_s12  }
   0x2   : > { %p137_p1 = scmp.lt.s32.totalorder %s541_s12, 3 }
   0x4   : > { %p138_p2 = pnand %p437_p0, %p137_p1 }
   0x5   : > { %p161_p3 = scmp.lt.s32.totalorder (!%p138_p2), %s433_s13, 1  ;;  %v582_v0 = vld [vmem:[%s743_s1] ss:$0 sm:$0xff] (!%p138_p2)  ;;  %vm345_vm0 = vcmask (!%p138_p2), 64512  }
   0x6   : > { %141 = sbr.rel (%p138_p2) target bundleno = 53 (0x35), region = 32  ;;  %v591_v9 = vld [vmem:[%s744_s2] ss:$0 sm:$0xff] (!%p138_p2) }
   0xd   : > { %s747_s13 = smov (!%p161_p3, %s433_s13), 1 }
   0xe   : > { %s446_s14 = sshll.u32 %s747_s13, 7  ;;  %s447_s22 = sshll.u32 %s747_s13, 8 }
   0xf   : > { %s577_s17 = scalar_lea.vmem %s742_s0, %s446_s14  ;;  %s609_s25 = scalar_lea.vmem %s745_s3, %s447_s22 }
  0x10   : > { %v449_v1 = vld [vmem:[%s577_s17] sm:$0xff]   ;;  %v512_v2 = vld [vmem:[%s577_s17 + $0x8] sm:$0xff]   ;;  %v513_v3 = vld [vmem:[%s577_s17 + $0x10] sm:$0xff]  }
  0x11   : > { %v450_v4 = vunpack.c.l.bf16 %v449_v1  ;;  %v451_v5 = vunpack.c.h.bf16 %v449_v1  ;;  %v454_v6 = vunpack.c.l.bf16 %v512_v2  ;;  %v455_v7 = vunpack.c.h.bf16 %v512_v2  ;;  %v514_v8 = vld [vmem:[%s577_s17 + $0x18] sm:$0xff]   ;;  %v515_v30 = vld [vmem:[%s577_s17 + $0x20] sm:$0xff]   ;;  %v516_v31 = vld [vmem:[%s577_s17 + $0x28] sm:$0xff]  }
  0x12   : > { %v458_v10 = vunpack.c.l.bf16 %v513_v3  ;;  %v459_v11 = vunpack.c.h.bf16 %v513_v3  ;;  %v462_v12 = vunpack.c.l.bf16 %v514_v8  ;;  %v463_v13 = vunpack.c.h.bf16 %v514_v8  ;;  %v517_v36 = vld [vmem:[%s577_s17 + $0x30] sm:$0xff]   ;;  %v518_v37 = vld [vmem:[%s577_s17 + $0x38] sm:$0xff]   ;;  %v519_v3 = vld [vmem:[%s577_s17 + $0x40] sm:$0xff]  }
  0x13   : > { %v242_v14 = vmul.f32 %v450_v4, %v582_v0  ;;  %v243_v15 = vmul.f32 %v451_v5, %v582_v0  ;;  %v244_v16 = vmul.f32 %v454_v6, %v582_v0  ;;  %v245_v17 = vmul.f32 %v455_v7, %v582_v0  ;;  %v520_v4 = vld [vmem:[%s577_s17 + $0x48] sm:$0xff]  }
  0x14   : > { %v246_v18 = vmul.f32 %v458_v10, %v582_v0  ;;  %v247_v19 = vmul.f32 %v459_v11, %v582_v0  ;;  %v248_v20 = vmul.f32 %v462_v12, %v582_v0  ;;  %v249_v21 = vmul.f32 %v463_v13, %v582_v0  ;;  %v521_v10 = vld [vmem:[%s577_s17 + $0x50] sm:$0xff]   ;;  %v522_v11 = vld [vmem:[%s577_s17 + $0x58] sm:$0xff]  }
  0x15   : > { %v281_v22 = vadd.f32 %v591_v9, %v242_v14  ;;  %v282_v23 = vadd.f32 %v591_v9, %v243_v15  ;;  %v283_v24 = vadd.f32 %v591_v9, %v244_v16  ;;  %v284_v25 = vadd.f32 %v591_v9, %v245_v17 }
  0x16   : > { %v285_v26 = vadd.f32 %v591_v9, %v246_v18  ;;  %v286_v27 = vadd.f32 %v591_v9, %v247_v19  ;;  %v287_v28 = vadd.f32 %v591_v9, %v248_v20  ;;  %v288_v29 = vadd.f32 %v591_v9, %v249_v21 }
  0x17   : > { %v313_v32 = vmax.f32 %v281_v22, 0.0  ;;  %v314_v33 = vmax.f32 %v282_v23, 0.0  ;;  %v315_v34 = vmax.f32 %v283_v24, 0.0  ;;  %v316_v35 = vmax.f32 %v284_v25, 0.0 }
  0x18   : > { %v317_v38 = vmax.f32 %v285_v26, 0.0  ;;  %v318_v39 = vmax.f32 %v286_v27, 0.0  ;;  %v319_v40 = vmax.f32 %v287_v28, 0.0  ;;  %v320_v41 = vmax.f32 %v288_v29, 0.0 }
  0x19   : > { %346 = vst.msk [vmem:[%s609_s25] sm:$0xff] %vm345_vm0, %v313_v32  ;;  %347 = vst.msk [vmem:[%s609_s25 + $0x8] sm:$0xff] %vm345_vm0, %v314_v33  ;;  %v466_v42 = vunpack.c.l.bf16 %v515_v30  ;;  %v467_v43 = vunpack.c.h.bf16 %v515_v30  ;;  %v470_v44 = vunpack.c.l.bf16 %v516_v31  ;;  %v471_v45 = vunpack.c.h.bf16 %v516_v31 }
  0x1a   : > { %348 = vst.msk [vmem:[%s609_s25 + $0x10] sm:$0xff] %vm345_vm0, %v315_v34  ;;  %349 = vst.msk [vmem:[%s609_s25 + $0x18] sm:$0xff] %vm345_vm0, %v316_v35  ;;  %v474_v46 = vunpack.c.l.bf16 %v517_v36  ;;  %v475_v47 = vunpack.c.h.bf16 %v517_v36  ;;  %v478_v48 = vunpack.c.l.bf16 %v518_v37  ;;  %v479_v49 = vunpack.c.h.bf16 %v518_v37 }
  0x1b   : > { %350 = vst.msk [vmem:[%s609_s25 + $0x20] sm:$0xff] %vm345_vm0, %v317_v38  ;;  %351 = vst.msk [vmem:[%s609_s25 + $0x28] sm:$0xff] %vm345_vm0, %v318_v39  ;;  %v250_v50 = vmul.f32 %v466_v42, %v582_v0  ;;  %v251_v51 = vmul.f32 %v467_v43, %v582_v0  ;;  %v252_v52 = vmul.f32 %v470_v44, %v582_v0  ;;  %v482_v16 = vunpack.c.l.bf16 %v519_v3 }
  0x1c   : > { %352 = vst.msk [vmem:[%s609_s25 + $0x30] sm:$0xff] %vm345_vm0, %v319_v40  ;;  %353 = vst.msk [vmem:[%s609_s25 + $0x38] sm:$0xff] %vm345_vm0, %v320_v41  ;;  %v253_v53 = vmul.f32 %v471_v45, %v582_v0  ;;  %v254_v54 = vmul.f32 %v474_v46, %v582_v0  ;;  %v255_v55 = vmul.f32 %v475_v47, %v582_v0  ;;  %v483_v17 = vunpack.c.h.bf16 %v519_v3  ;;  %v523_v40 = vld [vmem:[%s577_s17 + $0x60] sm:$0xff]   ;;  %v524_v41 = vld [vmem:[%s577_s17 + $0x68] sm:$0xff]  }
  0x1d   : > { %v256_v56 = vmul.f32 %v478_v48, %v582_v0  ;;  %v257_v57 = vmul.f32 %v479_v49, %v582_v0  ;;  %v289_v58 = vadd.f32 %v591_v9, %v250_v50  ;;  %v290_v59 = vadd.f32 %v591_v9, %v251_v51  ;;  %v525_v46 = vld [vmem:[%s577_s17 + $0x70] sm:$0xff]   ;;  %v526_v47 = vld [vmem:[%s577_s17 + $0x78] sm:$0xff]  }
  0x1e   : > { %v291_v60 = vadd.f32 %v591_v9, %v252_v52  ;;  %v292_v61 = vadd.f32 %v591_v9, %v253_v53  ;;  %v293_v62 = vadd.f32 %v591_v9, %v254_v54  ;;  %v294_v63 = vadd.f32 %v591_v9, %v255_v55 }
  0x1f   : > { %v295_v1 = vadd.f32 %v591_v9, %v256_v56  ;;  %v296_v2 = vadd.f32 %v591_v9, %v257_v57  ;;  %v321_v5 = vmax.f32 %v289_v58, 0.0  ;;  %v322_v6 = vmax.f32 %v290_v59, 0.0 }
  0x20   : > { %v323_v7 = vmax.f32 %v291_v60, 0.0  ;;  %v324_v8 = vmax.f32 %v292_v61, 0.0  ;;  %v325_v12 = vmax.f32 %v293_v62, 0.0  ;;  %v326_v13 = vmax.f32 %v294_v63, 0.0 }
  0x21   : > { %v327_v14 = vmax.f32 %v295_v1, 0.0  ;;  %v328_v15 = vmax.f32 %v296_v2, 0.0  ;;  %354 = vst.msk [vmem:[%s609_s25 + $0x40] sm:$0xff] %vm345_vm0, %v321_v5  ;;  %355 = vst.msk [vmem:[%s609_s25 + $0x48] sm:$0xff] %vm345_vm0, %v322_v6  ;;  %v486_v18 = vunpack.c.l.bf16 %v520_v4  ;;  %v487_v19 = vunpack.c.h.bf16 %v520_v4 }
  0x22   : > { %356 = vst.msk [vmem:[%s609_s25 + $0x50] sm:$0xff] %vm345_vm0, %v323_v7  ;;  %357 = vst.msk [vmem:[%s609_s25 + $0x58] sm:$0xff] %vm345_vm0, %v324_v8  ;;  %v490_v20 = vunpack.c.l.bf16 %v521_v10  ;;  %v491_v21 = vunpack.c.h.bf16 %v521_v10  ;;  %v494_v22 = vunpack.c.l.bf16 %v522_v11  ;;  %v495_v23 = vunpack.c.h.bf16 %v522_v11 }
  0x23   : > { %358 = vst.msk [vmem:[%s609_s25 + $0x60] sm:$0xff] %vm345_vm0, %v325_v12  ;;  %359 = vst.msk [vmem:[%s609_s25 + $0x68] sm:$0xff] %vm345_vm0, %v326_v13  ;;  %v258_v24 = vmul.f32 %v482_v16, %v582_v0  ;;  %v259_v25 = vmul.f32 %v483_v17, %v582_v0  ;;  %v260_v26 = vmul.f32 %v486_v18, %v582_v0  ;;  %v498_v52 = vunpack.c.l.bf16 %v523_v40 }
  0x24   : > { %360 = vst.msk [vmem:[%s609_s25 + $0x70] sm:$0xff] %vm345_vm0, %v327_v14  ;;  %361 = vst.msk [vmem:[%s609_s25 + $0x78] sm:$0xff] %vm345_vm0, %v328_v15  ;;  %v261_v27 = vmul.f32 %v487_v19, %v582_v0  ;;  %v262_v28 = vmul.f32 %v490_v20, %v582_v0  ;;  %v263_v29 = vmul.f32 %v491_v21, %v582_v0  ;;  %v499_v53 = vunpack.c.h.bf16 %v523_v40 }
  0x25   : > { %v264_v30 = vmul.f32 %v494_v22, %v582_v0  ;;  %v265_v31 = vmul.f32 %v495_v23, %v582_v0  ;;  %v297_v32 = vadd.f32 %v591_v9, %v258_v24  ;;  %v298_v33 = vadd.f32 %v591_v9, %v259_v25 }
  0x26   : > { %v299_v34 = vadd.f32 %v591_v9, %v260_v26  ;;  %v300_v35 = vadd.f32 %v591_v9, %v261_v27  ;;  %v301_v36 = vadd.f32 %v591_v9, %v262_v28  ;;  %v302_v37 = vadd.f32 %v591_v9, %v263_v29 }
  0x27   : > { %v303_v38 = vadd.f32 %v591_v9, %v264_v30  ;;  %v304_v39 = vadd.f32 %v591_v9, %v265_v31  ;;  %v329_v42 = vmax.f32 %v297_v32, 0.0  ;;  %v330_v43 = vmax.f32 %v298_v33, 0.0 }
  0x28   : > { %v331_v44 = vmax.f32 %v299_v34, 0.0  ;;  %v332_v45 = vmax.f32 %v300_v35, 0.0  ;;  %v333_v48 = vmax.f32 %v301_v36, 0.0  ;;  %v334_v49 = vmax.f32 %v302_v37, 0.0 }
  0x29   : > { %v335_v50 = vmax.f32 %v303_v38, 0.0  ;;  %v336_v51 = vmax.f32 %v304_v39, 0.0  ;;  %362 = vst.msk [vmem:[%s609_s25 + $0x80] sm:$0xff] %vm345_vm0, %v329_v42  ;;  %363 = vst.msk [vmem:[%s609_s25 + $0x88] sm:$0xff] %vm345_vm0, %v330_v43  ;;  %v502_v54 = vunpack.c.l.bf16 %v524_v41  ;;  %v503_v55 = vunpack.c.h.bf16 %v524_v41 }
  0x2a   : > { %364 = vst.msk [vmem:[%s609_s25 + $0x90] sm:$0xff] %vm345_vm0, %v331_v44  ;;  %365 = vst.msk [vmem:[%s609_s25 + $0x98] sm:$0xff] %vm345_vm0, %v332_v45  ;;  %v506_v56 = vunpack.c.l.bf16 %v525_v46  ;;  %v507_v57 = vunpack.c.h.bf16 %v525_v46  ;;  %v510_v58 = vunpack.c.l.bf16 %v526_v47  ;;  %v511_v59 = vunpack.c.h.bf16 %v526_v47 }
  0x2b   : > { %366 = vst.msk [vmem:[%s609_s25 + $0xa0] sm:$0xff] %vm345_vm0, %v333_v48  ;;  %367 = vst.msk [vmem:[%s609_s25 + $0xa8] sm:$0xff] %vm345_vm0, %v334_v49  ;;  %v266_v60 = vmul.f32 %v498_v52, %v582_v0  ;;  %v267_v61 = vmul.f32 %v499_v53, %v582_v0  ;;  %v268_v62 = vmul.f32 %v502_v54, %v582_v0 }
  0x2c   : > { %368 = vst.msk [vmem:[%s609_s25 + $0xb0] sm:$0xff] %vm345_vm0, %v335_v50  ;;  %369 = vst.msk [vmem:[%s609_s25 + $0xb8] sm:$0xff] %vm345_vm0, %v336_v51  ;;  %v269_v63 = vmul.f32 %v503_v55, %v582_v0  ;;  %v270_v1 = vmul.f32 %v506_v56, %v582_v0  ;;  %v271_v2 = vmul.f32 %v507_v57, %v582_v0 }
  0x2d   : > { %v272_v3 = vmul.f32 %v510_v58, %v582_v0  ;;  %v273_v4 = vmul.f32 %v511_v59, %v582_v0  ;;  %v305_v5 = vadd.f32 %v591_v9, %v266_v60  ;;  %v306_v6 = vadd.f32 %v591_v9, %v267_v61 }
  0x2e   : > { %v307_v7 = vadd.f32 %v591_v9, %v268_v62  ;;  %v308_v8 = vadd.f32 %v591_v9, %v269_v63  ;;  %v309_v10 = vadd.f32 %v591_v9, %v270_v1  ;;  %v310_v11 = vadd.f32 %v591_v9, %v271_v2 }
  0x2f   : > { %v311_v0 = vadd.f32 %v591_v9, %v272_v3  ;;  %v312_v12 = vadd.f32 %v591_v9, %v273_v4  ;;  %v337_v13 = vmax.f32 %v305_v5, 0.0  ;;  %v338_v14 = vmax.f32 %v306_v6, 0.0 }
  0x30   : > { %v339_v15 = vmax.f32 %v307_v7, 0.0  ;;  %v340_v16 = vmax.f32 %v308_v8, 0.0  ;;  %v341_v17 = vmax.f32 %v309_v10, 0.0  ;;  %v342_v18 = vmax.f32 %v310_v11, 0.0 }
  0x31   : > { %v343_v19 = vmax.f32 %v311_v0, 0.0  ;;  %v344_v20 = vmax.f32 %v312_v12, 0.0  ;;  %370 = vst.msk [vmem:[%s609_s25 + $0xc0] sm:$0xff] %vm345_vm0, %v337_v13  ;;  %371 = vst.msk [vmem:[%s609_s25 + $0xc8] sm:$0xff] %vm345_vm0, %v338_v14 }
  0x32   : > { %372 = vst.msk [vmem:[%s609_s25 + $0xd0] sm:$0xff] %vm345_vm0, %v339_v15  ;;  %373 = vst.msk [vmem:[%s609_s25 + $0xd8] sm:$0xff] %vm345_vm0, %v340_v16 }
  0x33   : > { %374 = vst.msk [vmem:[%s609_s25 + $0xe0] sm:$0xff] %vm345_vm0, %v341_v17  ;;  %375 = vst.msk [vmem:[%s609_s25 + $0xe8] sm:$0xff] %vm345_vm0, %v342_v18 }
  0x34   : > { %376 = vst.msk [vmem:[%s609_s25 + $0xf0] sm:$0xff] %vm345_vm0, %v343_v19  ;;  %377 = vst.msk [vmem:[%s609_s25 + $0xf8] sm:$0xff] %vm345_vm0, %v344_v20 }
  0x35 PF: > { %s13_s12 = sadd.s32 1, %s541_s12  }
  0x36   : > { %p10_p4 = scmp.ge.s32.totalorder %s13_s12, 4  }
  0x38   :  { %12 = sbr.rel (!%p10_p4) target bundleno = 1 (0x1), region = 62 }

// kernel: double_conv_pallas.3
= control target key start
LH: loop header
LB: loop body
LE: loop exit
PB: predicated region body
PF: predicated region fallthrough
CT: control target
= control target key end

     0   :  { %s4163_s15 = smov 0   ;;  %s4917_s0 = inlined_call_operand.vmem [shape: bf16[2,16,16,4], index: 0, kind: input, shape index: {}]   ;;  %s4918_s1 = inlined_call_operand.vmem [shape: bf16[9,4,128], index: 1, kind: input, shape index: {}]   ;;  %s4919_s2 = inlined_call_operand.vmem [shape: bf16[2,16,16,128], index: 2, kind: output, shape index: {0}]   ;;  %s4920_s3 = inlined_call_operand.vmem [shape: f32[2,1,128], index: 3, kind: output, shape index: {1}]   ;;  %s4921_s4 = inlined_call_operand.vmem [shape: f32[2,1,128], index: 4, kind: output, shape index: {2}]  }
   0x1 LB: > { %s3037_s16 = sadd.s32 4294967295, %s4135_s15   ;;  %p3041_p0 = scmp.ge.s32.totalorder %s4135_s15, 1  ;;  %s4135_s15 = sphi %s4163_s15, %s15_s15  }
   0x2   : > { %p167_p1 = scmp.lt.s32.totalorder %s4135_s15, 3 }
   0x4   : > { %p168_p2 = pnand %p3041_p0, %p167_p1 }
   0x6   : > { %171 = sbr.rel (%p168_p2) target bundleno = 553 (0x229), region = 28 }
   0xd   : > { %v3062_v0 = vld [vmem:[%s4918_s1 + $0x2] sm:$0x3]  ;;  %vm763_vm0 = vcmask 1041408   ;;  %v4177_v1 = vld [vmem:[%s4918_s1 + $0x8] sm:$0x3]  ;;  %v4137_v4 = vmov 0  }
   0xe   : > { %4094 = vmatprep.subr.msk.bf16.mxu1 %vm763_vm0, %v3062_v0  ;;  %4098 = vmatprep.subr.msk.bf16.mxu0 %vm763_vm0, %v4177_v1  ;;  %v765_v2 = vsel %vm763_vm0, %v3062_v0, 0  ;;  %v4185_v3 = vsel %vm763_vm0, %v4177_v1, 0  ;;  %v331_v5 = vrot.slane %v4137_v4, 7  ;;  %vm481_vm1 = vcmask 1040384   ;;  %p199_p3 = scmp.lt.s32.totalorder %s3037_s16, 1 }
   0xf   : > { %3531 = vmatpush3.bf16.msra.mxu1 %v765_v2  ;;  %3667 = vmatpush3.bf16.msra.mxu0 %v4185_v3  ;;  %vm482_vm2 = vsmask.f32 256  ;;  %v518_v7 = vld [vmem:[%s4918_s1] sm:$0x3]  ;;  %v3146_v8 = vld [vmem:[%s4918_s1 + $0xa] sm:$0x3] }
  0x10   : > { %vm4188_vm3 = vmand %vm481_vm1, %vm482_vm2  ;;  %s4932_s16 = smov (!%p199_p3, %s3037_s16), 1  ;;  %4095 = vmatprep.subr.msk.bf16.mxu1 %vm763_vm0, %v518_v7  ;;  %4100 = vmatprep.subr.msk.bf16.mxu0 %vm763_vm0, %v3146_v8  ;;  %vm519_vm4 = vsmask.f32 7424  ;;  %vm714_vm5 = vcmask 31744   ;;  %v961_v30 = vsel %vm763_vm0, %v518_v7, 0  ;;  %v1875_v32 = vsel %vm763_vm0, %v3146_v8, 0 }
  0x11   : > { %v4202_v9 = vsel %vm4188_vm3, 0, %v331_v5  ;;  %v4206_v10 = vsel %vm4188_vm3, %v331_v5, 0  ;;  %s3248_s25 = sshll.u32 %s4932_s16, 7  ;;  %vm1156_vm6 = vcmask 1046528   ;;  %s211_s20 = scalar_lea.vmem %s4920_s3, %s4932_s16 }
  0x12   : > { %v521_v11 = vshrl.u32 %v4202_v9, 16  ;;  %v523_v12 = vshll.u32 %v4202_v9, 16  ;;  %v528_v13 = vshll.u32 %v4206_v10, 16  ;;  %s4219_s28 = scalar_lea.vmem %s4917_s0, %s3248_s25  ;;  %s4884_s17 = scalar_lea.vmem %s4919_s2, %s3248_s25 }
  0x13   : > { %v4113_v16 = vld [vmem:[%s4219_s28] sm:$0xff]   ;;  %v4114_v18 = vld [vmem:[%s4219_s28 + $0x8] sm:$0xff]   ;;  %v4115_v21 = vld [vmem:[%s4219_s28 + $0x10] sm:$0xff]   ;;  %s214_s23 = scalar_lea.vmem %s4921_s4, %s4932_s16 }
  0x14   : > { %v525_v14 = vrot.slane %v523_v12, 1  ;;  %v530_v15 = vrot.slane %v528_v13, 1  ;;  %v336_v19 = vshrl.u32 %v4113_v16, 16  ;;  %v339_v20 = vshll.u32 %v4113_v16, 16  ;;  %v4116_v22 = vld [vmem:[%s4219_s28 + $0x18] sm:$0xff]   ;;  %v4117_v33 = vld [vmem:[%s4219_s28 + $0x20] sm:$0xff]  }
  0x15   : > { %v343_v24 = vshrl.u32 %v4114_v18, 16  ;;  %v346_v25 = vshll.u32 %v4114_v18, 16  ;;  %v350_v27 = vshrl.u32 %v4115_v21, 16  ;;  %v353_v28 = vshll.u32 %v4115_v21, 16  ;;  %v4118_v62 = vld [vmem:[%s4219_s28 + $0x28] sm:$0xff]   ;;  %v4119_v5 = vld [vmem:[%s4219_s28 + $0x30] sm:$0xff]  }
  0x16   : > { %v526_v17 = vor.u32 %v525_v14, %v521_v11  ;;  %v338_v26 = vrot.slane %v336_v19, 7  ;;  %v357_v29 = vshrl.u32 %v4116_v22, 16  ;;  %v360_v37 = vshll.u32 %v4116_v22, 16  ;;  %v4120_v13 = vld [vmem:[%s4219_s28 + $0x38] sm:$0xff]   ;;  %v4281_v14 = vld [vmem:[%s4918_s1 + $0xc] sm:$0x3] }
  0x17   : > { %v345_v31 = vrot.slane %v343_v24, 7  ;;  %v352_v36 = vrot.slane %v350_v27, 7  ;;  %v364_v45 = vshrl.u32 %v4117_v33, 16  ;;  %v367_v12 = vshll.u32 %v4117_v33, 16  ;;  %v4289_v19 = vld [vmem:[%s4918_s1 + $0x4] sm:$0x3] }
  0x18   : > { %v4226_v23 = vsel %vm519_vm4, %v526_v17, %v530_v15  ;;  %v341_v34 = vor.u32 %v339_v20, %v338_v26  ;;  %v4235_v35 = vsel %vm4188_vm3, %v338_v26, 0  ;;  %v359_v41 = vrot.slane %v357_v29, 7  ;;  %v4121_v29 = vld [vmem:[%s4219_s28 + $0x40] sm:$0xff]  }
  0x19   : > { %4927 = vst [vmem:[#allocation2_spill] sm:$0xff] %v4226_v23  ;;  %3532 = vmatprep.mubr.msk.bf16.mxu1 %vm714_vm5, %v4226_v23  ;;  %v540_v38 = vshll.u32 %v4235_v35, 16  ;;  %v348_v39 = vor.u32 %v346_v25, %v345_v31  ;;  %v4240_v40 = vsel %vm4188_vm3, %v345_v31, 0  ;;  %v355_v44 = vor.u32 %v353_v28, %v352_v36 }
  0x1a   : > { %v4244_v42 = vsel %vm4188_vm3, 0, %v341_v34  ;;  %v552_v43 = vshll.u32 %v4240_v40, 16  ;;  %v4261_v55 = vsel %vm4188_vm3, %v352_v36, 0  ;;  %v362_v60 = vor.u32 %v360_v37, %v359_v41 }
  0x1b   : > { %v533_v46 = vshrl.u32 %v4244_v42, 16  ;;  %v535_v47 = vshll.u32 %v4244_v42, 16  ;;  %v542_v48 = vrot.slane %v540_v38, 1  ;;  %v4251_v49 = vsel %vm4188_vm3, 0, %v348_v39 }
  0x1c   : > { %v545_v50 = vshrl.u32 %v4251_v49, 16  ;;  %v547_v51 = vshll.u32 %v4251_v49, 16  ;;  %v554_v52 = vrot.slane %v552_v43, 1  ;;  %v4257_v53 = vsel %vm4188_vm3, 0, %v355_v44 }
  0x1d   : > { %v537_v54 = vrot.slane %v535_v47, 1  ;;  %v557_v56 = vshrl.u32 %v4257_v53, 16  ;;  %v559_v57 = vshll.u32 %v4257_v53, 16  ;;  %v564_v59 = vshll.u32 %v4261_v55, 16 }
  0x1e   : > { %v549_v58 = vrot.slane %v547_v51, 1  ;;  %v4268_v61 = vsel %vm4188_vm3, %v359_v41, 0  ;;  %v366_v4 = vrot.slane %v364_v45, 7  ;;  %v4275_v11 = vsel %vm4188_vm3, 0, %v362_v60 }
  0x1f   : > { %v538_v63 = vor.u32 %v537_v54, %v533_v46  ;;  %v561_v0 = vrot.slane %v559_v57, 1  ;;  %v576_v2 = vshll.u32 %v4268_v61, 16  ;;  %v566_v8 = vrot.slane %v564_v59, 1 }
  0x20   : > { %v550_v7 = vor.u32 %v549_v58, %v545_v50  ;;  %v569_v17 = vshrl.u32 %v4275_v11, 16  ;;  %v571_v18 = vshll.u32 %v4275_v11, 16  ;;  %v369_v22 = vor.u32 %v367_v12, %v366_v4 }
  0x21   : > { %v543_v15 = vsel %vm519_vm4, %v538_v63, %v542_v48  ;;  %v562_v16 = vor.u32 %v561_v0, %v557_v56  ;;  %v578_v21 = vrot.slane %v576_v2, 1  ;;  %v4298_v24 = vsel %vm4188_vm3, %v366_v4, 0 }
  0x22   : > { %3533 = vmatmul.mubr.msk.bf16.vlgmr.msra.gmra.mrb[0].mxu1 %vm714_vm5, %v543_v15  ;;  %3668 = vmatprep.mubr.msk.bf16.mxu0 %vm714_vm5, %v543_v15  ;;  %v4294_v20 = vsel %vm519_vm4, %v550_v7, %v554_v52  ;;  %v573_v26 = vrot.slane %v571_v18, 1  ;;  %v588_v27 = vshll.u32 %v4298_v24, 16  ;;  %v371_v28 = vshrl.u32 %v4118_v62, 16 }
  0x23   : > { %3565 = vmatpush3.bf16.msra.mxu1 %v961_v30  ;;  %3669 = vmatmul.mubr.msk.bf16.vlgmr.msra.gmra.mrb[0].mxu0 %vm714_vm5, %v4294_v20  ;;  %v4303_v25 = vsel %vm519_vm4, %v562_v16, %v566_v8  ;;  %v4311_v31 = vsel %vm4188_vm3, 0, %v369_v22  ;;  %v374_v30 = vshll.u32 %v4118_v62, 16  ;;  %v378_v33 = vshrl.u32 %v4119_v5, 16  ;;  %v4122_v22 = vld [vmem:[%s4219_s28 + $0x48] sm:$0xff]  }
  0x24   : > { %3701 = vmatpush3.bf16.msra.mxu0 %v1875_v32  ;;  %3536 = vmatprep.mubr.msk.bf16.mxu1 %vm714_vm5, %v4294_v20  ;;  %v381_v34 = vshll.u32 %v4119_v5, 16  ;;  %v574_v36 = vor.u32 %v573_v26, %v569_v17  ;;  %v581_v37 = vshrl.u32 %v4311_v31, 16  ;;  %v583_v38 = vshll.u32 %v4311_v31, 16 }
  0x25   : > { %3672 = vmatprep.mubr.msk.bf16.mxu0 %vm714_vm5, %v4303_v25  ;;  %4101 = vmatprep.subr.msk.bf16.mxu0 %vm763_vm0, %v4281_v14  ;;  %v590_v32 = vrot.slane %v588_v27, 1  ;;  %v373_v39 = vrot.slane %v371_v28, 7  ;;  %v380_v41 = vrot.slane %v378_v33, 7  ;;  %v385_v43 = vshrl.u32 %v4120_v13, 16 }
  0x26   : > { %4096 = vmatprep.subr.msk.bf16.mxu1 %vm763_vm0, %v4289_v19  ;;  %v4322_v44 = vsel %vm519_vm4, %v574_v36, %v578_v21  ;;  %v585_v45 = vrot.slane %v583_v38, 1  ;;  %v388_v46 = vshll.u32 %v4120_v13, 16  ;;  %v392_v47 = vshrl.u32 %v4121_v29, 16 }
  0x27   : > { %v376_v48 = vor.u32 %v374_v30, %v373_v39  ;;  %v4326_v50 = vsel %vm4188_vm3, %v373_v39, 0  ;;  %v383_v51 = vor.u32 %v381_v34, %v380_v41  ;;  %v4330_v52 = vsel %vm4188_vm3, %v380_v41, 0 }
  0x28   : > { %v586_v54 = vor.u32 %v585_v45, %v581_v37  ;;  %v600_v56 = vshll.u32 %v4326_v50, 16  ;;  %v387_v57 = vrot.slane %v385_v43, 7  ;;  %v395_v58 = vshll.u32 %v4121_v29, 16  ;;  %v4123_v29 = vld [vmem:[%s4219_s28 + $0x50] sm:$0xff]  }
  0x29   : > { %v4337_v59 = vsel %vm4188_vm3, 0, %v376_v48  ;;  %v4341_v60 = vsel %vm4188_vm3, 0, %v383_v51  ;;  %v612_v62 = vshll.u32 %v4330_v52, 16  ;;  %v394_v63 = vrot.slane %v392_v47, 7 }
  0x2a   : > { %3537 = vmatmul.mubr.msk.bf16.gmra.mrb[4].mxu1 %vm714_vm5, %v4303_v25  ;;  %v4349_v0 = vsel %vm519_vm4, %v586_v54, %v590_v32  ;;  %v593_v2 = vshrl.u32 %v4337_v59, 16  ;;  %v595_v4 = vshll.u32 %v4337_v59, 16  ;;  %v605_v5 = vshrl.u32 %v4341_v60, 16 }
  0x2b   : > { %3673 = vmatmul.mubr.msk.bf16.gmra.mrb[4].mxu0 %vm714_vm5, %v4322_v44  ;;  %3540 = vmatprep.mubr.msk.bf16.mxu1 %vm714_vm5, %v4322_v44  ;;  %v607_v7 = vshll.u32 %v4341_v60, 16  ;;  %v390_v8 = vor.u32 %v388_v46, %v387_v57  ;;  %v602_v13 = vrot.slane %v600_v56, 1  ;;  %v4359_v15 = vsel %vm4188_vm3, %v387_v57, 0  ;;  %v4124_v56 = vld [vmem:[%s4219_s28 + $0x58] sm:$0xff]  }
  0x2c   : > { %3676 = vmatprep.mubr.msk.bf16.mxu0 %vm714_vm5, %v4349_v0  ;;  %v597_v12 = vrot.slane %v595_v4, 1  ;;  %v397_v16 = vor.u32 %v395_v58, %v394_v63  ;;  %v614_v18 = vrot.slane %v612_v62, 1  ;;  %v624_v34 = vshll.u32 %v4359_v15, 16 }
  0x2d   : > { %v609_v17 = vrot.slane %v607_v7, 1  ;;  %v4363_v21 = vsel %vm4188_vm3, 0, %v390_v8  ;;  %v4376_v36 = vsel %vm4188_vm3, %v394_v63, 0  ;;  %v399_v41 = vshrl.u32 %v4122_v22, 16 }
  0x2e   : > { %v598_v26 = vor.u32 %v597_v12, %v593_v2  ;;  %v619_v27 = vshll.u32 %v4363_v21, 16  ;;  %v4369_v28 = vsel %vm4188_vm3, 0, %v397_v16  ;;  %v617_v33 = vshrl.u32 %v4363_v21, 16  ;;  %v4125_v16 = vld [vmem:[%s4219_s28 + $0x60] sm:$0xff]  }
  0x2f   : > { %v610_v30 = vor.u32 %v609_v17, %v605_v5  ;;  %v631_v39 = vshll.u32 %v4369_v28, 16  ;;  %v636_v43 = vshll.u32 %v4376_v36, 16  ;;  %v402_v45 = vshll.u32 %v4122_v22, 16 }
  0x30   : > { %v4379_v37 = vsel %vm519_vm4, %v598_v26, %v602_v13  ;;  %v621_v38 = vrot.slane %v619_v27, 1  ;;  %v406_v46 = vshrl.u32 %v4123_v29, 16  ;;  %v626_v48 = vrot.slane %v624_v34, 1 }
  0x31   : > { %v4384_v32 = vsel %vm519_vm4, %v610_v30, %v614_v18  ;;  %v401_v51 = vrot.slane %v399_v41, 7  ;;  %v409_v54 = vshll.u32 %v4123_v29, 16  ;;  %v1160_v57 = vrot.slane %v4244_v42, 1 }
  0x32   : > { %3541 = vmatmul.mubr.msk.bf16.gmra.mrb[8].mxu1 %vm714_vm5, %v4349_v0  ;;  %v622_v47 = vor.u32 %v621_v38, %v617_v33  ;;  %v1161_v58 = vrot.slane %v4235_v35, 1  ;;  %v408_v62 = vrot.slane %v406_v46, 7  ;;  %v629_v63 = vshrl.u32 %v4369_v28, 16 }
  0x33   : > { %3677 = vmatmul.mubr.msk.bf16.gmra.mrb[8].mxu0 %vm714_vm5, %v4379_v37  ;;  %3544 = vmatprep.mubr.msk.bf16.mxu1 %vm714_vm5, %v4379_v37  ;;  %v633_v2 = vrot.slane %v631_v39, 1  ;;  %v404_v4 = vor.u32 %v402_v45, %v401_v51  ;;  %v4400_v5 = vsel %vm4188_vm3, %v401_v51, 0  ;;  %v1164_v7 = vrot.slane %v4240_v40, 1 }
  0x34   : > { %3680 = vmatprep.mubr.msk.bf16.mxu0 %vm714_vm5, %v4384_v32  ;;  %v638_v8 = vrot.slane %v636_v43, 1  ;;  %v2073_v12 = vsel %vm763_vm0, %v4281_v14, 0  ;;  %v411_v13 = vor.u32 %v409_v54, %v408_v62  ;;  %v4407_v17 = vsel %vm519_vm4, %v622_v47, %v626_v48 }
  0x35   : > { %v4411_v35 = vsel %vm4188_vm3, 0, %v404_v4  ;;  %v648_v18 = vshll.u32 %v4400_v5, 16  ;;  %v413_v22 = vshrl.u32 %v4124_v56, 16  ;;  %v4415_v26 = vsel %vm1156_vm6, %v1160_v57, %v1161_v58 }
  0x36   : > { %v641_v40 = vshrl.u32 %v4411_v35, 16  ;;  %v643_v27 = vshll.u32 %v4411_v35, 16  ;;  %v4421_v14 = vsel %vm4188_vm3, 0, %v411_v13  ;;  %v634_v29 = vor.u32 %v633_v2, %v629_v63 }
  0x37   : > { %v1163_v30 = vrot.slane %v4251_v49, 1  ;;  %v4428_v33 = vsel %vm4188_vm3, %v408_v62, 0  ;;  %v655_v34 = vshll.u32 %v4421_v14, 16  ;;  %v415_v39 = vrot.slane %v413_v22, 7  ;;  %v4126_v62 = vld [vmem:[%s4219_s28 + $0x68] sm:$0xff]   ;;  %v4127_v22 = vld [vmem:[%s4219_s28 + $0x70] sm:$0xff]  }
  0x38   : > { %v645_v38 = vrot.slane %v643_v27, 1  ;;  %v416_v41 = vshll.u32 %v4124_v56, 16  ;;  %v420_v43 = vshrl.u32 %v4125_v16, 16  ;;  %v650_v45 = vrot.slane %v648_v18, 1 }
  0x39   : > { %v1166_v46 = vrot.slane %v4257_v53, 1  ;;  %v1167_v47 = vrot.slane %v4261_v55, 1  ;;  %v423_v48 = vshll.u32 %v4125_v16, 16  ;;  %v4441_v57 = vsel %vm4188_vm3, %v415_v39, 0 }
  0x3a   : > { %3545 = vmatmul.mubr.msk.bf16.gmra.mrb[12].mxu1 %vm714_vm5, %v4384_v32  ;;  %v646_v51 = vor.u32 %v645_v38, %v641_v40  ;;  %v418_v54 = vor.u32 %v416_v41, %v415_v39  ;;  %v422_v58 = vrot.slane %v420_v43, 7  ;;  %v4445_v56 = vsel %vm1156_vm6, %v1163_v30, %v1164_v7 }
  0x3b   : > { %3681 = vmatmul.mubr.msk.bf16.gmra.mrb[12].mxu0 %vm714_vm5, %v4407_v17  ;;  %3548 = vmatprep.mubr.msk.bf16.mxu1 %vm714_vm5, %v4407_v17  ;;  %v653_v63 = vshrl.u32 %v4421_v14, 16  ;;  %v657_v2 = vrot.slane %v655_v34, 1  ;;  %v660_v4 = vshll.u32 %v4428_v33, 16  ;;  %v4450_v13 = vsel %vm519_vm4, %v634_v29, %v638_v8 }
  0x3c   : > { %3702 = vmatprep.mubr.msk.bf16.mxu0 %vm714_vm5, %v4415_v26  ;;  %v1169_v55 = vrot.slane %v4275_v11, 1  ;;  %v4455_v16 = vsel %vm4188_vm3, 0, %v418_v54  ;;  %v425_v18 = vor.u32 %v423_v48, %v422_v58  ;;  %v4459_v40 = vsel %vm519_vm4, %v646_v51, %v650_v45  ;;  %v4477_v48 = vld [vmem:[%s4918_s1 + $0xe] sm:$0x3] }
  0x3d   : > { %v665_v7 = vshrl.u32 %v4455_v16, 16  ;;  %v667_v27 = vshll.u32 %v4455_v16, 16  ;;  %v672_v30 = vshll.u32 %v4441_v57, 16  ;;  %v4465_v8 = vsel %vm1156_vm6, %v1166_v46, %v1167_v47 }
  0x3e   : > { %v1170_v29 = vrot.slane %v4268_v61, 1  ;;  %v4470_v34 = vsel %vm4188_vm3, 0, %v425_v18  ;;  %v427_v38 = vshrl.u32 %v4126_v62, 16  ;;  %v658_v39 = vor.u32 %v657_v2, %v653_v63 }
  0x3f   : > { %v662_v41 = vrot.slane %v660_v4, 1  ;;  %v669_v43 = vrot.slane %v667_v27, 1  ;;  %v430_v45 = vshll.u32 %v4126_v62, 16  ;;  %v4485_v61 = vsel %vm4188_vm3, %v422_v58, 0 }
  0x40   : > { %v679_v46 = vshll.u32 %v4470_v34, 16  ;;  %v429_v47 = vrot.slane %v427_v38, 7  ;;  %v434_v51 = vshrl.u32 %v4127_v22, 16  ;;  %v674_v62 = vrot.slane %v672_v30, 1 }
  0x41   : > { %v670_v54 = vor.u32 %v669_v43, %v665_v7  ;;  %v1172_v63 = vrot.slane %v4311_v31, 1  ;;  %v437_v2 = vshll.u32 %v4127_v22, 16  ;;  %v1173_v4 = vrot.slane %v4298_v24, 1 }
  0x42   : > { %3549 = vmatmul.mubr.msk.bf16.gmra.mrb[16].mxu1 %vm714_vm5, %v4450_v13  ;;  %v432_v18 = vor.u32 %v430_v45, %v429_v47  ;;  %v4494_v58 = vsel %vm4188_vm3, %v429_v47, 0  ;;  %v436_v27 = vrot.slane %v434_v51, 7  ;;  %v4502_v7 = vsel %vm1156_vm6, %v1169_v55, %v1170_v29 }
  0x43   : > { %3703 = vmatmul.mubr.msk.bf16.vlgmr.msra.gmra.mrb[0].mxu0 %vm714_vm5, %v4445_v56  ;;  %3552 = vmatprep.mubr.msk.bf16.mxu1 %vm714_vm5, %v4459_v40  ;;  %v684_v30 = vshll.u32 %v4485_v61, 16  ;;  %v677_v22 = vshrl.u32 %v4470_v34, 16  ;;  %v681_v24 = vrot.slane %v679_v46, 1  ;;  %v4511_v45 = vsel %vm519_vm4, %v670_v54, %v674_v62 }
  0x44   : > { %3735 = vmatpush3.bf16.msra.mxu0 %v2073_v12  ;;  %3706 = vmatprep.mubr.msk.bf16.mxu0 %vm714_vm5, %v4465_v8  ;;  %v4499_v12 = vsel %vm519_vm4, %v658_v39, %v662_v41  ;;  %v4508_v38 = vsel %vm4188_vm3, 0, %v432_v18  ;;  %v439_v43 = vor.u32 %v437_v2, %v436_v27  ;;  %4928 = vst [vmem:[#allocation3_spill] sm:$0xff] %v4511_v45  ;;  %v696_v55 = vshll.u32 %v4494_v58, 16 }
  0x45   : > { %4102 = vmatprep.subr.msk.bf16.mxu0 %vm763_vm0, %v4477_v48  ;;  %v689_v47 = vshrl.u32 %v4508_v38, 16  ;;  %v691_v39 = vshll.u32 %v4508_v38, 16  ;;  %v4517_v29 = vsel %vm1156_vm6, %v1172_v63, %v1173_v4  ;;  %v682_v51 = vor.u32 %v681_v24, %v677_v22 }
  0x46   : > { %v4521_v41 = vsel %vm4188_vm3, 0, %v439_v43  ;;  %v686_v54 = vrot.slane %v684_v30, 1  ;;  %v1175_v62 = vrot.slane %v4337_v59, 1  ;;  %v1176_v2 = vrot.slane %v4326_v50, 1 }
  0x47   : > { %v693_v46 = vrot.slane %v691_v39, 1  ;;  %v703_v63 = vshll.u32 %v4521_v41, 16  ;;  %v698_v18 = vrot.slane %v696_v55, 1  ;;  %v4536_v43 = vsel %vm4188_vm3, %v436_v27, 0 }
  0x48   : > { %v1178_v39 = vrot.slane %v4341_v60, 1  ;;  %v1179_v22 = vrot.slane %v4330_v52, 1  ;;  %v1158_v30 = vrot.slane %v4206_v10, 1  ;;  %v4542_v24 = vsel %vm519_vm4, %v682_v51, %v686_v54 }
  0x49   : > { %v694_v4 = vor.u32 %v693_v46, %v689_v47  ;;  %v701_v23 = vshrl.u32 %v4521_v41, 16  ;;  %v708_v50 = vshll.u32 %v4536_v43, 16  ;;  %v4547_v47 = vsel %vm1156_vm6, %v1175_v62, %v1176_v2 }
  0x4a   : > { %3553 = vmatmul.mubr.msk.bf16.gmra.mrb[20].mxu1 %vm714_vm5, %v4499_v12  ;;  %v4553_v55 = vsel %vm1156_vm6, %v1178_v39, %v1179_v22  ;;  %v1157_v52 = vrot.slane %v4202_v9, 1  ;;  %v1181_v54 = vrot.slane %v4363_v21, 1  ;;  %v1182_v62 = vrot.slane %v4359_v15, 1 }
  0x4b   : > { %3707 = vmatmul.mubr.msk.bf16.gmra.mrb[4].mxu0 %vm714_vm5, %v4502_v7  ;;  %3556 = vmatprep.mubr.msk.bf16.mxu1 %vm714_vm5, %v4511_v45  ;;  %v705_v45 = vrot.slane %v703_v63, 1  ;;  %v4550_v27 = vsel %vm519_vm4, %v694_v4, %v698_v18  ;;  %v710_v46 = vrot.slane %v708_v50, 1  ;;  %v1184_v63 = vrot.slane %v4369_v28, 1 }
  0x4c   : > { %3710 = vmatprep.mubr.msk.bf16.mxu0 %vm714_vm5, %v4517_v29  ;;  %v4563_v51 = vsel %vm1156_vm6, %v1157_v52, %v1158_v30  ;;  %v1185_v2 = vrot.slane %v4376_v36, 1  ;;  %v1187_v15 = vrot.slane %v4411_v35, 1  ;;  %v1188_v36 = vrot.slane %v4400_v5, 1  ;;  %v4128_v52 = vld [vmem:[%s4219_s28 + $0x78] sm:$0xff]   ;;  %v3112_v5 = vld [vmem:[%s4918_s1 + $0x6] sm:$0x3] }
  0x4d   : > { %v706_v10 = vor.u32 %v705_v45, %v701_v23  ;;  %v4575_v23 = vsel %vm1156_vm6, %v1181_v54, %v1182_v62  ;;  %v1190_v18 = vrot.slane %v4421_v14, 1  ;;  %v1191_v39 = vrot.slane %v4428_v33, 1 }
  0x4e   : > { %v4578_v45 = vsel %vm1156_vm6, %v1184_v63, %v1185_v2  ;;  %v1256_v22 = vsel %vm763_vm0, %v4289_v19, 0  ;;  %v4595_v30 = vsel %vm1156_vm6, %v1187_v15, %v1188_v36  ;;  %v1193_v19 = vrot.slane %v4455_v16, 1 }
  0x4f   : > { %v4572_v4 = vsel %vm519_vm4, %v706_v10, %v710_v46  ;;  %v4598_v50 = vsel %vm1156_vm6, %v1190_v18, %v1191_v39  ;;  %v1194_v33 = vrot.slane %v4441_v57, 1  ;;  %v1196_v10 = vrot.slane %v4470_v34, 1 }
  0x50   : > { %v1197_v46 = vrot.slane %v4485_v61, 1  ;;  %v441_v54 = vshrl.u32 %v4128_v52, 16  ;;  %v444_v15 = vshll.u32 %v4128_v52, 16  ;;  %v1199_v57 = vrot.slane %v4508_v38, 1 }
  0x51   : > { %v4618_v62 = vsel %vm1156_vm6, %v1193_v19, %v1194_v33  ;;  %v1200_v61 = vrot.slane %v4494_v58, 1  ;;  %v1202_v36 = vrot.slane %v4521_v41, 1  ;;  %v1203_v18 = vrot.slane %v4536_v43, 1 }
  0x52   : > { %3557 = vmatmul.mubr.msk.bf16.gmra.mrb[24].mxu1 %vm714_vm5, %v4542_v24  ;;  %v4621_v63 = vsel %vm1156_vm6, %v1196_v10, %v1197_v46  ;;  %v443_v2 = vrot.slane %v441_v54, 7  ;;  %v2271_v10 = vsel %vm763_vm0, %v4477_v48, 0  ;;  %v3197_v46 = vld [vmem:[%s4918_s1 + $0x10] sm:$0x3]  ;;  %v1457_v48 = vsel %vm763_vm0, %v3112_v5, 0 }
  0x53   : > { %3711 = vmatmul.mubr.msk.bf16.gmra.mrb[8].mxu0 %vm714_vm5, %v4547_v47  ;;  %3560 = vmatprep.mubr.msk.bf16.mxu1 %vm714_vm5, %v4550_v27  ;;  %v4639_v52 = vsel %vm1156_vm6, %v1202_v36, %v1203_v18 }
  0x54   : > { %3714 = vmatprep.mubr.msk.bf16.mxu0 %vm714_vm5, %v4553_v55  ;;  %v446_v39 = vor.u32 %v444_v15, %v443_v2  ;;  %v4647_v33 = vsel %vm4188_vm3, %v443_v2, 0 }
  0x55   : > { %v1867_v43 = vrot.slane %v4647_v33, 1 }
  0x56   : > { %v4643_v19 = vsel %vm4188_vm3, 0, %v446_v39 }
  0x57   : > { %v1866_v58 = vrot.slane %v4643_v19, 1 }
  0x59   : > { %v4660_v6 = vsel %vm1156_vm6, %v1866_v58, %v1867_v43 }
  0x5a   : > { %3561 = vmatmul.mubr.msk.bf16.gmra.mrb[28].mxu1 %vm714_vm5, %v4572_v4 }
  0x5b   : > { %3715 = vmatmul.mubr.msk.bf16.gmra.mrb[12].mxu0 %vm714_vm5, %v4575_v23  ;;  %3566 = vmatprep.mubr.msk.bf16.mxu1 %vm714_vm5, %v4202_v9 }
  0x5c   : > { %3718 = vmatprep.mubr.msk.bf16.mxu0 %vm714_vm5, %v4578_v45 }
  0x62   : > { %3567 = vmatmul.mubr.msk.bf16.vlgmr.msra.gmra.mrb[0].mxu1 %vm714_vm5, %v4244_v42 }
  0x63   : > { %3599 = vmatpush3.bf16.msra.mxu1 %v1256_v22  ;;  %3719 = vmatmul.mubr.msk.bf16.gmra.mrb[16].mxu0 %vm714_vm5, %v4595_v30  ;;  %v4636_v22 = vsel %vm1156_vm6, %v1199_v57, %v1200_v61 }
  0x64   : > { %3570 = vmatprep.mubr.msk.bf16.mxu1 %vm714_vm5, %v4251_v49  ;;  %3722 = vmatprep.mubr.msk.bf16.mxu0 %vm714_vm5, %v4598_v50 }
  0x65   : > { %4097 = vmatprep.subr.msk.bf16.mxu1 %vm763_vm0, %v3112_v5 }
  0x6a   : > { %3571 = vmatmul.mubr.msk.bf16.gmra.mrb[4].mxu1 %vm714_vm5, %v4257_v53 }
  0x6b   : > { %3723 = vmatmul.mubr.msk.bf16.gmra.mrb[20].mxu0 %vm714_vm5, %v4618_v62  ;;  %3574 = vmatprep.mubr.msk.bf16.mxu1 %vm714_vm5, %v4275_v11 }
  0x6c   : > { %3726 = vmatprep.mubr.msk.bf16.mxu0 %vm714_vm5, %v4621_v63 }
  0x72   : > { %3575 = vmatmul.mubr.msk.bf16.gmra.mrb[8].mxu1 %vm714_vm5, %v4311_v31 }
  0x73   : > { %3727 = vmatmul.mubr.msk.bf16.gmra.mrb[24].mxu0 %vm714_vm5, %v4636_v22  ;;  %3578 = vmatprep.mubr.msk.bf16.mxu1 %vm714_vm5, %v4337_v59 }
  0x74   : > { %3730 = vmatprep.mubr.msk.bf16.mxu0 %vm714_vm5, %v4639_v52 }
  0x7a   : > { %3579 = vmatmul.mubr.msk.bf16.gmra.mrb[12].mxu1 %vm714_vm5, %v4341_v60 }
  0x7b   : > { %3731 = vmatmul.mubr.msk.bf16.gmra.mrb[28].mxu0 %vm714_vm5, %v4660_v6  ;;  %3582 = vmatprep.mubr.msk.bf16.mxu1 %vm714_vm5, %v4363_v21 }
  0x7c   : > { %3736 = vmatprep.mubr.msk.bf16.mxu0 %vm714_vm5, %v4251_v49 }
  0x82   : > { %3583 = vmatmul.mubr.msk.bf16.gmra.mrb[16].mxu1 %vm714_vm5, %v4369_v28 }
  0x83   : > { %3737 = vmatmul.mubr.msk.bf16.vlgmr.msra.gmra.mrb[0].mxu0 %vm714_vm5, %v4257_v53  ;;  %3586 = vmatprep.mubr.msk.bf16.mxu1 %vm714_vm5, %v4411_v35 }
  0x84   : > { %3769 = vmatpush3.bf16.msra.mxu0 %v2271_v10  ;;  %3740 = vmatprep.mubr.msk.bf16.mxu0 %vm714_vm5, %v4275_v11 }
  0x85   : > { %4103 = vmatprep.subr.msk.bf16.mxu0 %vm763_vm0, %v3197_v46 }
  0x8a   : > { %3587 = vmatmul.mubr.msk.bf16.gmra.mrb[20].mxu1 %vm714_vm5, %v4421_v14 }
  0x8b   : > { %3741 = vmatmul.mubr.msk.bf16.gmra.mrb[4].mxu0 %vm714_vm5, %v4311_v31  ;;  %3590 = vmatprep.mubr.msk.bf16.mxu1 %vm714_vm5, %v4455_v16 }
  0x8c   : > { %3744 = vmatprep.mubr.msk.bf16.mxu0 %vm714_vm5, %v4337_v59 }
  0x92   : > { %3591 = vmatmul.mubr.msk.bf16.gmra.mrb[24].mxu1 %vm714_vm5, %v4470_v34 }
  0x93   : > { %3745 = vmatmul.mubr.msk.bf16.gmra.mrb[8].mxu0 %vm714_vm5, %v4341_v60  ;;  %3594 = vmatprep.mubr.msk.bf16.mxu1 %vm714_vm5, %v4508_v38 }
  0x94   : > { %3748 = vmatprep.mubr.msk.bf16.mxu0 %vm714_vm5, %v4363_v21 }
  0x9a   : > { %3595 = vmatmul.mubr.msk.bf16.gmra.mrb[28].mxu1 %vm714_vm5, %v4521_v41 }
  0x9b   : > { %3749 = vmatmul.mubr.msk.bf16.gmra.mrb[12].mxu0 %vm714_vm5, %v4369_v28  ;;  %3600 = vmatprep.mubr.msk.bf16.mxu1 %vm714_vm5, %v4563_v51 }
  0x9c   : > { %3752 = vmatprep.mubr.msk.bf16.mxu0 %vm714_vm5, %v4411_v35 }
  0xa2   : > { %3601 = vmatmul.mubr.msk.bf16.vlgmr.msra.gmra.mrb[0].mxu1 %vm714_vm5, %v4415_v26 }
  0xa3   : > { %3633 = vmatpush3.bf16.msra.mxu1 %v1457_v48  ;;  %3753 = vmatmul.mubr.msk.bf16.gmra.mrb[16].mxu0 %vm714_vm5, %v4421_v14 }
  0xa4   : > { %3604 = vmatprep.mubr.msk.bf16.mxu1 %vm714_vm5, %v4445_v56  ;;  %3756 = vmatprep.mubr.msk.bf16.mxu0 %vm714_vm5, %v4455_v16 }
  0xa5   : > { %4099 = vmatprep.subr.msk.bf16.mxu1 %vm763_vm0, %v4177_v1  ;;  %v2469_v1 = vsel %vm763_vm0, %v3197_v46, 0 }
  0xaa   : > { %3605 = vmatmul.mubr.msk.bf16.gmra.mrb[4].mxu1 %vm714_vm5, %v4465_v8 }
  0xab   : > { %3757 = vmatmul.mubr.msk.bf16.gmra.mrb[20].mxu0 %vm714_vm5, %v4470_v34  ;;  %3608 = vmatprep.mubr.msk.bf16.mxu1 %vm714_vm5, %v4502_v7 }
  0xac   : > { %3760 = vmatprep.mubr.msk.bf16.mxu0 %vm714_vm5, %v4508_v38 }
  0xb2   : > { %3609 = vmatmul.mubr.msk.bf16.gmra.mrb[8].mxu1 %vm714_vm5, %v4517_v29 }
  0xb3   : > { %3761 = vmatmul.mubr.msk.bf16.gmra.mrb[24].mxu0 %vm714_vm5, %v4521_v41  ;;  %3612 = vmatprep.mubr.msk.bf16.mxu1 %vm714_vm5, %v4547_v47 }
  0xb4   : > { %3764 = vmatprep.mubr.msk.bf16.mxu0 %vm714_vm5, %v4643_v19 }
  0xba   : > { %3613 = vmatmul.mubr.msk.bf16.gmra.mrb[12].mxu1 %vm714_vm5, %v4553_v55 }
  0xbb   : > { %3765 = vmatmul.mubr.msk.bf16.gmra.mrb[28].mxu0 %vm714_vm5, %v4202_v9  ;;  %3616 = vmatprep.mubr.msk.bf16.mxu1 %vm714_vm5, %v4575_v23  ;;  %v4929_v9 = vld [vmem:[#allocation3_spill] sm:$0xff] }
  0xbc   : > { %3770 = vmatprep.mubr.msk.bf16.mxu0 %vm714_vm5, %v4294_v20  ;;  %v1654_v20 = vshll.u32 %v4643_v19, 16 }
  0xc2   : > { %3617 = vmatmul.mubr.msk.bf16.gmra.mrb[16].mxu1 %vm714_vm5, %v4578_v45 }
  0xc3   : > { %3771 = vmatmul.mubr.msk.bf16.vlgmr.msra.gmra.mrb[0].mxu0 %vm714_vm5, %v4303_v25  ;;  %3620 = vmatprep.mubr.msk.bf16.mxu1 %vm714_vm5, %v4595_v30  ;;  %v1656_v25 = vrot.slane %v1654_v20, 1 }
  0xc4   : > { %3803 = vmatpush3.bf16.msra.mxu0 %v2469_v1  ;;  %3774 = vmatprep.mubr.msk.bf16.mxu0 %vm714_vm5, %v4322_v44  ;;  %v1659_v44 = vshll.u32 %v4647_v33, 16 }
  0xca   : > { %3621 = vmatmul.mubr.msk.bf16.gmra.mrb[20].mxu1 %vm714_vm5, %v4598_v50 }
  0xcb   : > { %3775 = vmatmul.mubr.msk.bf16.gmra.mrb[4].mxu0 %vm714_vm5, %v4349_v0  ;;  %3624 = vmatprep.mubr.msk.bf16.mxu1 %vm714_vm5, %v4618_v62 }
  0xcc   : > { %3778 = vmatprep.mubr.msk.bf16.mxu0 %vm714_vm5, %v4379_v37 }
  0xd2   : > { %3625 = vmatmul.mubr.msk.bf16.gmra.mrb[24].mxu1 %vm714_vm5, %v4621_v63 }
  0xd3   : > { %3779 = vmatmul.mubr.msk.bf16.gmra.mrb[8].mxu0 %vm714_vm5, %v4384_v32  ;;  %3628 = vmatprep.mubr.msk.bf16.mxu1 %vm714_vm5, %v4636_v22 }
  0xd4   : > { %3782 = vmatprep.mubr.msk.bf16.mxu0 %vm714_vm5, %v4407_v17 }
  0xda   : > { %3629 = vmatmul.mubr.msk.bf16.gmra.mrb[28].mxu1 %vm714_vm5, %v4639_v52 }
  0xdb   : > { %3783 = vmatmul.mubr.msk.bf16.gmra.mrb[12].mxu0 %vm714_vm5, %v4450_v13  ;;  %3634 = vmatprep.mubr.msk.bf16.mxu1 %vm714_vm5, %v4244_v42  ;;  %v1652_v42 = vshrl.u32 %v4643_v19, 16 }
  0xdc   : > { %3786 = vmatprep.mubr.msk.bf16.mxu0 %vm714_vm5, %v4459_v40 }
  0xe2   : > { %3635 = vmatmul.mubr.msk.bf16.vlgmr.msra.gmra.mrb[0].mxu1 %vm714_vm5, %v4251_v49  ;;  %v1661_v49 = vrot.slane %v1659_v44, 1 }
  0xe3   : > { %3837 = vmatpush3.bf16.msra.mxu1 %v4185_v3  ;;  %3787 = vmatmul.mubr.msk.bf16.gmra.mrb[16].mxu0 %vm714_vm5, %v4499_v12  ;;  %v1657_v3 = vor.u32 %v1656_v25, %v1652_v42 }
  0xe4   : > { %3638 = vmatprep.mubr.msk.bf16.mxu1 %vm714_vm5, %v4257_v53  ;;  %3790 = vmatprep.mubr.msk.bf16.mxu0 %vm714_vm5, %v4929_v9 }
  0xe5   : > { %v1662_v53 = vsel %vm519_vm4, %v1657_v3, %v1661_v49 }
  0xea   : > { %3639 = vmatmul.mubr.msk.bf16.gmra.mrb[4].mxu1 %vm714_vm5, %v4275_v11  ;;  %v4930_v11 = vld [vmem:[#allocation2_spill] sm:$0xff] }
  0xeb   : > { %3791 = vmatmul.mubr.msk.bf16.gmra.mrb[20].mxu0 %vm714_vm5, %v4542_v24  ;;  %3642 = vmatprep.mubr.msk.bf16.mxu1 %vm714_vm5, %v4311_v31 }
  0xec   : > { %3794 = vmatprep.mubr.msk.bf16.mxu0 %vm714_vm5, %v4550_v27 }
  0xf2   : > { %3643 = vmatmul.mubr.msk.bf16.gmra.mrb[8].mxu1 %vm714_vm5, %v4337_v59 }
  0xf3   : > { %3795 = vmatmul.mubr.msk.bf16.gmra.mrb[24].mxu0 %vm714_vm5, %v4572_v4  ;;  %3646 = vmatprep.mubr.msk.bf16.mxu1 %vm714_vm5, %v4341_v60 }
  0xf4   : > { %3798 = vmatprep.mubr.msk.bf16.mxu0 %vm714_vm5, %v1662_v53 }
  0xfa   : > { %3647 = vmatmul.mubr.msk.bf16.gmra.mrb[12].mxu1 %vm714_vm5, %v4363_v21 }
  0xfb   : > { %3799 = vmatmul.mubr.msk.bf16.gmra.mrb[28].mxu0 %vm714_vm5, %v4930_v11  ;;  %3650 = vmatprep.mubr.msk.bf16.mxu1 %vm714_vm5, %v4369_v28 }
  0xfc   : > { %3804 = vmatprep.mubr.msk.bf16.mxu0 %vm714_vm5, %v4445_v56 }
 0x102   : > { %3651 = vmatmul.mubr.msk.bf16.gmra.mrb[16].mxu1 %vm714_vm5, %v4411_v35 }
 0x103   : > { %3805 = vmatmul.mubr.msk.bf16.vlgmr.msra.gmra.mrb[0].mxu0 %vm714_vm5, %v4465_v8  ;;  %3654 = vmatprep.mubr.msk.bf16.mxu1 %vm714_vm5, %v4421_v14 }
 0x104   : > { %3808 = vmatprep.mubr.msk.bf16.mxu0 %vm714_vm5, %v4502_v7 }
 0x10a   : > { %3655 = vmatmul.mubr.msk.bf16.gmra.mrb[20].mxu1 %vm714_vm5, %v4455_v16 }
 0x10b   : > { %3809 = vmatmul.mubr.msk.bf16.gmra.mrb[4].mxu0 %vm714_vm5, %v4517_v29  ;;  %3658 = vmatprep.mubr.msk.bf16.mxu1 %vm714_vm5, %v4470_v34 }
 0x10c   : > { %3812 = vmatprep.mubr.msk.bf16.mxu0 %vm714_vm5, %v4547_v47 }
 0x112   : > { %3659 = vmatmul.mubr.msk.bf16.gmra.mrb[24].mxu1 %vm714_vm5, %v4508_v38 }
 0x113   : > { %3813 = vmatmul.mubr.msk.bf16.gmra.mrb[8].mxu0 %vm714_vm5, %v4553_v55  ;;  %3662 = vmatprep.mubr.msk.bf16.mxu1 %vm714_vm5, %v4521_v41 }
 0x114   : > { %3816 = vmatprep.mubr.msk.bf16.mxu0 %vm714_vm5, %v4575_v23 }
 0x11a   : > { %3663 = vmatmul.mubr.msk.bf16.gmra.mrb[28].mxu1 %vm714_vm5, %v4643_v19 }
 0x11b   : > { %3817 = vmatmul.mubr.msk.bf16.gmra.mrb[12].mxu0 %vm714_vm5, %v4578_v45  ;;  %3684 = vmatprep.mubr.msk.bf16.mxu1 %vm714_vm5, %v4450_v13 }
 0x11c   : > { %3820 = vmatprep.mubr.msk.bf16.mxu0 %vm714_vm5, %v4595_v30 }
 0x122   : > { %3685 = vmatmul.mubr.msk.bf16.vlgmr.msra.gmra.mrb[16].mxu1 %vm714_vm5, %v4459_v40 }
 0x123   : > { %3821 = vmatmul.mubr.msk.bf16.gmra.mrb[16].mxu0 %vm714_vm5, %v4598_v50  ;;  %3688 = vmatprep.mubr.msk.bf16.mxu1 %vm714_vm5, %v4499_v12 }
 0x124   : > { %3824 = vmatprep.mubr.msk.bf16.mxu0 %vm714_vm5, %v4618_v62 }
 0x12a   : > { %3689 = vmatmul.mubr.msk.bf16.gmra.mrb[20].mxu1 %vm714_vm5, %v4929_v9 }
 0x12b   : > { %3825 = vmatmul.mubr.msk.bf16.gmra.mrb[20].mxu0 %vm714_vm5, %v4621_v63  ;;  %3692 = vmatprep.mubr.msk.bf16.mxu1 %vm714_vm5, %v4542_v24 }
 0x12c   : > { %3828 = vmatprep.mubr.msk.bf16.mxu0 %vm714_vm5, %v4636_v22 }
 0x132   : > { %3693 = vmatmul.mubr.msk.bf16.gmra.mrb[24].mxu1 %vm714_vm5, %v4550_v27 }
 0x133   : > { %3829 = vmatmul.mubr.msk.bf16.gmra.mrb[24].mxu0 %vm714_vm5, %v4639_v52  ;;  %3696 = vmatprep.mubr.msk.bf16.mxu1 %vm714_vm5, %v4572_v4 }
 0x134   : > { %3832 = vmatprep.mubr.msk.bf16.mxu0 %vm714_vm5, %v4660_v6 }
 0x13a   : > { %3697 = vmatmul.mubr.msk.bf16.gmra.mrb[28].mxu1 %vm714_vm5, %v1662_v53 }
 0x13b   : > { %3833 = vmatmul.mubr.msk.bf16.gmra.mrb[28].mxu0 %vm714_vm5, %v4563_v51 }
 0x1b5   : > { %v3636_v31 = vpop.f32.mrb[0].mxu1 }
 0x1b6   : > { %v1493_v59 = vpop.f32.mrb[1].mxu1 }
 0x1b7   : > { %v3637_v60 = vpop.f32.mrb[2].mxu1 }
 0x1b8   : > { %v1496_v0 = vpop.f32.mrb[3].mxu1 }
 0x1bd   : > { %v3640_v21 = vpop.f32.mrb[4].mxu1 }
 0x1be   : > { %v1509_v28 = vpop.f32.mrb[5].mxu1 }
 0x1bf   : > { %v3641_v37 = vpop.f32.mrb[6].mxu1 }
 0x1c0   : > { %v1512_v32 = vpop.f32.mrb[7].mxu1 }
 0x1c5   : > { %v3644_v17 = vpop.f32.mrb[8].mxu1 }
 0x1c6   : > { %v1525_v35 = vpop.f32.mrb[9].mxu1 }
 0x1c7   : > { %v3645_v26 = vpop.f32.mrb[10].mxu1 }
 0x1c8   : > { %v1528_v14 = vpop.f32.mrb[11].mxu1 }
 0x1cd   : > { %v4871_v56 = vpop.f32.mrb[12].mxu1 }
 0x1ce   : > { %v4873_v13 = vpop.f32.mrb[13].mxu1 }
 0x1cf   : > { %v4875_v16 = vpop.f32.mrb[14].mxu1 }
 0x1d0   : > { %v4877_v40 = vpop.f32.mrb[15].mxu1 }
 0x1d6   : > { %v3806_v8 = vpop.f32.mrb[0].mxu0 }
 0x1d7   : > { %v3838_v34 = vadd.f32 %v3806_v8, %v3636_v31  ;;  %v2505_v12 = vpop.f32.mrb[1].mxu0 }
 0x1d8   : > { %v3839_v7 = vadd.f32 %v2505_v12, %v1493_v59  ;;  %v3807_v38 = vpop.f32.mrb[2].mxu0 }
 0x1d9   : > { %v3840_v29 = vadd.f32 %v3807_v38, %v3637_v60  ;;  %v2508_v41 = vpop.f32.mrb[3].mxu0  ;;  %v2864_v23 = vmul.f32 %v3838_v34, %v3838_v34 }
 0x1da   : > { %v3841_v24 = vadd.f32 %v2508_v41, %v1496_v0  ;;  %v2862_v27 = vmul.f32 %v3839_v7, %v3839_v7 }
 0x1db   : > { %v3290_v47 = vpack.c.bf16 %v3840_v29, %v3838_v34  ;;  %v2865_v62 = vmul.f32 %v3840_v29, %v3840_v29 }
 0x1dc   : > { %v3285_v55 = vpack.c.bf16 %v3841_v24, %v3839_v7  ;;  %v2824_v51 = vadd.f32 %v3841_v24, %v3839_v7  ;;  %v2863_v4 = vmul.f32 %v3841_v24, %v3841_v24 }
 0x1dd   : > { %3362 = vst [vmem:[%s4884_s17 + $0x8] sm:$0xff] %v3290_v47  }
 0x1de   : > { %3286 = vst [vmem:[%s4884_s17] sm:$0xff] %v3285_v55   ;;  %v2825_v45 = vadd.f32 %v3838_v34, %v2824_v51  ;;  %v2894_v30 = vadd.f32 %v2863_v4, %v2862_v27  ;;  %v3810_v50 = vpop.f32.mrb[4].mxu0 }
 0x1df   : > { %v3842_v5 = vadd.f32 %v3810_v50, %v3640_v21  ;;  %v2521_v54 = vpop.f32.mrb[5].mxu0 }
 0x1e0   : > { %v2895_v63 = vadd.f32 %v2894_v30, %v2864_v23  ;;  %v3843_v2 = vadd.f32 %v2521_v54, %v1509_v28  ;;  %v2826_v15 = vadd.f32 %v3840_v29, %v2825_v45  ;;  %v3811_v57 = vpop.f32.mrb[6].mxu0 }
 0x1e1   : > { %v3844_v61 = vadd.f32 %v3811_v57, %v3641_v37  ;;  %v2524_v36 = vpop.f32.mrb[7].mxu0  ;;  %v2868_v10 = vmul.f32 %v3842_v5, %v3842_v5 }
 0x1e2   : > { %v2827_v18 = vadd.f32 %v3843_v2, %v2826_v15  ;;  %v2866_v39 = vmul.f32 %v3843_v2, %v3843_v2  ;;  %v2896_v22 = vadd.f32 %v2895_v63, %v2865_v62  ;;  %v3845_v52 = vadd.f32 %v2524_v36, %v1512_v32 }
 0x1e3   : > { %v3300_v19 = vpack.c.bf16 %v3844_v61, %v3842_v5  ;;  %v2869_v42 = vmul.f32 %v3844_v61, %v3844_v61 }
 0x1e4   : > { %v2897_v33 = vadd.f32 %v2896_v22, %v2866_v39  ;;  %v3295_v58 = vpack.c.bf16 %v3845_v52, %v3843_v2  ;;  %v2828_v43 = vadd.f32 %v3845_v52, %v2827_v18  ;;  %v2867_v6 = vmul.f32 %v3845_v52, %v3845_v52 }
 0x1e5   : > { %3364 = vst [vmem:[%s4884_s17 + $0x18] sm:$0xff] %v3300_v19  }
 0x1e6   : > { %3363 = vst [vmem:[%s4884_s17 + $0x10] sm:$0xff] %v3295_v58   ;;  %v2829_v46 = vadd.f32 %v3842_v5, %v2828_v43  ;;  %v2898_v48 = vadd.f32 %v2897_v33, %v2867_v6  ;;  %v3814_v1 = vpop.f32.mrb[8].mxu0 }
 0x1e7   : > { %v3846_v9 = vadd.f32 %v3814_v1, %v3644_v17  ;;  %v2537_v20 = vpop.f32.mrb[9].mxu0 }
 0x1e8   : > { %v2899_v25 = vadd.f32 %v2898_v48, %v2868_v10  ;;  %v3847_v44 = vadd.f32 %v2537_v20, %v1525_v35  ;;  %v2830_v3 = vadd.f32 %v3844_v61, %v2829_v46  ;;  %v3815_v49 = vpop.f32.mrb[10].mxu0 }
 0x1e9   : > { %v3848_v53 = vadd.f32 %v3815_v49, %v3645_v26  ;;  %v2540_v11 = vpop.f32.mrb[11].mxu0  ;;  %v2872_v17 = vmul.f32 %v3846_v9, %v3846_v9 }
 0x1ea   : > { %v2831_v31 = vadd.f32 %v3847_v44, %v2830_v3  ;;  %v2870_v59 = vmul.f32 %v3847_v44, %v3847_v44  ;;  %v2900_v60 = vadd.f32 %v2899_v25, %v2869_v42  ;;  %v3849_v0 = vadd.f32 %v2540_v11, %v1528_v14 }
 0x1eb   : > { %v3310_v21 = vpack.c.bf16 %v3848_v53, %v3846_v9  ;;  %v2873_v26 = vmul.f32 %v3848_v53, %v3848_v53 }
 0x1ec   : > { %v2901_v28 = vadd.f32 %v2900_v60, %v2870_v59  ;;  %v3305_v37 = vpack.c.bf16 %v3849_v0, %v3847_v44  ;;  %v2832_v32 = vadd.f32 %v3849_v0, %v2831_v31  ;;  %v2871_v8 = vmul.f32 %v3849_v0, %v3849_v0 }
 0x1ed   : > { %3366 = vst [vmem:[%s4884_s17 + $0x28] sm:$0xff] %v3310_v21  }
 0x1ee   : > { %3365 = vst [vmem:[%s4884_s17 + $0x20] sm:$0xff] %v3305_v37   ;;  %v2833_v34 = vadd.f32 %v3846_v9, %v2832_v32  ;;  %v2902_v12 = vadd.f32 %v2901_v28, %v2871_v8  ;;  %v3818_v35 = vpop.f32.mrb[12].mxu0 }
 0x1ef   : > { %v3850_v7 = vadd.f32 %v3818_v35, %v4871_v56  ;;  %v2553_v38 = vpop.f32.mrb[13].mxu0 }
 0x1f0   : > { %v2903_v29 = vadd.f32 %v2902_v12, %v2872_v17  ;;  %v3851_v41 = vadd.f32 %v2553_v38, %v4873_v13  ;;  %v2834_v14 = vadd.f32 %v3848_v53, %v2833_v34  ;;  %v3819_v24 = vpop.f32.mrb[14].mxu0 }
 0x1f1   : > { %v3852_v47 = vadd.f32 %v3819_v24, %v4875_v16  ;;  %v2556_v27 = vpop.f32.mrb[15].mxu0  ;;  %v2876_v62 = vmul.f32 %v3850_v7, %v3850_v7 }
 0x1f2   : > { %v2835_v55 = vadd.f32 %v3851_v41, %v2834_v14  ;;  %v2874_v51 = vmul.f32 %v3851_v41, %v3851_v41  ;;  %v2904_v4 = vadd.f32 %v2903_v29, %v2873_v26  ;;  %v3853_v23 = vadd.f32 %v2556_v27, %v4877_v40 }
 0x1f3   : > { %v3320_v45 = vpack.c.bf16 %v3852_v47, %v3850_v7  ;;  %v2877_v36 = vmul.f32 %v3852_v47, %v3852_v47 }
 0x1f4   : > { %v2905_v30 = vadd.f32 %v2904_v4, %v2874_v51  ;;  %v3315_v56 = vpack.c.bf16 %v3853_v23, %v3851_v41  ;;  %v2836_v50 = vadd.f32 %v3853_v23, %v2835_v55  ;;  %v2875_v5 = vmul.f32 %v3853_v23, %v3853_v23 }
 0x1f5   : > { %3368 = vst [vmem:[%s4884_s17 + $0x38] sm:$0xff] %v3320_v45   ;;  %v3686_v54 = vpop.f32.mrb[16].mxu1 }
 0x1f6   : > { %3367 = vst [vmem:[%s4884_s17 + $0x30] sm:$0xff] %v3315_v56   ;;  %v2837_v13 = vadd.f32 %v3850_v7, %v2836_v50  ;;  %v2906_v63 = vadd.f32 %v2905_v30, %v2875_v5  ;;  %v1769_v2 = vpop.f32.mrb[17].mxu1  ;;  %v3822_v15 = vpop.f32.mrb[16].mxu0 }
 0x1f7   : > { %v3854_v16 = vadd.f32 %v3822_v15, %v3686_v54  ;;  %v3687_v57 = vpop.f32.mrb[18].mxu1  ;;  %v2569_v61 = vpop.f32.mrb[17].mxu0 }
 0x1f8   : > { %v2907_v18 = vadd.f32 %v2906_v63, %v2876_v62  ;;  %v3855_v40 = vadd.f32 %v2569_v61, %v1769_v2  ;;  %v2838_v39 = vadd.f32 %v3852_v47, %v2837_v13  ;;  %v1772_v22 = vpop.f32.mrb[19].mxu1  ;;  %v3823_v52 = vpop.f32.mrb[18].mxu0 }
 0x1f9   : > { %v3856_v19 = vadd.f32 %v3823_v52, %v3687_v57  ;;  %v2572_v33 = vpop.f32.mrb[19].mxu0  ;;  %v2880_v25 = vmul.f32 %v3854_v16, %v3854_v16 }
 0x1fa   : > { %v2839_v58 = vadd.f32 %v3855_v40, %v2838_v39  ;;  %v2878_v43 = vmul.f32 %v3855_v40, %v3855_v40  ;;  %v2908_v6 = vadd.f32 %v2907_v18, %v2877_v36  ;;  %v3857_v10 = vadd.f32 %v2572_v33, %v1772_v22 }
 0x1fb   : > { %v3330_v46 = vpack.c.bf16 %v3856_v19, %v3854_v16  ;;  %v2881_v60 = vmul.f32 %v3856_v19, %v3856_v19 }
 0x1fc   : > { %v2909_v48 = vadd.f32 %v2908_v6, %v2878_v43  ;;  %v3325_v1 = vpack.c.bf16 %v3857_v10, %v3855_v40  ;;  %v2840_v9 = vadd.f32 %v3857_v10, %v2839_v58  ;;  %v2879_v20 = vmul.f32 %v3857_v10, %v3857_v10 }
 0x1fd   : > { %3370 = vst [vmem:[%s4884_s17 + $0x48] sm:$0xff] %v3330_v46   ;;  %v3690_v42 = vpop.f32.mrb[20].mxu1 }
 0x1fe   : > { %3369 = vst [vmem:[%s4884_s17 + $0x40] sm:$0xff] %v3325_v1   ;;  %v2841_v44 = vadd.f32 %v3854_v16, %v2840_v9  ;;  %v2910_v3 = vadd.f32 %v2909_v48, %v2879_v20  ;;  %v1785_v49 = vpop.f32.mrb[21].mxu1  ;;  %v3826_v53 = vpop.f32.mrb[20].mxu0 }
 0x1ff   : > { %v3858_v11 = vadd.f32 %v3826_v53, %v3690_v42  ;;  %v3691_v31 = vpop.f32.mrb[22].mxu1  ;;  %v2585_v59 = vpop.f32.mrb[21].mxu0 }
 0x200   : > { %v2911_v0 = vadd.f32 %v2910_v3, %v2880_v25  ;;  %v3859_v21 = vadd.f32 %v2585_v59, %v1785_v49  ;;  %v2842_v28 = vadd.f32 %v3856_v19, %v2841_v44  ;;  %v1788_v37 = vpop.f32.mrb[23].mxu1  ;;  %v3827_v32 = vpop.f32.mrb[22].mxu0 }
 0x201   : > { %v3860_v8 = vadd.f32 %v3827_v32, %v3691_v31  ;;  %v2588_v17 = vpop.f32.mrb[23].mxu0  ;;  %v2884_v47 = vmul.f32 %v3858_v11, %v3858_v11 }
 0x202   : > { %v2843_v34 = vadd.f32 %v3859_v21, %v2842_v28  ;;  %v2882_v12 = vmul.f32 %v3859_v21, %v3859_v21  ;;  %v2912_v35 = vadd.f32 %v2911_v0, %v2881_v60  ;;  %v3861_v7 = vadd.f32 %v2588_v17, %v1788_v37 }
 0x203   : > { %v3340_v38 = vpack.c.bf16 %v3860_v8, %v3858_v11  ;;  %v2885_v56 = vmul.f32 %v3860_v8, %v3860_v8 }
 0x204   : > { %v2913_v26 = vadd.f32 %v2912_v35, %v2882_v12  ;;  %v3335_v29 = vpack.c.bf16 %v3861_v7, %v3859_v21  ;;  %v2844_v41 = vadd.f32 %v3861_v7, %v2843_v34  ;;  %v2883_v14 = vmul.f32 %v3861_v7, %v3861_v7 }
 0x205   : > { %3372 = vst [vmem:[%s4884_s17 + $0x58] sm:$0xff] %v3340_v38   ;;  %v3694_v24 = vpop.f32.mrb[24].mxu1 }
 0x206   : > { %3371 = vst [vmem:[%s4884_s17 + $0x50] sm:$0xff] %v3335_v29   ;;  %v2845_v27 = vadd.f32 %v3858_v11, %v2844_v41  ;;  %v2914_v55 = vadd.f32 %v2913_v26, %v2883_v14  ;;  %v1801_v51 = vpop.f32.mrb[25].mxu1  ;;  %v3830_v4 = vpop.f32.mrb[24].mxu0 }
 0x207   : > { %v3862_v23 = vadd.f32 %v3830_v4, %v3694_v24  ;;  %v3695_v45 = vpop.f32.mrb[26].mxu1  ;;  %v2601_v30 = vpop.f32.mrb[25].mxu0 }
 0x208   : > { %v2915_v50 = vadd.f32 %v2914_v55, %v2884_v47  ;;  %v3863_v5 = vadd.f32 %v2601_v30, %v1801_v51  ;;  %v2846_v54 = vadd.f32 %v3860_v8, %v2845_v27  ;;  %v1804_v62 = vpop.f32.mrb[27].mxu1  ;;  %v3831_v13 = vpop.f32.mrb[26].mxu0 }
 0x209   : > { %v3864_v63 = vadd.f32 %v3831_v13, %v3695_v45  ;;  %v2604_v2 = vpop.f32.mrb[27].mxu0  ;;  %v2888_v19 = vmul.f32 %v3862_v23, %v3862_v23 }
 0x20a   : > { %v2847_v15 = vadd.f32 %v3863_v5, %v2846_v54  ;;  %v2886_v16 = vmul.f32 %v3863_v5, %v3863_v5  ;;  %v2916_v57 = vadd.f32 %v2915_v50, %v2885_v56  ;;  %v3865_v61 = vadd.f32 %v2604_v2, %v1804_v62 }
 0x20b   : > { %v3350_v36 = vpack.c.bf16 %v3864_v63, %v3862_v23  ;;  %v2889_v1 = vmul.f32 %v3864_v63, %v3864_v63 }
 0x20c   : > { %v2917_v18 = vadd.f32 %v2916_v57, %v2886_v16  ;;  %v3345_v40 = vpack.c.bf16 %v3865_v61, %v3863_v5  ;;  %v2848_v39 = vadd.f32 %v3865_v61, %v2847_v15  ;;  %v2887_v22 = vmul.f32 %v3865_v61, %v3865_v61 }
 0x20d   : > { %3374 = vst [vmem:[%s4884_s17 + $0x68] sm:$0xff] %v3350_v36   ;;  %v3698_v52 = vpop.f32.mrb[28].mxu1 }
 0x20e   : > { %3373 = vst [vmem:[%s4884_s17 + $0x60] sm:$0xff] %v3345_v40   ;;  %v2849_v33 = vadd.f32 %v3862_v23, %v2848_v39  ;;  %v2918_v58 = vadd.f32 %v2917_v18, %v2887_v22  ;;  %v1817_v43 = vpop.f32.mrb[29].mxu1  ;;  %v3834_v6 = vpop.f32.mrb[28].mxu0 }
 0x20f   : > { %v3866_v10 = vadd.f32 %v3834_v6, %v3698_v52  ;;  %v3699_v46 = vpop.f32.mrb[30].mxu1  ;;  %v2617_v48 = vpop.f32.mrb[29].mxu0 }
 0x210   : > { %v2919_v9 = vadd.f32 %v2918_v58, %v2888_v19  ;;  %v3867_v20 = vadd.f32 %v2617_v48, %v1817_v43  ;;  %v2850_v42 = vadd.f32 %v3864_v63, %v2849_v33  ;;  %v1820_v25 = vpop.f32.mrb[31].mxu1  ;;  %v3835_v44 = vpop.f32.mrb[30].mxu0 }
 0x211   : > { %v3868_v3 = vadd.f32 %v3835_v44, %v3699_v46  ;;  %v2620_v49 = vpop.f32.mrb[31].mxu0  ;;  %v2892_v32 = vmul.f32 %v3866_v10, %v3866_v10 }
 0x212   : > { %v2851_v53 = vadd.f32 %v3867_v20, %v2850_v42  ;;  %v2890_v11 = vmul.f32 %v3867_v20, %v3867_v20  ;;  %v2920_v31 = vadd.f32 %v2919_v9, %v2889_v1  ;;  %v3869_v59 = vadd.f32 %v2620_v49, %v1820_v25 }
 0x213   : > { %v3360_v60 = vpack.c.bf16 %v3868_v3, %v3866_v10  ;;  %v2893_v34 = vmul.f32 %v3868_v3, %v3868_v3 }
 0x214   : > { %v2921_v0 = vadd.f32 %v2920_v31, %v2890_v11  ;;  %v3355_v21 = vpack.c.bf16 %v3869_v59, %v3867_v20  ;;  %v2852_v28 = vadd.f32 %v3869_v59, %v2851_v53  ;;  %v2891_v37 = vmul.f32 %v3869_v59, %v3869_v59 }
 0x215   : > { %3376 = vst [vmem:[%s4884_s17 + $0x78] sm:$0xff] %v3360_v60  }
 0x216   : > { %3375 = vst [vmem:[%s4884_s17 + $0x70] sm:$0xff] %v3355_v21   ;;  %v2853_v8 = vadd.f32 %v3866_v10, %v2852_v28  ;;  %v2922_v17 = vadd.f32 %v2921_v0, %v2891_v37 }
 0x218   : > { %v2854_v12 = vadd.f32 %v3868_v3, %v2853_v8  ;;  %v2923_v35 = vadd.f32 %v2922_v17, %v2892_v32 }
 0x21a   : > { %v2855_v7 = vrot.slane %v2854_v12, 4  ;;  %v2924_v38 = vadd.f32 %v2923_v35, %v2893_v34 }
 0x21c   : > { %v2856_v26 = vadd.f32 %v2855_v7, %v2854_v12  ;;  %v2925_v29 = vrot.slane %v2924_v38, 4 }
 0x21e   : > { %v2857_v41 = vrot.slane %v2856_v26, 2  ;;  %v2926_v14 = vadd.f32 %v2925_v29, %v2924_v38 }
 0x220   : > { %v2858_v24 = vadd.f32 %v2857_v41, %v2856_v26  ;;  %v2927_v47 = vrot.slane %v2926_v14, 2 }
 0x222   : > { %v2859_v27 = vrot.slane %v2858_v24, 1  ;;  %v2928_v55 = vadd.f32 %v2927_v47, %v2926_v14 }
 0x224   : > { %v2860_v51 = vadd.f32 %v2859_v27, %v2858_v24  ;;  %v2929_v4 = vrot.slane %v2928_v55, 1 }
 0x226   : > { %2861 = vst [vmem:[%s211_s20] sm:$0x1] %v2860_v51  ;;  %v2930_v23 = vadd.f32 %v2929_v4, %v2928_v55 }
 0x228   : > { %2931 = vst [vmem:[%s214_s23] sm:$0x1] %v2930_v23 }
 0x229 PF: > { %s15_s15 = sadd.s32 1, %s4135_s15  }
 0x22a   : > { %p12_p4 = scmp.ge.s32.totalorder %s15_s15, 4  }
 0x22c   :  { %14 = sbr.rel (!%p12_p4) target bundleno = 1 (0x1), region = 90 }

// kernel: double_conv_pallas.4
= control target key start
LH: loop header
LB: loop body
LE: loop exit
PB: predicated region body
PF: predicated region fallthrough
CT: control target
= control target key end

     0   :  { %s4198_s21 = smov 0   ;;  %s5365_s0 = inlined_call_operand.vmem [shape: bf16[2,16,16,128], index: 0, kind: input, shape index: {}]   ;;  %s5366_s1 = inlined_call_operand.vmem [shape: f32[1,128], index: 1, kind: input, shape index: {}]   ;;  %s5367_s2 = inlined_call_operand.vmem [shape: f32[1,128], index: 2, kind: input, shape index: {}]   ;;  %s5368_s3 = inlined_call_operand.vmem [shape: bf16[3,384,128], index: 3, kind: input, shape index: {}]   ;;  %s5369_s4 = inlined_call_operand.vmem [shape: bf16[2,16,16,128], index: 4, kind: output, shape index: {0}]   ;;  %s5370_s5 = inlined_call_operand.vmem [shape: f32[2,1,128], index: 5, kind: output, shape index: {1}]   ;;  %s5371_s6 = inlined_call_operand.vmem [shape: f32[2,1,128], index: 6, kind: output, shape index: {2}]  }
   0x1 LB: > { %s2924_s22 = sadd.s32 4294967295, %s4160_s21   ;;  %p2928_p0 = scmp.ge.s32.totalorder %s4160_s21, 1  ;;  %s4160_s21 = sphi %s4198_s21, %s17_s21  }
   0x2   : > { %p217_p1 = scmp.lt.s32.totalorder %s4160_s21, 3 }
   0x4   : > { %p218_p2 = pnand %p2928_p0, %p217_p1 }
   0x6   : > { %221 = sbr.rel (%p218_p2) target bundleno = 590 (0x24e), region = 36 }
   0xd   : > { %v4082_v0 = vld [vmem:[%s5368_s3 + $0x100] sm:$0xff]   ;;  %v4085_v3 = vld [vmem:[%s5368_s3 + $0x108] sm:$0xff]   ;;  %v4088_v6 = vld [vmem:[%s5368_s3 + $0x110] sm:$0xff]   ;;  %p253_p3 = scmp.lt.s32.totalorder %s2924_s22, 1  ;;  %vm613_vm0 = vcmask 1040384   ;;  %v4162_v24 = vmov 0  }
   0xe   : > { %v4212_v1 = vld [vmem:[%s5368_s3 + $0x140] sm:$0xff]   ;;  %3345 = vmatprep.subr.bf16.mxu0 %v4082_v0  ;;  %v4225_v4 = vld [vmem:[%s5368_s3 + $0x148] sm:$0xff]   ;;  %v4237_v7 = vld [vmem:[%s5368_s3 + $0x150] sm:$0xff]   ;;  %v463_v25 = vrot.slane %v4162_v24, 7  ;;  %vm614_vm1 = vsmask.f32 256 }
   0xf   : > { %v4084_v2 = vld [vmem:[%s5368_s3 + $0xc0] sm:$0xff]   ;;  %3897 = vmatprep.subr.bf16.mxu1 %v4212_v1  ;;  %v4087_v5 = vld [vmem:[%s5368_s3 + $0xc8] sm:$0xff]   ;;  %v4090_v8 = vld [vmem:[%s5368_s3 + $0xd0] sm:$0xff]   ;;  %s5398_s22 = smov (!%p253_p3, %s2924_s22), 1  ;;  %vm906_vm3 = vcmask 1046528  }
  0x10   : > { %3346 = vmatpush3.bf16.msra.mxu0 %v4084_v2  ;;  %3905 = vmatpush3.bf16.msra.mxu1 %v4212_v1  ;;  %v4091_v9 = vld [vmem:[%s5368_s3 + $0x118] sm:$0xff]   ;;  %v4094_v12 = vld [vmem:[%s5368_s3 + $0x120] sm:$0xff]   ;;  %v4097_v15 = vld [vmem:[%s5368_s3 + $0x128] sm:$0xff]   ;;  %s3137_s11 = sshll.u32 %s5398_s22, 7  ;;  %vm650_vm4 = vsmask.f32 7424  ;;  %s265_s7 = scalar_lea.vmem %s5370_s5, %s5398_s22 }
  0x11   : > { %3347 = vmatprep.subr.bf16.mxu0 %v4085_v3  ;;  %3898 = vmatprep.subr.bf16.mxu1 %v4225_v4  ;;  %v4250_v10 = vld [vmem:[%s5368_s3 + $0x158] sm:$0xff]   ;;  %v4265_v13 = vld [vmem:[%s5368_s3 + $0x160] sm:$0xff]   ;;  %v4282_v16 = vld [vmem:[%s5368_s3 + $0x168] sm:$0xff]   ;;  %s4303_s20 = scalar_lea.vmem %s5365_s0, %s3137_s11  ;;  %s5289_s30 = scalar_lea.vmem %s5369_s4, %s3137_s11 }
  0x12   : > { %v4093_v11 = vld [vmem:[%s5368_s3 + $0xd8] sm:$0xff]   ;;  %v4096_v14 = vld [vmem:[%s5368_s3 + $0xe0] sm:$0xff]   ;;  %v4099_v17 = vld [vmem:[%s5368_s3 + $0xe8] sm:$0xff]   ;;  %s268_s10 = scalar_lea.vmem %s5371_s6, %s5398_s22 }
  0x13   : > { %v4100_v18 = vld [vmem:[%s5368_s3 + $0x130] sm:$0xff]   ;;  %v4103_v21 = vld [vmem:[%s5368_s3 + $0x138] sm:$0xff]   ;;  %v3172_v22 = vld [vmem:[%s4303_s20] sm:$0xff]  }
  0x14   : > { %3348 = vmatpush3.bf16.msra.mxu0 %v4087_v5  ;;  %3906 = vmatpush3.bf16.msra.mxu1 %v4225_v4  ;;  %v4296_v19 = vld [vmem:[%s5368_s3 + $0x170] sm:$0xff]   ;;  %v4316_v23 = vld [vmem:[%s5366_s1] ss:$0 sm:$0xff]  ;;  %v4322_v26 = vld [vmem:[%s5368_s3 + $0x178] sm:$0xff]   ;;  %v3173_v27 = vunpack.c.l.bf16 %v3172_v22  ;;  %v3174_v28 = vunpack.c.h.bf16 %v3172_v22 }
  0x15   : > { %3349 = vmatprep.subr.bf16.mxu0 %v4088_v6  ;;  %3899 = vmatprep.subr.bf16.mxu1 %v4237_v7  ;;  %v4102_v20 = vld [vmem:[%s5368_s3 + $0xf0] sm:$0xff]   ;;  %v3322_v29 = vld [vmem:[%s4303_s20 + $0x40] sm:$0xff]   ;;  %v3323_v30 = vld [vmem:[%s4303_s20 + $0x48] sm:$0xff]  }
  0x16   : > { %v4329_v31 = vld [vmem:[%s5367_s2] ss:$0 sm:$0xff]  ;;  %v3205_v32 = vunpack.c.l.bf16 %v3322_v29  ;;  %v3206_v33 = vunpack.c.h.bf16 %v3322_v29  ;;  %v3209_v34 = vunpack.c.l.bf16 %v3323_v30  ;;  %v3210_v35 = vunpack.c.h.bf16 %v3323_v30  ;;  %vm4334_vm2 = vmand %vm613_vm0, %vm614_vm1  ;;  %v4105_v39 = vld [vmem:[%s5368_s3 + $0xf8] sm:$0xff]  }
  0x17   : > { %v341_v36 = vmul.f32 %v3173_v27, %v4316_v23  ;;  %v342_v37 = vmul.f32 %v3174_v28, %v4316_v23  ;;  %v4347_v43 = vsel %vm4334_vm2, 0, %v463_v25  ;;  %v4106_v47 = vld [vmem:[%s5368_s3 + $0x40] sm:$0xff]   ;;  %v4358_v48 = vsel %vm4334_vm2, %v463_v25, 0  ;;  %v3315_v52 = vld [vmem:[%s4303_s20 + $0x8] sm:$0xff]   ;;  %v3324_v53 = vld [vmem:[%s4303_s20 + $0x50] sm:$0xff]  }
  0x18   : > { %3350 = vmatpush3.bf16.msra.mxu0 %v4090_v8  ;;  %3907 = vmatpush3.bf16.msra.mxu1 %v4237_v7  ;;  %v357_v40 = vmul.f32 %v3205_v32, %v4316_v23  ;;  %v358_v41 = vmul.f32 %v3206_v33, %v4316_v23  ;;  %v359_v42 = vmul.f32 %v3209_v34, %v4316_v23  ;;  %v652_v54 = vshrl.u32 %v4347_v43, 16  ;;  %v4368_v59 = vld [vmem:[%s4303_s20 + $0x58] sm:$0xff]   ;;  %v4126_v38 = vld [vmem:[%s5368_s3 + $0xa0] sm:$0xff]  }
  0x19   : > { %3351 = vmatprep.subr.bf16.mxu0 %v4091_v9  ;;  %3900 = vmatprep.subr.bf16.mxu1 %v4250_v10  ;;  %v380_v44 = vadd.f32 %v4329_v31, %v341_v36  ;;  %v381_v45 = vadd.f32 %v4329_v31, %v342_v37  ;;  %v360_v46 = vmul.f32 %v3210_v35, %v4316_v23  ;;  %v3177_v58 = vunpack.c.l.bf16 %v3315_v52 }
  0x1a   : > { %v396_v49 = vadd.f32 %v4329_v31, %v357_v40  ;;  %v397_v50 = vadd.f32 %v4329_v31, %v358_v41  ;;  %v398_v51 = vadd.f32 %v4329_v31, %v359_v42  ;;  %v3178_v63 = vunpack.c.h.bf16 %v3315_v52 }
  0x1b   : > { %v412_v55 = vmax.f32 %v380_v44, 0.0  ;;  %v413_v56 = vmax.f32 %v381_v45, 0.0  ;;  %v399_v57 = vadd.f32 %v4329_v31, %v360_v46  ;;  %v343_v3 = vmul.f32 %v3177_v58, %v4316_v23  ;;  %v4108_v58 = vld [vmem:[%s5368_s3 + $0x48] sm:$0xff]  }
  0x1c   : > { %3352 = vmatpush3.bf16.msra.mxu0 %v4093_v11  ;;  %3908 = vmatpush3.bf16.msra.mxu1 %v4250_v10  ;;  %v428_v60 = vmax.f32 %v396_v49, 0.0  ;;  %v429_v61 = vmax.f32 %v397_v50, 0.0  ;;  %v430_v62 = vmax.f32 %v398_v51, 0.0  ;;  %v3213_v5 = vunpack.c.l.bf16 %v3324_v53 }
  0x1d   : > { %3353 = vmatprep.subr.bf16.mxu0 %v4094_v12  ;;  %3901 = vmatprep.subr.bf16.mxu1 %v4265_v13  ;;  %v444_v0 = vpack.c.bf16 %v413_v56, %v412_v55  ;;  %v431_v2 = vmax.f32 %v399_v57, 0.0  ;;  %v344_v8 = vmul.f32 %v3178_v63, %v4316_v23  ;;  %v3214_v9 = vunpack.c.h.bf16 %v3324_v53  ;;  %v4107_v57 = vld [vmem:[%s5368_s3] sm:$0xff]  }
  0x1e   : > { %v452_v6 = vpack.c.bf16 %v429_v61, %v428_v60  ;;  %v3217_v11 = vunpack.c.l.bf16 %v4368_v59  ;;  %v361_v22 = vmul.f32 %v3213_v5, %v4316_v23  ;;  %v3218_v37 = vunpack.c.h.bf16 %v4368_v59 }
  0x1f   : > { %v468_v12 = vshrl.u32 %v444_v0, 16  ;;  %v362_v32 = vmul.f32 %v3214_v9, %v4316_v23 }
  0x20   : > { %3354 = vmatpush3.bf16.msra.mxu0 %v4096_v14  ;;  %3909 = vmatpush3.bf16.msra.mxu1 %v4265_v13  ;;  %v471_v14 = vshll.u32 %v444_v0, 16  ;;  %v400_v33 = vadd.f32 %v4329_v31, %v361_v22  ;;  %v3316_v0 = vld [vmem:[%s4303_s20 + $0x10] sm:$0xff]  }
  0x21   : > { %3355 = vmatprep.subr.bf16.mxu0 %v4097_v15  ;;  %3902 = vmatprep.subr.bf16.mxu1 %v4282_v16  ;;  %v453_v15 = vpack.c.bf16 %v431_v2, %v430_v62  ;;  %v470_v24 = vrot.slane %v468_v12, 7  ;;  %v401_v63 = vadd.f32 %v4329_v31, %v362_v32 }
  0x22   : > { %v432_v5 = vmax.f32 %v400_v33, 0.0  ;;  %v3182_v33 = vunpack.c.h.bf16 %v3316_v0 }
  0x23   : > { %v531_v25 = vshrl.u32 %v453_v15, 16  ;;  %v534_v27 = vshll.u32 %v453_v15, 16  ;;  %v473_v34 = vor.u32 %v471_v14, %v470_v24  ;;  %v4382_v35 = vsel %vm4334_vm2, %v470_v24, 0  ;;  %v4109_v15 = vld [vmem:[%s5368_s3 + $0x8] sm:$0xff]  }
  0x24   : > { %3356 = vmatpush3.bf16.msra.mxu0 %v4099_v17  ;;  %3910 = vmatpush3.bf16.msra.mxu1 %v4282_v16  ;;  %v382_v17 = vadd.f32 %v4329_v31, %v343_v3  ;;  %v433_v12 = vmax.f32 %v401_v63, 0.0  ;;  %v364_v14 = vmul.f32 %v3218_v37, %v4316_v23 }
  0x25   : > { %3357 = vmatprep.subr.bf16.mxu0 %v4100_v18  ;;  %3903 = vmatprep.subr.bf16.mxu1 %v4296_v19  ;;  %v524_v18 = vshrl.u32 %v452_v6, 16  ;;  %v533_v36 = vrot.slane %v531_v25, 7  ;;  %v4392_v44 = vsel %vm4334_vm2, 0, %v473_v34  ;;  %v4110_v25 = vld [vmem:[%s5368_s3 + $0x50] sm:$0xff]  }
  0x26   : > { %v414_v28 = vmax.f32 %v382_v17, 0.0  ;;  %v664_v49 = vshrl.u32 %v4392_v44, 16  ;;  %v666_v50 = vshll.u32 %v4392_v44, 16  ;;  %v454_v24 = vpack.c.bf16 %v433_v12, %v432_v5  ;;  %v3317_v5 = vld [vmem:[%s4303_s20 + $0x18] sm:$0xff]  }
  0x27   : > { %v526_v29 = vrot.slane %v524_v18, 7  ;;  %v536_v46 = vor.u32 %v534_v27, %v533_v36  ;;  %v3326_v27 = vld [vmem:[%s4303_s20 + $0x60] sm:$0xff]  }
  0x28   : > { %3358 = vmatpush3.bf16.msra.mxu0 %v4102_v20  ;;  %3911 = vmatpush3.bf16.msra.mxu1 %v4296_v19  ;;  %v527_v20 = vshll.u32 %v452_v6, 16  ;;  %v668_v60 = vrot.slane %v666_v50, 1  ;;  %v363_v6 = vmul.f32 %v3217_v11, %v4316_v23 }
  0x29   : > { %3359 = vmatprep.subr.bf16.mxu0 %v4103_v21  ;;  %3904 = vmatprep.subr.bf16.mxu1 %v4322_v26  ;;  %v383_v21 = vadd.f32 %v4329_v31, %v344_v8  ;;  %v4388_v41 = vsel %vm4334_vm2, %v526_v29, 0  ;;  %v4408_v55 = vsel %vm4334_vm2, 0, %v536_v46 }
  0x2a   : > { %v529_v40 = vor.u32 %v527_v20, %v526_v29  ;;  %v935_v45 = vrot.slane %v4388_v41, 1  ;;  %v937_v61 = vrot.slane %v4408_v55, 1  ;;  %v669_v8 = vor.u32 %v668_v60, %v664_v49 }
  0x2b   : > { %v415_v30 = vmax.f32 %v383_v21, 0.0  ;;  %v402_v18 = vadd.f32 %v4329_v31, %v363_v6  ;;  %v3181_v20 = vunpack.c.l.bf16 %v3316_v0  ;;  %v346_v49 = vmul.f32 %v3182_v33, %v4316_v23 }
  0x2c   : > { %3360 = vmatpush3.bf16.msra.mxu0 %v4105_v39  ;;  %3912 = vmatpush3.bf16.msra.mxu1 %v4322_v26  ;;  %v671_v39 = vshll.u32 %v4382_v35, 16  ;;  %v4403_v52 = vsel %vm4334_vm2, 0, %v529_v40  ;;  %v4457_v40 = vld [vmem:[%s4303_s20 + $0x68] sm:$0xff]  }
  0x2d   : > { %3753 = vmatprep.subr.bf16.mxu0 %v4212_v1  ;;  %3481 = vmatprep.subr.bf16.mxu1 %v4106_v47  ;;  %v445_v42 = vpack.c.bf16 %v415_v30, %v414_v28  ;;  %v4397_v47 = vsel %vm4334_vm2, %v533_v36, 0  ;;  %v934_v53 = vrot.slane %v4403_v52, 1  ;;  %v654_v28 = vshll.u32 %v4347_v43, 16 }
  0x2e   : > { %v673_v51 = vrot.slane %v671_v39, 1  ;;  %v938_v56 = vrot.slane %v4397_v47, 1  ;;  %v403_v30 = vadd.f32 %v4329_v31, %v364_v14  ;;  %v434_v32 = vmax.f32 %v402_v18, 0.0  ;;  %v4113_v18 = vld [vmem:[%s5368_s3 + $0x18] sm:$0xff]  }
  0x2f   : > { %v475_v59 = vshrl.u32 %v445_v42, 16  ;;  %v478_v62 = vshll.u32 %v445_v42, 16  ;;  %v4421_v2 = vsel %vm906_vm3, %v934_v53, %v935_v45  ;;  %v538_v39 = vshrl.u32 %v454_v24, 16  ;;  %v4111_v53 = vld [vmem:[%s5368_s3 + $0x10] sm:$0xff]  }
  0x30   : > { %3785 = vmatprep.mubr.bf16.mxu1 %v4421_v2  ;;  %v4426_v9 = vsel %vm906_vm3, %v937_v61, %v938_v56  ;;  %v4439_v21 = vsel %vm650_vm4, %v669_v8, %v673_v51  ;;  %v541_v42 = vshll.u32 %v454_v24, 16  ;;  %v435_v45 = vmax.f32 %v403_v30, 0.0  ;;  %v4112_v56 = vld [vmem:[%s5368_s3 + $0x58] sm:$0xff]  }
  0x31   : > { %v477_v3 = vrot.slane %v475_v59, 7  ;;  %3786 = vmatmul.mubr.bf16.vlgmr.msra.gmra.mrb[0].mxu1 %v4426_v9  ;;  %1248 = vmatprep.mubr.bf16.mxu0 %v4439_v21  ;;  %v345_v46 = vmul.f32 %v3181_v20, %v4316_v23  ;;  %v540_v51 = vrot.slane %v538_v39, 7  ;;  %v385_v60 = vadd.f32 %v4329_v31, %v346_v49  ;;  %v4506_v39 = vld [vmem:[%s4303_s20 + $0x70] sm:$0xff]  }
  0x32   : > { %3482 = vmatpush3.bf16.msra.mxu1 %v4107_v57  ;;  %1249 = vmatmul.mubr.bf16.vlgmr.msra.gmra.mrb[0].mxu0 %v4392_v44  ;;  %v3221_v57 = vunpack.c.l.bf16 %v3326_v27  ;;  %v3225_v61 = vunpack.c.l.bf16 %v4457_v40  ;;  %v3226_v30 = vunpack.c.h.bf16 %v4457_v40 }
  0x33   : > { %v480_v17 = vor.u32 %v478_v62, %v477_v3  ;;  %v4435_v11 = vsel %vm4334_vm2, %v477_v3, 0  ;;  %3483 = vmatprep.subr.bf16.mxu1 %v4108_v58  ;;  %3754 = vmatpush3.bf16.msra.mxu0 %v4212_v1  ;;  %v3222_v1 = vunpack.c.h.bf16 %v3326_v27  ;;  %v455_v58 = vpack.c.bf16 %v435_v45, %v434_v32 }
  0x34   : > { %v683_v22 = vshll.u32 %v4435_v11, 16  ;;  %3755 = vmatprep.subr.bf16.mxu0 %v4225_v4  ;;  %v384_v59 = vadd.f32 %v4329_v31, %v345_v46  ;;  %v543_v63 = vor.u32 %v541_v42, %v540_v51  ;;  %v4474_v0 = vsel %vm4334_vm2, %v540_v51, 0 }
  0x35   : > { %v4450_v29 = vsel %vm4334_vm2, 0, %v480_v17  ;;  %v365_v3 = vmul.f32 %v3221_v57, %v4316_v23  ;;  %v941_v6 = vrot.slane %v4474_v0, 1  ;;  %v545_v8 = vshrl.u32 %v455_v58, 16 }
  0x36   : > { %v676_v34 = vshrl.u32 %v4450_v29, 16  ;;  %v678_v36 = vshll.u32 %v4450_v29, 16  ;;  %v685_v37 = vrot.slane %v683_v22, 1  ;;  %3484 = vmatpush3.bf16.msra.mxu1 %v4109_v15  ;;  %v548_v12 = vshll.u32 %v455_v58, 16 }
  0x37   : > { %3485 = vmatprep.subr.bf16.mxu1 %v4110_v25  ;;  %v416_v14 = vmax.f32 %v384_v59, 0.0  ;;  %3756 = vmatpush3.bf16.msra.mxu0 %v4225_v4  ;;  %v4485_v17 = vsel %vm4334_vm2, 0, %v543_v63  ;;  %v417_v20 = vmax.f32 %v385_v60, 0.0  ;;  %v366_v22 = vmul.f32 %v3222_v1, %v4316_v23  ;;  %v4114_v4 = vld [vmem:[%s5368_s3 + $0x60] sm:$0xff]  }
  0x38   : > { %v680_v50 = vrot.slane %v678_v36, 1  ;;  %3757 = vmatprep.subr.bf16.mxu0 %v4237_v7  ;;  %v940_v24 = vrot.slane %v4485_v17, 1  ;;  %v547_v25 = vrot.slane %v545_v8, 7  ;;  %v404_v27 = vadd.f32 %v4329_v31, %v365_v3  ;;  %v4115_v36 = vld [vmem:[%s5368_s3 + $0x20] sm:$0xff]  }
  0x39   : > { %v446_v32 = vpack.c.bf16 %v417_v20, %v416_v14  ;;  %v405_v33 = vadd.f32 %v4329_v31, %v366_v22  ;;  %v368_v57 = vmul.f32 %v3226_v30, %v4316_v23  ;;  %v3186_v58 = vunpack.c.h.bf16 %v3317_v5 }
  0x3a   : > { %v681_v62 = vor.u32 %v680_v50, %v676_v34  ;;  %3486 = vmatpush3.bf16.msra.mxu1 %v4111_v53  ;;  %v367_v34 = vmul.f32 %v3225_v61, %v4316_v23  ;;  %v4509_v42 = vsel %vm906_vm3, %v940_v24, %v941_v6  ;;  %v550_v45 = vor.u32 %v548_v12, %v547_v25  ;;  %v4117_v6 = vld [vmem:[%s5368_s3 + $0x28] sm:$0xff]  }
  0x3b   : > { %3487 = vmatprep.subr.bf16.mxu1 %v4112_v56  ;;  %v4513_v40 = vsel %vm4334_vm2, %v547_v25, 0  ;;  %v436_v46 = vmax.f32 %v404_v27, 0.0  ;;  %3758 = vmatpush3.bf16.msra.mxu0 %v4237_v7  ;;  %v482_v50 = vshrl.u32 %v446_v32, 16  ;;  %v485_v51 = vshll.u32 %v446_v32, 16  ;;  %v4116_v7 = vld [vmem:[%s5368_s3 + $0x68] sm:$0xff]   ;;  %v4118_v25 = vld [vmem:[%s5368_s3 + $0x70] sm:$0xff]  }
  0x3c   : > { %v4481_v15 = vsel %vm650_vm4, %v681_v62, %v685_v37  ;;  %v3185_v37 = vunpack.c.l.bf16 %v3317_v5  ;;  %3789 = vmatprep.mubr.bf16.mxu1 %v4509_v42  ;;  %v944_v49 = vrot.slane %v4513_v40, 1  ;;  %v437_v53 = vmax.f32 %v405_v33, 0.0  ;;  %3759 = vmatprep.subr.bf16.mxu0 %v4250_v10 }
  0x3d   : > { %1256 = vmatprep.mubr.bf16.mxu0 %v4481_v15  ;;  %v4520_v56 = vsel %vm4334_vm2, 0, %v550_v45  ;;  %v406_v1 = vadd.f32 %v4329_v31, %v367_v34  ;;  %v484_v60 = vrot.slane %v482_v50, 7  ;;  %v407_v63 = vadd.f32 %v4329_v31, %v368_v57  ;;  %v3329_v34 = vld [vmem:[%s4303_s20 + $0x78] sm:$0xff]  }
  0x3e   : > { %1257 = vmatmul.mubr.bf16.gmra.mrb[4].mxu0 %v4450_v29  ;;  %3488 = vmatpush3.bf16.msra.mxu1 %v4113_v18  ;;  %v943_v59 = vrot.slane %v4520_v56, 1  ;;  %v456_v61 = vpack.c.bf16 %v437_v53, %v436_v46  ;;  %v347_v62 = vmul.f32 %v3185_v37, %v4316_v23  ;;  %v348_v8 = vmul.f32 %v3186_v58, %v4316_v23  ;;  %v4120_v57 = vld [vmem:[%s5368_s3 + $0x78] sm:$0xff]  }
  0x3f   : > { %3489 = vmatprep.subr.bf16.mxu1 %v4114_v4  ;;  %v438_v3 = vmax.f32 %v406_v1, 0.0  ;;  %v3229_v12 = vunpack.c.l.bf16 %v4506_v39  ;;  %3760 = vmatpush3.bf16.msra.mxu0 %v4250_v10  ;;  %v487_v14 = vor.u32 %v485_v51, %v484_v60  ;;  %v4542_v18 = vsel %vm4334_vm2, %v484_v60, 0 }
  0x40   : > { %v4538_v5 = vsel %vm906_vm3, %v943_v59, %v944_v49  ;;  %v552_v20 = vshrl.u32 %v456_v61, 16  ;;  %3761 = vmatprep.subr.bf16.mxu0 %v4265_v13  ;;  %v695_v22 = vshll.u32 %v4542_v18, 16  ;;  %v555_v4 = vshll.u32 %v456_v61, 16  ;;  %v4119_v49 = vld [vmem:[%s5368_s3 + $0x30] sm:$0xff]  }
  0x41   : > { %5383 = vst [vmem:[#allocation2_spill] sm:$0xff] %v4538_v5  ;;  %3790 = vmatmul.mubr.bf16.gmra.mrb[4].mxu1 %v4538_v5  ;;  %v439_v24 = vmax.f32 %v407_v63, 0.0  ;;  %v386_v10 = vadd.f32 %v4329_v31, %v347_v62  ;;  %v4553_v27 = vsel %vm4334_vm2, 0, %v487_v14  ;;  %v387_v32 = vadd.f32 %v4329_v31, %v348_v8 }
  0x42   : > { %3490 = vmatpush3.bf16.msra.mxu1 %v4115_v36  ;;  %v554_v30 = vrot.slane %v552_v20, 7  ;;  %v3230_v33 = vunpack.c.h.bf16 %v4506_v39  ;;  %v688_v36 = vshrl.u32 %v4553_v27, 16  ;;  %v690_v37 = vshll.u32 %v4553_v27, 16 }
  0x43   : > { %3491 = vmatprep.subr.bf16.mxu1 %v4116_v7  ;;  %v697_v45 = vrot.slane %v695_v22, 1  ;;  %v457_v46 = vpack.c.bf16 %v439_v24, %v438_v3  ;;  %3762 = vmatpush3.bf16.msra.mxu0 %v4265_v13  ;;  %v418_v39 = vmax.f32 %v386_v10, 0.0  ;;  %v419_v53 = vmax.f32 %v387_v32, 0.0  ;;  %v3318_v24 = vld [vmem:[%s4303_s20 + $0x20] sm:$0xff]  }
  0x44   : > { %v557_v50 = vor.u32 %v555_v4, %v554_v30  ;;  %v4566_v51 = vsel %vm4334_vm2, %v554_v30, 0  ;;  %3763 = vmatprep.subr.bf16.mxu0 %v4282_v16  ;;  %v692_v1 = vrot.slane %v690_v37, 1  ;;  %v369_v61 = vmul.f32 %v3229_v12, %v4316_v23  ;;  %v4121_v12 = vld [vmem:[%s5368_s3 + $0x38] sm:$0xff]   ;;  %v4601_v32 = vld [vmem:[%s5368_s3 + $0x80] sm:$0xff]  }
  0x45   : > { %v947_v7 = vrot.slane %v4566_v51, 1  ;;  %v559_v58 = vshrl.u32 %v457_v46, 16  ;;  %v562_v59 = vshll.u32 %v457_v46, 16  ;;  %v447_v60 = vpack.c.bf16 %v419_v53, %v418_v39 }
  0x46   : > { %3492 = vmatpush3.bf16.msra.mxu1 %v4117_v6  ;;  %v4575_v13 = vsel %vm4334_vm2, 0, %v557_v50  ;;  %v370_v62 = vmul.f32 %v3230_v33, %v4316_v23  ;;  %v693_v63 = vor.u32 %v692_v1, %v688_v36  ;;  %v3233_v8 = vunpack.c.l.bf16 %v3329_v34 }
  0x47   : > { %3493 = vmatprep.subr.bf16.mxu1 %v4118_v25  ;;  %v946_v3 = vrot.slane %v4575_v13, 1  ;;  %v561_v6 = vrot.slane %v559_v58, 7  ;;  %3764 = vmatpush3.bf16.msra.mxu0 %v4282_v16  ;;  %v489_v14 = vshrl.u32 %v447_v60, 16  ;;  %v492_v20 = vshll.u32 %v447_v60, 16 }
  0x48   : > { %v408_v22 = vadd.f32 %v4329_v31, %v369_v61  ;;  %v409_v4 = vadd.f32 %v4329_v31, %v370_v62  ;;  %3765 = vmatprep.subr.bf16.mxu0 %v4296_v19  ;;  %v4589_v10 = vsel %vm650_vm4, %v693_v63, %v697_v45  ;;  %v371_v50 = vmul.f32 %v3233_v8, %v4316_v23  ;;  %v4129_v61 = vld [vmem:[%s5368_s3 + $0x1c0] sm:$0xff]  }
  0x49   : > { %v4592_v25 = vsel %vm906_vm3, %v946_v3, %v947_v7  ;;  %v564_v16 = vor.u32 %v562_v59, %v561_v6  ;;  %v4596_v30 = vsel %vm4334_vm2, %v561_v6, 0  ;;  %1264 = vmatprep.mubr.bf16.mxu0 %v4589_v10  ;;  %v491_v36 = vrot.slane %v489_v14, 7 }
  0x4a   : > { %3494 = vmatpush3.bf16.msra.mxu1 %v4119_v49  ;;  %5384 = vst [vmem:[#allocation3_spill] sm:$0xff] %v4592_v25  ;;  %3793 = vmatprep.mubr.bf16.mxu1 %v4592_v25  ;;  %v950_v33 = vrot.slane %v4596_v30, 1  ;;  %v440_v37 = vmax.f32 %v408_v22, 0.0  ;;  %v441_v45 = vmax.f32 %v409_v4, 0.0  ;;  %v3234_v49 = vunpack.c.h.bf16 %v3329_v34 }
  0x4b   : > { %3495 = vmatprep.subr.bf16.mxu1 %v4120_v57  ;;  %1265 = vmatmul.mubr.bf16.gmra.mrb[8].mxu0 %v4553_v27  ;;  %v4609_v46 = vsel %vm4334_vm2, 0, %v564_v16  ;;  %v3189_v39 = vunpack.c.l.bf16 %v3318_v24  ;;  %v494_v57 = vor.u32 %v492_v20, %v491_v36  ;;  %v4615_v1 = vsel %vm4334_vm2, %v491_v36, 0 }
  0x4c   : > { %v949_v53 = vrot.slane %v4609_v46, 1  ;;  %v458_v7 = vpack.c.bf16 %v441_v45, %v440_v37  ;;  %3766 = vmatpush3.bf16.msra.mxu0 %v4296_v19  ;;  %v707_v58 = vshll.u32 %v4615_v1, 16  ;;  %v372_v59 = vmul.f32 %v3234_v49, %v4316_v23 }
  0x4d   : > { %v410_v34 = vadd.f32 %v4329_v31, %v371_v50  ;;  %v3190_v60 = vunpack.c.h.bf16 %v3318_v24  ;;  %3767 = vmatprep.subr.bf16.mxu0 %v4322_v26  ;;  %v4631_v19 = vsel %vm4334_vm2, 0, %v494_v57  ;;  %v656_v36 = vrot.slane %v654_v28, 1 }
  0x4e   : > { %3496 = vmatpush3.bf16.msra.mxu1 %v4121_v12  ;;  %v4627_v62 = vsel %vm906_vm3, %v949_v53, %v950_v33  ;;  %v566_v63 = vshrl.u32 %v458_v7, 16  ;;  %v569_v3 = vshll.u32 %v458_v7, 16  ;;  %v700_v6 = vshrl.u32 %v4631_v19, 16  ;;  %v3319_v53 = vld [vmem:[%s4303_s20 + $0x28] sm:$0xff]  }
  0x4f   : > { %3801 = vmatprep.subr.bf16.mxu1 %v4601_v32  ;;  %5385 = vst [vmem:[#allocation4_spill] sm:$0xff] %v4627_v62  ;;  %3794 = vmatmul.mubr.bf16.gmra.mrb[8].mxu1 %v4627_v62  ;;  %v702_v8 = vshll.u32 %v4631_v19, 16  ;;  %v709_v14 = vrot.slane %v707_v58, 1  ;;  %v411_v20 = vadd.f32 %v4329_v31, %v372_v59  ;;  %v442_v4 = vmax.f32 %v410_v34, 0.0  ;;  %v3320_v58 = vld [vmem:[%s4303_s20 + $0x30] sm:$0xff]  }
  0x50   : > { %v568_v22 = vrot.slane %v566_v63, 7  ;;  %v349_v12 = vmul.f32 %v3189_v39, %v4316_v23  ;;  %v350_v24 = vmul.f32 %v3190_v60, %v4316_v23  ;;  %3768 = vmatpush3.bf16.msra.mxu0 %v4322_v26  ;;  %v659_v37 = vshll.u32 %v4358_v48, 16 }
  0x51   : > { %v704_v16 = vrot.slane %v702_v8, 1  ;;  %v443_v33 = vmax.f32 %v411_v20, 0.0  ;;  %3617 = vmatprep.subr.bf16.mxu0 %v4129_v61  ;;  %v657_v28 = vor.u32 %v656_v36, %v652_v54 }
  0x52   : > { %v571_v45 = vor.u32 %v569_v3, %v568_v22  ;;  %v4645_v49 = vsel %vm4334_vm2, %v568_v22, 0  ;;  %v388_v50 = vadd.f32 %v4329_v31, %v349_v12  ;;  %v389_v39 = vadd.f32 %v4329_v31, %v350_v24 }
  0x53   : > { %v705_v57 = vor.u32 %v704_v16, %v700_v6  ;;  %v953_v26 = vrot.slane %v4645_v49, 1  ;;  %v459_v7 = vpack.c.bf16 %v443_v33, %v442_v4  ;;  %v661_v61 = vrot.slane %v659_v37, 1 }
  0x54   : > { %v4656_v59 = vsel %vm4334_vm2, 0, %v571_v45  ;;  %v420_v34 = vmax.f32 %v388_v50, 0.0  ;;  %v421_v60 = vmax.f32 %v389_v39, 0.0  ;;  %v3193_v22 = vunpack.c.l.bf16 %v3319_v53  ;;  %v3321_v50 = vld [vmem:[%s4303_s20 + $0x38] sm:$0xff]  }
  0x55   : > { %v4659_v63 = vsel %vm650_vm4, %v705_v57, %v709_v14  ;;  %v952_v3 = vrot.slane %v4656_v59, 1  ;;  %v573_v6 = vshrl.u32 %v459_v7, 16  ;;  %v576_v8 = vshll.u32 %v459_v7, 16 }
  0x56   : > { %1272 = vmatprep.mubr.bf16.mxu0 %v4659_v63  ;;  %v448_v20 = vpack.c.bf16 %v421_v60, %v420_v34  ;;  %v4664_v54 = vsel %vm650_vm4, %v657_v28, %v661_v61  ;;  %v3194_v4 = vunpack.c.h.bf16 %v3319_v53  ;;  %v3197_v24 = vunpack.c.l.bf16 %v3320_v58 }
  0x57   : > { %v4667_v12 = vsel %vm906_vm3, %v952_v3, %v953_v26  ;;  %1273 = vmatmul.mubr.bf16.gmra.mrb[12].mxu0 %v4631_v19  ;;  %v575_v14 = vrot.slane %v573_v6, 7  ;;  %v3198_v16 = vunpack.c.h.bf16 %v3320_v58  ;;  %v351_v37 = vmul.f32 %v3193_v22, %v4316_v23 }
  0x58   : > { %5386 = vst [vmem:[#allocation5_spill] sm:$0xff] %v4667_v12  ;;  %3797 = vmatprep.mubr.bf16.mxu1 %v4667_v12  ;;  %v496_v33 = vshrl.u32 %v448_v20, 16  ;;  %v499_v36 = vshll.u32 %v448_v20, 16  ;;  %v352_v45 = vmul.f32 %v3194_v4, %v4316_v23  ;;  %v353_v57 = vmul.f32 %v3197_v24, %v4316_v23 }
  0x59   : > { %v578_v39 = vor.u32 %v576_v8, %v575_v14  ;;  %v4676_v53 = vsel %vm4334_vm2, %v575_v14, 0  ;;  %v354_v26 = vmul.f32 %v3198_v16, %v4316_v23  ;;  %v390_v58 = vadd.f32 %v4329_v31, %v351_v37 }
  0x5a   : > { %v956_v7 = vrot.slane %v4676_v53, 1  ;;  %v498_v28 = vrot.slane %v496_v33, 7  ;;  %v391_v34 = vadd.f32 %v4329_v31, %v352_v45  ;;  %v392_v61 = vadd.f32 %v4329_v31, %v353_v57 }
  0x5b   : > { %v4685_v60 = vsel %vm4334_vm2, 0, %v578_v39  ;;  %v393_v3 = vadd.f32 %v4329_v31, %v354_v26  ;;  %v3201_v6 = vunpack.c.l.bf16 %v3321_v50  ;;  %v422_v4 = vmax.f32 %v390_v58, 0.0 }
  0x5c   : > { %v955_v8 = vrot.slane %v4685_v60, 1  ;;  %v501_v20 = vor.u32 %v499_v36, %v498_v28  ;;  %v4692_v22 = vsel %vm4334_vm2, %v498_v28, 0  ;;  %v423_v24 = vmax.f32 %v391_v34, 0.0 }
  0x5d   : > { %v719_v14 = vshll.u32 %v4692_v22, 16  ;;  %v424_v16 = vmax.f32 %v392_v61, 0.0  ;;  %v425_v33 = vmax.f32 %v393_v3, 0.0  ;;  %v3202_v39 = vunpack.c.h.bf16 %v3321_v50 }
  0x5e   : > { %v4696_v37 = vsel %vm906_vm3, %v955_v8, %v956_v7  ;;  %v4700_v45 = vsel %vm4334_vm2, 0, %v501_v20  ;;  %v355_v36 = vmul.f32 %v3201_v6, %v4316_v23  ;;  %v449_v28 = vpack.c.bf16 %v423_v24, %v422_v4 }
  0x5f   : > { %5387 = vst [vmem:[#allocation6_spill] sm:$0xff] %v4696_v37  ;;  %3798 = vmatmul.mubr.bf16.gmra.mrb[12].mxu1 %v4696_v37  ;;  %v712_v57 = vshrl.u32 %v4700_v45, 16  ;;  %v714_v26 = vshll.u32 %v4700_v45, 16  ;;  %v450_v58 = vpack.c.bf16 %v425_v33, %v424_v16  ;;  %v356_v7 = vmul.f32 %v3202_v39, %v4316_v23 }
  0x60   : > { %1714 = vmatprep.mubr.bf16.mxu1 %v4664_v54  ;;  %v394_v34 = vadd.f32 %v4329_v31, %v355_v36  ;;  %v721_v3 = vrot.slane %v719_v14, 1  ;;  %v503_v8 = vshrl.u32 %v449_v28, 16  ;;  %v506_v50 = vshll.u32 %v449_v28, 16  ;;  %v4123_v14 = vld [vmem:[%s5368_s3 + $0x88] sm:$0xff]  }
  0x61   : > { %v716_v61 = vrot.slane %v714_v26, 1  ;;  %v510_v20 = vshrl.u32 %v450_v58, 16  ;;  %v513_v6 = vshll.u32 %v450_v58, 16  ;;  %v395_v37 = vadd.f32 %v4329_v31, %v356_v7 }
  0x62   : > { %v426_v12 = vmax.f32 %v394_v34, 0.0  ;;  %v505_v25 = vrot.slane %v503_v8, 7 }
  0x63   : > { %v717_v62 = vor.u32 %v716_v61, %v712_v57  ;;  %v512_v5 = vrot.slane %v510_v20, 7  ;;  %v427_v4 = vmax.f32 %v395_v37, 0.0 }
  0x64   : > { %v508_v16 = vor.u32 %v506_v50, %v505_v25  ;;  %v4715_v23 = vsel %vm4334_vm2, %v505_v25, 0 }
  0x65   : > { %v4711_v24 = vsel %vm650_vm4, %v717_v62, %v721_v3  ;;  %v731_v31 = vshll.u32 %v4715_v23, 16  ;;  %v515_v33 = vor.u32 %v513_v6, %v512_v5  ;;  %v4724_v37 = vsel %vm4334_vm2, %v512_v5, 0 }
  0x66   : > { %1280 = vmatprep.mubr.bf16.mxu0 %v4711_v24  ;;  %v451_v62 = vpack.c.bf16 %v427_v4, %v426_v12  ;;  %v4730_v25 = vsel %vm4334_vm2, 0, %v508_v16  ;;  %v743_v39 = vshll.u32 %v4724_v37, 16 }
  0x67   : > { %1281 = vmatmul.mubr.bf16.gmra.mrb[16].mxu0 %v4700_v45  ;;  %1715 = vmatmul.mubr.bf16.vlgmr.msra.gmra.mrb[16].mxu1 %v4347_v43  ;;  %v724_v36 = vshrl.u32 %v4730_v25, 16  ;;  %v726_v57 = vshll.u32 %v4730_v25, 16  ;;  %v4739_v5 = vsel %vm4334_vm2, 0, %v515_v33  ;;  %v733_v7 = vrot.slane %v731_v31, 1  ;;  %v4125_v31 = vld [vmem:[%s5368_s3 + $0x98] sm:$0xff]  }
  0x68   : > { %3802 = vmatpush3.bf16.msra.mxu1 %v4601_v32  ;;  %1722 = vmatprep.mubr.bf16.mxu1 %v4439_v21  ;;  %v736_v12 = vshrl.u32 %v4739_v5, 16  ;;  %v738_v26 = vshll.u32 %v4739_v5, 16  ;;  %v517_v28 = vshrl.u32 %v451_v62, 16  ;;  %v4124_v32 = vld [vmem:[%s5368_s3 + $0x90] sm:$0xff]   ;;  %v520_v34 = vshll.u32 %v451_v62, 16 }
  0x69   : > { %3803 = vmatprep.subr.bf16.mxu1 %v4123_v14  ;;  %v728_v58 = vrot.slane %v726_v57, 1  ;;  %v745_v3 = vrot.slane %v743_v39, 1 }
  0x6a   : > { %v740_v61 = vrot.slane %v738_v26, 1  ;;  %v519_v21 = vrot.slane %v517_v28, 7 }
  0x6b   : > { %v729_v8 = vor.u32 %v728_v58, %v724_v36  ;;  %v760_v58 = vshrl.u32 %v4403_v52, 16 }
  0x6c   : > { %3804 = vmatpush3.bf16.msra.mxu1 %v4123_v14  ;;  %v741_v50 = vor.u32 %v740_v61, %v736_v12  ;;  %v522_v20 = vor.u32 %v520_v34, %v519_v21  ;;  %v4748_v6 = vsel %vm4334_vm2, %v519_v21, 0  ;;  %v762_v12 = vshll.u32 %v4403_v52, 16 }
  0x6d   : > { %3805 = vmatprep.subr.bf16.mxu1 %v4124_v32  ;;  %v4751_v4 = vsel %vm650_vm4, %v729_v8, %v733_v7  ;;  %v755_v16 = vshll.u32 %v4748_v6, 16  ;;  %v767_v34 = vshll.u32 %v4388_v41, 16  ;;  %v774_v21 = vshll.u32 %v4408_v55, 16  ;;  %v4128_v41 = vld [vmem:[%s5368_s3 + $0xb0] sm:$0xff]  }
  0x6e   : > { %1288 = vmatprep.mubr.bf16.mxu0 %v4751_v4  ;;  %v4760_v14 = vsel %vm650_vm4, %v741_v50, %v745_v3  ;;  %v4764_v33 = vsel %vm4334_vm2, 0, %v522_v20  ;;  %v764_v7 = vrot.slane %v762_v12, 1  ;;  %v772_v50 = vshrl.u32 %v4408_v55, 16 }
  0x6f   : > { %1723 = vmatmul.mubr.bf16.gmra.mrb[20].mxu1 %v4392_v44  ;;  %1289 = vmatmul.mubr.bf16.gmra.mrb[20].mxu0 %v4730_v25  ;;  %v748_v62 = vshrl.u32 %v4764_v33, 16  ;;  %v750_v39 = vshll.u32 %v4764_v33, 16  ;;  %v757_v57 = vrot.slane %v755_v16, 1  ;;  %v769_v3 = vrot.slane %v767_v34, 1 }
  0x70   : > { %1730 = vmatprep.mubr.bf16.mxu1 %v4481_v15  ;;  %1296 = vmatprep.mubr.bf16.mxu0 %v4760_v14  ;;  %v765_v61 = vor.u32 %v764_v7, %v760_v58  ;;  %v776_v20 = vrot.slane %v774_v21, 1  ;;  %v779_v16 = vshll.u32 %v4397_v47, 16  ;;  %v4807_v47 = vld [vmem:[%s5368_s3 + $0x200] sm:$0xff]   ;;  %v784_v12 = vshrl.u32 %v4485_v17, 16 }
  0x71   : > { %3806 = vmatpush3.bf16.msra.mxu1 %v4124_v32  ;;  %v752_v36 = vrot.slane %v750_v39, 1  ;;  %v4127_v32 = vld [vmem:[%s5368_s3 + $0xa8] sm:$0xff]   ;;  %v798_v34 = vshll.u32 %v4520_v56, 16 }
  0x72   : > { %3807 = vmatprep.subr.bf16.mxu1 %v4125_v31  ;;  %v4792_v8 = vsel %vm650_vm4, %v765_v61, %v769_v3  ;;  %v781_v39 = vrot.slane %v779_v16, 1  ;;  %v796_v61 = vshrl.u32 %v4520_v56, 16  ;;  %v803_v3 = vshll.u32 %v4513_v40, 16 }
  0x73   : > { %v753_v26 = vor.u32 %v752_v36, %v748_v62  ;;  %v777_v62 = vor.u32 %v776_v20, %v772_v50  ;;  %v786_v36 = vshll.u32 %v4485_v17, 16  ;;  %v810_v50 = vshll.u32 %v4575_v13, 16 }
  0x74   : > { %v808_v16 = vshrl.u32 %v4575_v13, 16  ;;  %v815_v40 = vshll.u32 %v4566_v51, 16  ;;  %v827_v51 = vshll.u32 %v4596_v30, 16  ;;  %v839_v30 = vshll.u32 %v4645_v49, 16 }
  0x75   : > { %3808 = vmatpush3.bf16.msra.mxu1 %v4125_v31  ;;  %v4776_v28 = vsel %vm650_vm4, %v753_v26, %v757_v57  ;;  %v4137_v31 = vld [vmem:[%s5368_s3 + $0xb8] sm:$0xff]   ;;  %v4810_v57 = vsel %vm650_vm4, %v777_v62, %v781_v39  ;;  %v791_v26 = vshll.u32 %v4474_v0, 16  ;;  %v800_v0 = vrot.slane %v798_v34, 1 }
  0x76   : > { %3809 = vmatprep.subr.bf16.mxu1 %v4126_v38  ;;  %v817_v39 = vrot.slane %v815_v40, 1  ;;  %v834_v34 = vshll.u32 %v4656_v59, 16  ;;  %v851_v49 = vshll.u32 %v4676_v53, 16  ;;  %v910_v53 = vrot.slane %v4392_v44, 1 }
  0x77   : > { %1731 = vmatmul.mubr.bf16.gmra.mrb[24].mxu1 %v4450_v29  ;;  %1297 = vmatmul.mubr.bf16.gmra.mrb[24].mxu0 %v4739_v5  ;;  %v793_v7 = vrot.slane %v791_v26, 1  ;;  %v801_v21 = vor.u32 %v800_v0, %v796_v61  ;;  %v832_v0 = vshrl.u32 %v4656_v59, 16  ;;  %v917_v44 = vrot.slane %v4542_v18, 1  ;;  %v4132_v18 = vld [vmem:[%s5368_s3 + $0x188] sm:$0xff]  }
  0x78   : > { %1738 = vmatprep.mubr.bf16.mxu1 %v4589_v10  ;;  %1304 = vmatprep.mubr.bf16.mxu0 %v4776_v28 }
  0x79   : > { %3810 = vmatpush3.bf16.msra.mxu1 %v4126_v38  ;;  %v788_v38 = vrot.slane %v786_v36, 1  ;;  %v822_v36 = vshll.u32 %v4609_v46, 16 }
  0x7a   : > { %3811 = vmatprep.subr.bf16.mxu1 %v4127_v32 }
  0x7b   : > { %v789_v58 = vor.u32 %v788_v38, %v784_v12  ;;  %v820_v38 = vshrl.u32 %v4609_v46, 16  ;;  %v824_v26 = vrot.slane %v822_v36, 1 }
  0x7d   : > { %3812 = vmatpush3.bf16.msra.mxu1 %v4127_v32  ;;  %v4821_v32 = vsel %vm650_vm4, %v789_v58, %v793_v7  ;;  %v825_v58 = vor.u32 %v824_v26, %v820_v38  ;;  %v829_v7 = vrot.slane %v827_v51, 1  ;;  %v911_v38 = vrot.slane %v4382_v35, 1 }
  0x7e   : > { %3813 = vmatprep.subr.bf16.mxu1 %v4128_v41  ;;  %v914_v51 = vrot.slane %v4435_v11, 1 }
  0x7f   : > { %1739 = vmatmul.mubr.bf16.gmra.mrb[28].mxu1 %v4553_v27  ;;  %1305 = vmatmul.mubr.bf16.gmra.mrb[28].mxu0 %v4764_v33  ;;  %v4851_v61 = vsel %vm650_vm4, %v825_v58, %v829_v7  ;;  %v4879_v26 = vsel %vm906_vm3, %v910_v53, %v911_v38  ;;  %v913_v58 = vrot.slane %v4450_v29, 1  ;;  %v916_v7 = vrot.slane %v4553_v27, 1  ;;  %v4138_v53 = vld [vmem:[%s5368_s3 + $0x1e0] sm:$0xff]  }
  0x80   : > { %1746 = vmatprep.mubr.bf16.mxu1 %v4659_v63  ;;  %1312 = vmatprep.mubr.bf16.mxu0 %v4792_v8  ;;  %v928_v38 = vrot.slane %v4739_v5, 1 }
  0x81   : > { %3814 = vmatpush3.bf16.msra.mxu1 %v4128_v41  ;;  %v805_v41 = vrot.slane %v803_v3, 1  ;;  %v836_v3 = vrot.slane %v834_v34, 1  ;;  %v4890_v35 = vsel %vm906_vm3, %v913_v58, %v914_v51  ;;  %v4130_v34 = vld [vmem:[%s5368_s3 + $0x180] sm:$0xff]   ;;  %v4899_v11 = vsel %vm906_vm3, %v916_v7, %v917_v44 }
  0x82   : > { %3815 = vmatprep.subr.bf16.mxu1 %v4137_v31  ;;  %v929_v51 = vrot.slane %v4724_v37, 1  ;;  %v4139_v7 = vld [vmem:[%s5368_s3 + $0x1a0] sm:$0xff]   ;;  %v4141_v37 = vld [vmem:[%s5368_s3 + $0x1a8] sm:$0xff]  }
  0x83   : > { %v4831_v20 = vsel %vm650_vm4, %v801_v21, %v805_v41  ;;  %v837_v21 = vor.u32 %v836_v3, %v832_v0  ;;  %v841_v41 = vrot.slane %v839_v30, 1  ;;  %v4131_v0 = vld [vmem:[%s5368_s3 + $0x1c8] sm:$0xff]   ;;  %v919_v3 = vrot.slane %v4631_v19, 1 }
  0x84   : > { %v920_v30 = vrot.slane %v4615_v1, 1  ;;  %v4135_v1 = vld [vmem:[%s5368_s3 + $0x1d8] sm:$0xff]   ;;  %v4951_v44 = vsel %vm906_vm3, %v928_v38, %v929_v51  ;;  %v5388_v38 = vld [vmem:[#allocation2_spill] sm:$0xff] }
  0x85   : > { %3816 = vmatpush3.bf16.msra.mxu1 %v4137_v31  ;;  %v812_v31 = vrot.slane %v810_v50, 1  ;;  %v846_v50 = vshll.u32 %v4685_v60, 16 }
  0x86   : > { %3849 = vmatprep.subr.bf16.mxu1 %v4807_v47 }
  0x87   : > { %1747 = vmatmul.mubr.bf16.gmra.mrb[32].mxu1 %v4631_v19  ;;  %1313 = vmatmul.mubr.bf16.gmra.mrb[32].mxu0 %v4403_v52  ;;  %v813_v62 = vor.u32 %v812_v31, %v808_v16  ;;  %v4861_v16 = vsel %vm650_vm4, %v837_v21, %v841_v41  ;;  %v844_v31 = vshrl.u32 %v4685_v60, 16  ;;  %v848_v40 = vrot.slane %v846_v50, 1  ;;  %v4133_v21 = vld [vmem:[%s5368_s3 + $0x1d0] sm:$0xff]  }
  0x88   : > { %1754 = vmatprep.mubr.bf16.mxu1 %v4711_v24  ;;  %1320 = vmatprep.mubr.bf16.mxu0 %v4810_v57  ;;  %v922_v41 = vrot.slane %v4700_v45, 1  ;;  %v923_v50 = vrot.slane %v4692_v22, 1  ;;  %v4136_v22 = vld [vmem:[%s5368_s3 + $0x198] sm:$0xff]  }
  0x89   : > { %v4841_v12 = vsel %vm650_vm4, %v813_v62, %v817_v39  ;;  %v849_v62 = vor.u32 %v848_v40, %v844_v31  ;;  %v853_v39 = vrot.slane %v851_v49, 1  ;;  %v4916_v31 = vsel %vm906_vm3, %v919_v3, %v920_v30  ;;  %v4134_v40 = vld [vmem:[%s5368_s3 + $0x190] sm:$0xff]  }
  0x8a   : > { %v4925_v49 = vsel %vm906_vm3, %v922_v41, %v923_v50  ;;  %v908_v3 = vrot.slane %v4358_v48, 1  ;;  %v4142_v30 = vld [vmem:[%s5368_s3 + $0x1f0] sm:$0xff]   ;;  %v4144_v48 = vld [vmem:[%s5368_s3 + $0x1f8] sm:$0xff]  }
  0x8b   : > { %v4870_v36 = vsel %vm650_vm4, %v849_v62, %v853_v39  ;;  %v925_v62 = vrot.slane %v4730_v25, 1  ;;  %v926_v39 = vrot.slane %v4715_v23, 1  ;;  %v4140_v23 = vld [vmem:[%s5368_s3 + $0x1e8] sm:$0xff]   ;;  %v4143_v41 = vld [vmem:[%s5368_s3 + $0x1b0] sm:$0xff]  }
  0x8d   : > { %v4942_v58 = vsel %vm906_vm3, %v925_v62, %v926_v39 }
  0x8f   : > { %1755 = vmatmul.mubr.bf16.gmra.mrb[36].mxu1 %v4700_v45  ;;  %1321 = vmatmul.mubr.bf16.gmra.mrb[36].mxu0 %v4408_v55 }
  0x90   : > { %1762 = vmatprep.mubr.bf16.mxu1 %v4751_v4  ;;  %1328 = vmatprep.mubr.bf16.mxu0 %v4821_v32 }
  0x97   : > { %1763 = vmatmul.mubr.bf16.gmra.mrb[40].mxu1 %v4730_v25  ;;  %1329 = vmatmul.mubr.bf16.gmra.mrb[40].mxu0 %v4485_v17 }
  0x98   : > { %1770 = vmatprep.mubr.bf16.mxu1 %v4760_v14  ;;  %1336 = vmatprep.mubr.bf16.mxu0 %v4831_v20 }
  0x9f   : > { %1771 = vmatmul.mubr.bf16.gmra.mrb[44].mxu1 %v4739_v5  ;;  %1337 = vmatmul.mubr.bf16.gmra.mrb[44].mxu0 %v4520_v56 }
  0xa0   : > { %1778 = vmatprep.mubr.bf16.mxu1 %v4776_v28  ;;  %1344 = vmatprep.mubr.bf16.mxu0 %v4841_v12 }
  0xa7   : > { %1779 = vmatmul.mubr.bf16.gmra.mrb[48].mxu1 %v4764_v33  ;;  %1345 = vmatmul.mubr.bf16.gmra.mrb[48].mxu0 %v4575_v13 }
  0xa8   : > { %1786 = vmatprep.mubr.bf16.mxu1 %v4792_v8  ;;  %1352 = vmatprep.mubr.bf16.mxu0 %v4851_v61 }
  0xaf   : > { %1787 = vmatmul.mubr.bf16.gmra.mrb[52].mxu1 %v4403_v52  ;;  %1353 = vmatmul.mubr.bf16.gmra.mrb[52].mxu0 %v4609_v46 }
  0xb0   : > { %1794 = vmatprep.mubr.bf16.mxu1 %v4810_v57  ;;  %1360 = vmatprep.mubr.bf16.mxu0 %v4861_v16 }
  0xb7   : > { %1795 = vmatmul.mubr.bf16.gmra.mrb[56].mxu1 %v4408_v55  ;;  %1361 = vmatmul.mubr.bf16.gmra.mrb[56].mxu0 %v4656_v59 }
  0xb8   : > { %1802 = vmatprep.mubr.bf16.mxu1 %v4821_v32  ;;  %1368 = vmatprep.mubr.bf16.mxu0 %v4870_v36 }
  0xbf   : > { %1803 = vmatmul.mubr.bf16.gmra.mrb[60].mxu1 %v4485_v17  ;;  %1369 = vmatmul.mubr.bf16.gmra.mrb[60].mxu0 %v4685_v60 }
  0xc0   : > { %1810 = vmatprep.mubr.bf16.mxu1 %v4831_v20  ;;  %3769 = vmatprep.mubr.bf16.mxu0 %v4879_v26 }
  0xc7   : > { %1811 = vmatmul.mubr.bf16.gmra.mrb[64].mxu1 %v4520_v56  ;;  %3770 = vmatmul.mubr.bf16.vlgmr.msra.gmra.mrb[64].mxu0 %v4890_v35 }
  0xc8   : > { %1818 = vmatprep.mubr.bf16.mxu1 %v4841_v12  ;;  %3618 = vmatpush3.bf16.msra.mxu0 %v4130_v34  ;;  %v931_v34 = vrot.slane %v4764_v33, 1 }
  0xc9   : > { %3773 = vmatprep.mubr.bf16.mxu0 %v4899_v11  ;;  %3619 = vmatprep.subr.bf16.mxu0 %v4131_v0  ;;  %v932_v0 = vrot.slane %v4748_v6, 1  ;;  %v4145_v6 = vld [vmem:[%s5368_s3 + $0x1b8] sm:$0xff]  }
  0xcc   : > { %3620 = vmatpush3.bf16.msra.mxu0 %v4132_v18  ;;  %v907_v18 = vrot.slane %v4347_v43, 1 }
  0xcd   : > { %3621 = vmatprep.subr.bf16.mxu0 %v4133_v21  ;;  %v4968_v21 = vsel %vm906_vm3, %v931_v34, %v932_v0 }
  0xce   : > { %v4974_v50 = vsel %vm906_vm3, %v907_v18, %v908_v3 }
  0xcf   : > { %1819 = vmatmul.mubr.bf16.gmra.mrb[68].mxu1 %v4575_v13  ;;  %3774 = vmatmul.mubr.bf16.gmra.mrb[68].mxu0 %v4916_v31 }
  0xd0   : > { %1826 = vmatprep.mubr.bf16.mxu1 %v4851_v61  ;;  %3622 = vmatpush3.bf16.msra.mxu0 %v4134_v40  ;;  %v4147_v40 = vld [vmem:[%s5368_s3 + $0x208] sm:$0xff]  }
  0xd1   : > { %3777 = vmatprep.mubr.bf16.mxu0 %v4925_v49  ;;  %3623 = vmatprep.subr.bf16.mxu0 %v4135_v1  ;;  %v4149_v1 = vld [vmem:[%s5368_s3 + $0x218] sm:$0xff]  }
  0xd4   : > { %3624 = vmatpush3.bf16.msra.mxu0 %v4136_v22 }
  0xd5   : > { %3625 = vmatprep.subr.bf16.mxu0 %v4138_v53 }
  0xd7   : > { %1827 = vmatmul.mubr.bf16.gmra.mrb[72].mxu1 %v4609_v46  ;;  %3778 = vmatmul.mubr.bf16.gmra.mrb[72].mxu0 %v4942_v58 }
  0xd8   : > { %1834 = vmatprep.mubr.bf16.mxu1 %v4861_v16  ;;  %3626 = vmatpush3.bf16.msra.mxu0 %v4139_v7  ;;  %v5389_v7 = vld [vmem:[#allocation3_spill] sm:$0xff] }
  0xd9   : > { %3781 = vmatprep.mubr.bf16.mxu0 %v4951_v44  ;;  %3627 = vmatprep.subr.bf16.mxu0 %v4140_v23 }
  0xdc   : > { %3628 = vmatpush3.bf16.msra.mxu0 %v4141_v37  ;;  %v5391_v37 = vld [vmem:[#allocation5_spill] sm:$0xff] }
  0xdd   : > { %3629 = vmatprep.subr.bf16.mxu0 %v4142_v30 }
  0xdf   : > { %1835 = vmatmul.mubr.bf16.gmra.mrb[76].mxu1 %v4656_v59  ;;  %3782 = vmatmul.mubr.bf16.gmra.mrb[76].mxu0 %v4968_v21 }
  0xe0   : > { %3817 = vmatprep.mubr.bf16.mxu1 %v4974_v50  ;;  %3630 = vmatpush3.bf16.msra.mxu0 %v4143_v41 }
  0xe1   : > { %2229 = vmatprep.mubr.bf16.mxu0 %v4481_v15  ;;  %3631 = vmatprep.subr.bf16.mxu0 %v4144_v48  ;;  %v4148_v15 = vld [vmem:[%s5368_s3 + $0x210] sm:$0xff]  }
  0xe4   : > { %3632 = vmatpush3.bf16.msra.mxu0 %v4145_v6 }
  0xe7   : > { %3818 = vmatmul.mubr.bf16.vlgmr.msra.gmra.mrb[80].mxu1 %v4879_v26  ;;  %2230 = vmatmul.mubr.bf16.vlgmr.msra.gmra.mrb[80].mxu0 %v4450_v29  ;;  %v4150_v29 = vld [vmem:[%s5368_s3 + $0x220] sm:$0xff]  }
  0xe8   : > { %3850 = vmatpush3.bf16.msra.mxu1 %v4807_v47  ;;  %3821 = vmatprep.mubr.bf16.mxu1 %v4890_v35 }
  0xe9   : > { %2237 = vmatprep.mubr.bf16.mxu0 %v4589_v10  ;;  %3851 = vmatprep.subr.bf16.mxu1 %v4147_v40  ;;  %v4151_v10 = vld [vmem:[%s5368_s3 + $0x228] sm:$0xff]  }
  0xec   : > { %3852 = vmatpush3.bf16.msra.mxu1 %v4147_v40 }
  0xed   : > { %3853 = vmatprep.subr.bf16.mxu1 %v4148_v15 }
  0xef   : > { %3822 = vmatmul.mubr.bf16.gmra.mrb[84].mxu1 %v4899_v11  ;;  %2238 = vmatmul.mubr.bf16.gmra.mrb[84].mxu0 %v4553_v27  ;;  %v4152_v27 = vld [vmem:[%s5368_s3 + $0x230] sm:$0xff]  }
  0xf0   : > { %3825 = vmatprep.mubr.bf16.mxu1 %v4916_v31  ;;  %2245 = vmatprep.mubr.bf16.mxu0 %v4659_v63  ;;  %v4153_v63 = vld [vmem:[%s5368_s3 + $0x238] sm:$0xff]  }
  0xf1   : > { %3854 = vmatpush3.bf16.msra.mxu1 %v4148_v15 }
  0xf2   : > { %3855 = vmatprep.subr.bf16.mxu1 %v4149_v1 }
  0xf5   : > { %3856 = vmatpush3.bf16.msra.mxu1 %v4149_v1 }
  0xf6   : > { %3857 = vmatprep.subr.bf16.mxu1 %v4150_v29 }
  0xf7   : > { %3826 = vmatmul.mubr.bf16.gmra.mrb[88].mxu1 %v4925_v49  ;;  %2246 = vmatmul.mubr.bf16.gmra.mrb[88].mxu0 %v4631_v19 }
  0xf8   : > { %3829 = vmatprep.mubr.bf16.mxu1 %v4942_v58  ;;  %2253 = vmatprep.mubr.bf16.mxu0 %v4711_v24 }
  0xf9   : > { %3858 = vmatpush3.bf16.msra.mxu1 %v4150_v29 }
  0xfa   : > { %3859 = vmatprep.subr.bf16.mxu1 %v4151_v10 }
  0xfd   : > { %3860 = vmatpush3.bf16.msra.mxu1 %v4151_v10 }
  0xfe   : > { %3861 = vmatprep.subr.bf16.mxu1 %v4152_v27 }
  0xff   : > { %3830 = vmatmul.mubr.bf16.gmra.mrb[92].mxu1 %v4951_v44  ;;  %2254 = vmatmul.mubr.bf16.gmra.mrb[92].mxu0 %v4700_v45 }
 0x100   : > { %3833 = vmatprep.mubr.bf16.mxu1 %v4968_v21  ;;  %2261 = vmatprep.mubr.bf16.mxu0 %v4751_v4 }
 0x101   : > { %3862 = vmatpush3.bf16.msra.mxu1 %v4152_v27 }
 0x102   : > { %3863 = vmatprep.subr.bf16.mxu1 %v4153_v63 }
 0x105   : > { %v3361_v19 = vpop.f32.mrb[0].mxu0  ;;  %3864 = vmatpush3.bf16.msra.mxu1 %v4153_v63 }
 0x106   : > { %v3362_v24 = vpop.f32.mrb[1].mxu0 }
 0x107   : > { %3834 = vmatmul.mubr.bf16.gmra.mrb[0].mxu1 %v4421_v2  ;;  %v5025_v47 = vadd.f32 %v3362_v24, %v3361_v19  ;;  %v3364_v26 = vpop.f32.mrb[2].mxu0  ;;  %2262 = vmatmul.mubr.bf16.gmra.mrb[96].mxu0 %v4730_v25 }
 0x108   : > { %3837 = vmatprep.mubr.bf16.mxu1 %v4426_v9  ;;  %v3365_v22 = vpop.f32.mrb[3].mxu0  ;;  %2269 = vmatprep.mubr.bf16.mxu0 %v4760_v14  ;;  %v5390_v14 = vld [vmem:[#allocation4_spill] sm:$0xff] }
 0x109   : > { %v5030_v45 = vadd.f32 %v3365_v22, %v3364_v26 }
 0x10f   : > { %3838 = vmatmul.mubr.bf16.gmra.mrb[4].mxu1 %v4509_v42  ;;  %2270 = vmatmul.mubr.bf16.gmra.mrb[100].mxu0 %v4739_v5 }
 0x110   : > { %3841 = vmatprep.mubr.bf16.mxu1 %v5388_v38  ;;  %2277 = vmatprep.mubr.bf16.mxu0 %v4776_v28 }
 0x111   : > { %v3367_v4 = vpop.f32.mrb[4].mxu0 }
 0x112   : > { %v3368_v62 = vpop.f32.mrb[5].mxu0 }
 0x113   : > { %v5033_v39 = vadd.f32 %v3368_v62, %v3367_v4  ;;  %v3370_v53 = vpop.f32.mrb[6].mxu0 }
 0x114   : > { %v3371_v51 = vpop.f32.mrb[7].mxu0 }
 0x115   : > { %v5038_v25 = vadd.f32 %v3371_v51, %v3370_v53 }
 0x117   : > { %3842 = vmatmul.mubr.bf16.gmra.mrb[8].mxu1 %v5389_v7  ;;  %2278 = vmatmul.mubr.bf16.gmra.mrb[104].mxu0 %v4764_v33 }
 0x118   : > { %3845 = vmatprep.mubr.bf16.mxu1 %v5390_v14  ;;  %2285 = vmatprep.mubr.bf16.mxu0 %v4792_v8 }
 0x11e   : > { %v3373_v23 = vpop.f32.mrb[8].mxu0 }
 0x11f   : > { %3846 = vmatmul.mubr.bf16.gmra.mrb[12].mxu1 %v5391_v37  ;;  %v3374_v34 = vpop.f32.mrb[9].mxu0  ;;  %2286 = vmatmul.mubr.bf16.gmra.mrb[108].mxu0 %v4403_v52 }
 0x120   : > { %3865 = vmatprep.mubr.bf16.mxu1 %v4890_v35  ;;  %v5047_v5 = vadd.f32 %v3374_v34, %v3373_v23  ;;  %v3376_v28 = vpop.f32.mrb[10].mxu0  ;;  %2293 = vmatprep.mubr.bf16.mxu0 %v4810_v57 }
 0x121   : > { %v3377_v0 = vpop.f32.mrb[11].mxu0 }
 0x122   : > { %v5050_v18 = vadd.f32 %v3377_v0, %v3376_v28 }
 0x127   : > { %3866 = vmatmul.mubr.bf16.vlgmr.msra.gmra.mrb[80].mxu1 %v4899_v11  ;;  %2294 = vmatmul.mubr.bf16.gmra.mrb[112].mxu0 %v4408_v55 }
 0x128   : > { %3869 = vmatprep.mubr.bf16.mxu1 %v4916_v31  ;;  %2301 = vmatprep.mubr.bf16.mxu0 %v4821_v32 }
 0x12a   : > { %v3379_v33 = vpop.f32.mrb[12].mxu0 }
 0x12b   : > { %v3380_v52 = vpop.f32.mrb[13].mxu0 }
 0x12c   : > { %v5056_v8 = vadd.f32 %v3380_v52, %v3379_v33  ;;  %v3382_v35 = vpop.f32.mrb[14].mxu0 }
 0x12d   : > { %v3383_v3 = vpop.f32.mrb[15].mxu0 }
 0x12e   : > { %v5058_v30 = vadd.f32 %v3383_v3, %v3382_v35 }
 0x12f   : > { %3870 = vmatmul.mubr.bf16.gmra.mrb[84].mxu1 %v4925_v49  ;;  %2302 = vmatmul.mubr.bf16.gmra.mrb[116].mxu0 %v4485_v17 }
 0x130   : > { %3873 = vmatprep.mubr.bf16.mxu1 %v4942_v58  ;;  %2309 = vmatprep.mubr.bf16.mxu0 %v4831_v20 }
 0x137   : > { %3874 = vmatmul.mubr.bf16.gmra.mrb[88].mxu1 %v4951_v44  ;;  %2310 = vmatmul.mubr.bf16.gmra.mrb[120].mxu0 %v4520_v56 }
 0x138   : > { %3877 = vmatprep.mubr.bf16.mxu1 %v4968_v21  ;;  %2317 = vmatprep.mubr.bf16.mxu0 %v4841_v12 }
 0x13a   : > { %v3385_v55 = vpop.f32.mrb[16].mxu0  ;;  %v3497_v57 = vpop.f32.mrb[16].mxu1 }
 0x13b   : > { %v3386_v32 = vpop.f32.mrb[17].mxu0  ;;  %v3498_v11 = vpop.f32.mrb[17].mxu1 }
 0x13c   : > { %v5068_v31 = vadd.f32 %v3386_v32, %v3385_v55  ;;  %v5070_v49 = vadd.f32 %v3498_v11, %v3497_v57  ;;  %v3388_v17 = vpop.f32.mrb[18].mxu0  ;;  %v3500_v58 = vpop.f32.mrb[18].mxu1 }
 0x13d   : > { %v3389_v41 = vpop.f32.mrb[19].mxu0  ;;  %v3501_v20 = vpop.f32.mrb[19].mxu1 }
 0x13e   : > { %v5072_v48 = vadd.f32 %v3389_v41, %v3388_v17  ;;  %v5074_v44 = vadd.f32 %v3501_v20, %v3500_v58 }
 0x13f   : > { %3878 = vmatmul.mubr.bf16.gmra.mrb[92].mxu1 %v4421_v2  ;;  %2318 = vmatmul.mubr.bf16.gmra.mrb[124].mxu0 %v4575_v13 }
 0x140   : > { %3881 = vmatprep.mubr.bf16.mxu1 %v4426_v9  ;;  %2325 = vmatprep.mubr.bf16.mxu0 %v4851_v61 }
 0x142   : > { %v3503_v56 = vpop.f32.mrb[20].mxu1  ;;  %v3391_v12 = vpop.f32.mrb[20].mxu0 }
 0x143   : > { %v3504_v21 = vpop.f32.mrb[21].mxu1  ;;  %v3392_v6 = vpop.f32.mrb[21].mxu0 }
 0x144   : > { %v5080_v40 = vadd.f32 %v3504_v21, %v3503_v56  ;;  %v3506_v15 = vpop.f32.mrb[22].mxu1  ;;  %v5082_v1 = vadd.f32 %v3392_v6, %v3391_v12  ;;  %v3394_v29 = vpop.f32.mrb[22].mxu0 }
 0x145   : > { %v3507_v10 = vpop.f32.mrb[23].mxu1  ;;  %v3395_v27 = vpop.f32.mrb[23].mxu0 }
 0x146   : > { %v5084_v63 = vadd.f32 %v3507_v10, %v3506_v15  ;;  %v5086_v2 = vadd.f32 %v3395_v27, %v3394_v29 }
 0x147   : > { %3882 = vmatmul.mubr.bf16.gmra.mrb[0].mxu1 %v4509_v42  ;;  %2326 = vmatmul.mubr.bf16.gmra.mrb[128].mxu0 %v4609_v46 }
 0x148   : > { %3885 = vmatprep.mubr.bf16.mxu1 %v5388_v38  ;;  %2333 = vmatprep.mubr.bf16.mxu0 %v4861_v16 }
 0x14a   : > { %v3509_v9 = vpop.f32.mrb[24].mxu1  ;;  %v3397_v13 = vpop.f32.mrb[24].mxu0 }
 0x14b   : > { %v3510_v61 = vpop.f32.mrb[25].mxu1  ;;  %v3398_v19 = vpop.f32.mrb[25].mxu0 }
 0x14c   : > { %v5092_v24 = vadd.f32 %v3510_v61, %v3509_v9  ;;  %v3512_v26 = vpop.f32.mrb[26].mxu1  ;;  %v5094_v22 = vadd.f32 %v3398_v19, %v3397_v13  ;;  %v3400_v4 = vpop.f32.mrb[26].mxu0 }
 0x14d   : > { %v3513_v62 = vpop.f32.mrb[27].mxu1  ;;  %v3401_v53 = vpop.f32.mrb[27].mxu0 }
 0x14e   : > { %v5096_v51 = vadd.f32 %v3513_v62, %v3512_v26  ;;  %v5098_v42 = vadd.f32 %v3401_v53, %v3400_v4 }
 0x14f   : > { %3886 = vmatmul.mubr.bf16.gmra.mrb[4].mxu1 %v5389_v7  ;;  %2334 = vmatmul.mubr.bf16.gmra.mrb[132].mxu0 %v4656_v59  ;;  %v5392_v59 = vld [vmem:[#allocation6_spill] sm:$0xff] }
 0x150   : > { %3889 = vmatprep.mubr.bf16.mxu1 %v5390_v14  ;;  %2341 = vmatprep.mubr.bf16.mxu0 %v4870_v36 }
 0x152   : > { %v3515_v46 = vpop.f32.mrb[28].mxu1  ;;  %v3403_v16 = vpop.f32.mrb[28].mxu0 }
 0x153   : > { %v3516_v38 = vpop.f32.mrb[29].mxu1  ;;  %v3404_v23 = vpop.f32.mrb[29].mxu0 }
 0x154   : > { %v5104_v34 = vadd.f32 %v3516_v38, %v3515_v46  ;;  %v3518_v28 = vpop.f32.mrb[30].mxu1  ;;  %v5106_v0 = vadd.f32 %v3404_v23, %v3403_v16  ;;  %v3406_v33 = vpop.f32.mrb[30].mxu0 }
 0x155   : > { %v3519_v52 = vpop.f32.mrb[31].mxu1  ;;  %v3407_v35 = vpop.f32.mrb[31].mxu0 }
 0x156   : > { %v5108_v3 = vadd.f32 %v3519_v52, %v3518_v28  ;;  %v5110_v7 = vadd.f32 %v3407_v35, %v3406_v33 }
 0x157   : > { %3890 = vmatmul.mubr.bf16.gmra.mrb[8].mxu1 %v5391_v37  ;;  %2342 = vmatmul.mubr.bf16.gmra.mrb[136].mxu0 %v4685_v60 }
 0x158   : > { %3893 = vmatprep.mubr.bf16.mxu1 %v5392_v59  ;;  %2349 = vmatprep.mubr.bf16.mxu0 %v4664_v54 }
 0x15a   : > { %v3521_v36 = vpop.f32.mrb[32].mxu1  ;;  %v3409_v14 = vpop.f32.mrb[32].mxu0 }
 0x15b   : > { %v3522_v55 = vpop.f32.mrb[33].mxu1  ;;  %v3410_v57 = vpop.f32.mrb[33].mxu0 }
 0x15c   : > { %v5116_v32 = vadd.f32 %v3522_v55, %v3521_v36  ;;  %v3524_v11 = vpop.f32.mrb[34].mxu1  ;;  %v3411_v17 = vadd.f32 %v3410_v57, %v3409_v14  ;;  %v3412_v58 = vpop.f32.mrb[34].mxu0 }
 0x15d   : > { %v3525_v41 = vpop.f32.mrb[35].mxu1  ;;  %v3413_v20 = vpop.f32.mrb[35].mxu0 }
 0x15e   : > { %v5118_v56 = vadd.f32 %v3525_v41, %v3524_v11  ;;  %v3414_v37 = vadd.f32 %v3413_v20, %v3412_v58 }
 0x15f   : > { %3894 = vmatmul.mubr.bf16.gmra.mrb[12].mxu1 %v4974_v50  ;;  %2350 = vmatmul.mubr.bf16.gmra.mrb[140].mxu0 %v4347_v43 }
 0x162   : > { %v3527_v60 = vpop.f32.mrb[36].mxu1  ;;  %v3415_v54 = vpop.f32.mrb[36].mxu0 }
 0x163   : > { %v3528_v12 = vpop.f32.mrb[37].mxu1  ;;  %v3416_v21 = vpop.f32.mrb[37].mxu0 }
 0x164   : > { %v5122_v6 = vadd.f32 %v3528_v12, %v3527_v60  ;;  %v3530_v15 = vpop.f32.mrb[38].mxu1  ;;  %v3417_v29 = vadd.f32 %v3416_v21, %v3415_v54  ;;  %v3418_v10 = vpop.f32.mrb[38].mxu0 }
 0x165   : > { %v3531_v27 = vpop.f32.mrb[39].mxu1  ;;  %v3419_v9 = vpop.f32.mrb[39].mxu0 }
 0x166   : > { %v5124_v13 = vadd.f32 %v3531_v27, %v3530_v15  ;;  %v3420_v61 = vadd.f32 %v3419_v9, %v3418_v10 }
 0x16a   : > { %v3533_v19 = vpop.f32.mrb[40].mxu1  ;;  %v3421_v26 = vpop.f32.mrb[40].mxu0 }
 0x16b   : > { %v3534_v4 = vpop.f32.mrb[41].mxu1  ;;  %v3422_v50 = vpop.f32.mrb[41].mxu0 }
 0x16c   : > { %v5126_v62 = vadd.f32 %v3534_v4, %v3533_v19  ;;  %v3536_v43 = vpop.f32.mrb[42].mxu1  ;;  %v3423_v53 = vadd.f32 %v3422_v50, %v3421_v26  ;;  %v3424_v46 = vpop.f32.mrb[42].mxu0 }
 0x16d   : > { %v3537_v16 = vpop.f32.mrb[43].mxu1  ;;  %v3425_v38 = vpop.f32.mrb[43].mxu0 }
 0x16e   : > { %v5128_v23 = vadd.f32 %v3537_v16, %v3536_v43  ;;  %v3426_v28 = vadd.f32 %v3425_v38, %v3424_v46 }
 0x172   : > { %v3539_v33 = vpop.f32.mrb[44].mxu1  ;;  %v3427_v52 = vpop.f32.mrb[44].mxu0 }
 0x173   : > { %v3540_v35 = vpop.f32.mrb[45].mxu1  ;;  %v3428_v59 = vpop.f32.mrb[45].mxu0 }
 0x174   : > { %v5130_v36 = vadd.f32 %v3540_v35, %v3539_v33  ;;  %v3542_v14 = vpop.f32.mrb[46].mxu1  ;;  %v3429_v55 = vadd.f32 %v3428_v59, %v3427_v52  ;;  %v3430_v57 = vpop.f32.mrb[46].mxu0 }
 0x175   : > { %v3543_v11 = vpop.f32.mrb[47].mxu1  ;;  %v3431_v58 = vpop.f32.mrb[47].mxu0 }
 0x176   : > { %v5132_v41 = vadd.f32 %v3543_v11, %v3542_v14  ;;  %v3432_v20 = vadd.f32 %v3431_v58, %v3430_v57 }
 0x17a   : > { %v3545_v60 = vpop.f32.mrb[48].mxu1  ;;  %v3433_v54 = vpop.f32.mrb[48].mxu0 }
 0x17b   : > { %v3546_v12 = vpop.f32.mrb[49].mxu1  ;;  %v3434_v21 = vpop.f32.mrb[49].mxu0 }
 0x17c   : > { %v3547_v15 = vadd.f32 %v3546_v12, %v3545_v60  ;;  %v3548_v10 = vpop.f32.mrb[50].mxu1  ;;  %v3435_v27 = vadd.f32 %v3434_v21, %v3433_v54  ;;  %v3436_v9 = vpop.f32.mrb[50].mxu0 }
 0x17d   : > { %v3549_v19 = vpop.f32.mrb[51].mxu1  ;;  %v3437_v4 = vpop.f32.mrb[51].mxu0 }
 0x17e   : > { %v5134_v26 = vadd.f32 %v3547_v15, %v3411_v17  ;;  %v3550_v50 = vadd.f32 %v3549_v19, %v3548_v10  ;;  %v3438_v43 = vadd.f32 %v3437_v4, %v3436_v9 }
 0x180   : > { %v5136_v46 = vadd.f32 %v3550_v50, %v3414_v37 }
 0x182   : > { %v3551_v16 = vpop.f32.mrb[52].mxu1  ;;  %v3439_v38 = vpop.f32.mrb[52].mxu0 }
 0x183   : > { %v3552_v33 = vpop.f32.mrb[53].mxu1  ;;  %v3440_v52 = vpop.f32.mrb[53].mxu0 }
 0x184   : > { %v3553_v35 = vadd.f32 %v3552_v33, %v3551_v16  ;;  %v3554_v59 = vpop.f32.mrb[54].mxu1  ;;  %v5138_v14 = vadd.f32 %v3440_v52, %v3439_v38  ;;  %v3442_v57 = vpop.f32.mrb[54].mxu0 }
 0x185   : > { %v3555_v11 = vpop.f32.mrb[55].mxu1  ;;  %v3443_v60 = vpop.f32.mrb[55].mxu0 }
 0x186   : > { %v5140_v58 = vadd.f32 %v3553_v35, %v3417_v29  ;;  %v3556_v17 = vadd.f32 %v3555_v11, %v3554_v59  ;;  %v5142_v54 = vadd.f32 %v3443_v60, %v3442_v57 }
 0x188   : > { %v5144_v12 = vadd.f32 %v3556_v17, %v3420_v61 }
 0x18a   : > { %v3557_v37 = vpop.f32.mrb[56].mxu1  ;;  %v3445_v21 = vpop.f32.mrb[56].mxu0 }
 0x18b   : > { %v3558_v15 = vpop.f32.mrb[57].mxu1  ;;  %v3446_v10 = vpop.f32.mrb[57].mxu0 }
 0x18c   : > { %v3559_v9 = vadd.f32 %v3558_v15, %v3557_v37  ;;  %v3560_v19 = vpop.f32.mrb[58].mxu1  ;;  %v5146_v4 = vadd.f32 %v3446_v10, %v3445_v21  ;;  %v3448_v50 = vpop.f32.mrb[58].mxu0 }
 0x18d   : > { %v3561_v16 = vpop.f32.mrb[59].mxu1  ;;  %v3449_v29 = vpop.f32.mrb[59].mxu0 }
 0x18e   : > { %v5148_v38 = vadd.f32 %v3559_v9, %v3423_v53  ;;  %v3562_v33 = vadd.f32 %v3561_v16, %v3560_v19  ;;  %v5150_v52 = vadd.f32 %v3449_v29, %v3448_v50 }
 0x190   : > { %5393 = vst [vmem:[#allocation2_spill] sm:$0xff] %v5148_v38  ;;  %v5152_v35 = vadd.f32 %v3562_v33, %v3426_v28 }
 0x192   : > { %5394 = vst [vmem:[#allocation3_spill] sm:$0xff] %v5152_v35  ;;  %v3563_v61 = vpop.f32.mrb[60].mxu1  ;;  %v3451_v59 = vpop.f32.mrb[60].mxu0 }
 0x193   : > { %v3564_v57 = vpop.f32.mrb[61].mxu1  ;;  %v3452_v11 = vpop.f32.mrb[61].mxu0 }
 0x194   : > { %v3565_v60 = vadd.f32 %v3564_v57, %v3563_v61  ;;  %v3566_v17 = vpop.f32.mrb[62].mxu1  ;;  %v5154_v37 = vadd.f32 %v3452_v11, %v3451_v59  ;;  %v3454_v21 = vpop.f32.mrb[62].mxu0 }
 0x195   : > { %v3567_v15 = vpop.f32.mrb[63].mxu1  ;;  %v3455_v53 = vpop.f32.mrb[63].mxu0 }
 0x196   : > { %v5156_v10 = vadd.f32 %v3565_v60, %v3429_v55  ;;  %v3568_v9 = vadd.f32 %v3567_v15, %v3566_v17  ;;  %v5158_v38 = vadd.f32 %v3455_v53, %v3454_v21 }
 0x198   : > { %v5160_v19 = vadd.f32 %v3568_v9, %v3432_v20 }
 0x19a   : > { %v3569_v28 = vpop.f32.mrb[64].mxu1  ;;  %v3771_v50 = vpop.f32.mrb[64].mxu0 }
 0x19b   : > { %v3570_v16 = vpop.f32.mrb[65].mxu1  ;;  %v1420_v29 = vadd.f32 %v3771_v50, %v5033_v39  ;;  %v1411_v33 = vpop.f32.mrb[65].mxu0 }
 0x19c   : > { %v3571_v61 = vadd.f32 %v3570_v16, %v3569_v28  ;;  %v3572_v57 = vpop.f32.mrb[66].mxu1  ;;  %v1412_v59 = vadd.f32 %v5025_v47, %v1411_v33  ;;  %v3772_v11 = vpop.f32.mrb[66].mxu0 }
 0x19d   : > { %v3573_v35 = vpop.f32.mrb[67].mxu1  ;;  %v5165_v55 = vadd.f32 %v5080_v40, %v1420_v29  ;;  %v1423_v20 = vadd.f32 %v3772_v11, %v5038_v25  ;;  %v1414_v17 = vpop.f32.mrb[67].mxu0 }
 0x19e   : > { %v5167_v60 = vadd.f32 %v3571_v61, %v3435_v27  ;;  %v3574_v21 = vadd.f32 %v3573_v35, %v3572_v57  ;;  %v5171_v15 = vadd.f32 %v5070_v49, %v1412_v59  ;;  %v1415_v39 = vadd.f32 %v5030_v45, %v1414_v17 }
 0x19f   : > { %v5175_v53 = vadd.f32 %v5084_v63, %v1423_v20 }
 0x1a0   : > { %v5177_v47 = vadd.f32 %v3574_v21, %v3438_v43  ;;  %v5180_v9 = vadd.f32 %v5074_v44, %v1415_v39 }
 0x1a2   : > { %v3575_v40 = vpop.f32.mrb[68].mxu1  ;;  %v3775_v27 = vpop.f32.mrb[68].mxu0 }
 0x1a3   : > { %v3576_v28 = vpop.f32.mrb[69].mxu1  ;;  %v1436_v25 = vadd.f32 %v3775_v27, %v5056_v8  ;;  %v1427_v50 = vpop.f32.mrb[69].mxu0 }
 0x1a4   : > { %v3577_v35 = vadd.f32 %v3576_v28, %v3575_v40  ;;  %v3578_v16 = vpop.f32.mrb[70].mxu1  ;;  %v1428_v49 = vadd.f32 %v5047_v5, %v1427_v50  ;;  %v3776_v29 = vpop.f32.mrb[70].mxu0 }
 0x1a5   : > { %v3579_v45 = vpop.f32.mrb[71].mxu1  ;;  %v5185_v63 = vadd.f32 %v5104_v34, %v1436_v25  ;;  %v1439_v44 = vadd.f32 %v3776_v29, %v5058_v30  ;;  %v1430_v33 = vpop.f32.mrb[71].mxu0 }
 0x1a6   : > { %v5188_v43 = vadd.f32 %v3577_v35, %v5138_v14  ;;  %v3580_v61 = vadd.f32 %v3579_v45, %v3578_v16  ;;  %v5192_v57 = vadd.f32 %v5092_v24, %v1428_v49  ;;  %v1431_v8 = vadd.f32 %v5050_v18, %v1430_v33 }
 0x1a7   : > { %v5196_v59 = vadd.f32 %v5108_v3, %v1439_v44 }
 0x1a8   : > { %v5199_v5 = vadd.f32 %v3580_v61, %v5142_v54  ;;  %v5202_v34 = vadd.f32 %v5096_v51, %v1431_v8 }
 0x1aa   : > { %v3581_v14 = vpop.f32.mrb[72].mxu1  ;;  %v3779_v11 = vpop.f32.mrb[72].mxu0 }
 0x1ab   : > { %v3582_v20 = vpop.f32.mrb[73].mxu1  ;;  %v1452_v30 = vadd.f32 %v3779_v11, %v5082_v1  ;;  %v1443_v17 = vpop.f32.mrb[73].mxu0 }
 0x1ac   : > { %v3583_v21 = vadd.f32 %v3582_v20, %v3581_v14  ;;  %v3584_v24 = vpop.f32.mrb[74].mxu1  ;;  %v1444_v39 = vadd.f32 %v5068_v31, %v1443_v17  ;;  %v3780_v18 = vpop.f32.mrb[74].mxu0 }
 0x1ad   : > { %v3585_v40 = vpop.f32.mrb[75].mxu1  ;;  %v5207_v3 = vadd.f32 %v5122_v6, %v1452_v30  ;;  %v1455_v51 = vadd.f32 %v3780_v18, %v5086_v2  ;;  %v1446_v27 = vpop.f32.mrb[75].mxu0 }
 0x1ae   : > { %v5210_v54 = vadd.f32 %v3583_v21, %v5146_v4  ;;  %v3586_v28 = vadd.f32 %v3585_v40, %v3584_v24  ;;  %v5214_v25 = vadd.f32 %v5116_v32, %v1444_v39  ;;  %v1447_v1 = vadd.f32 %v5072_v48, %v1446_v27 }
 0x1af   : > { %v5218_v50 = vadd.f32 %v5124_v13, %v1455_v51 }
 0x1b0   : > { %v5221_v31 = vadd.f32 %v3586_v28, %v5150_v52  ;;  %v1752_v6 = vadd.f32 %v5118_v56, %v1447_v1 }
 0x1b2   : > { %v3587_v35 = vpop.f32.mrb[76].mxu1  ;;  %v3783_v4 = vpop.f32.mrb[76].mxu0 }
 0x1b3   : > { %v3588_v16 = vpop.f32.mrb[77].mxu1  ;;  %v1468_v2 = vadd.f32 %v3783_v4, %v5106_v0  ;;  %v1459_v49 = vpop.f32.mrb[77].mxu0 }
 0x1b4   : > { %v3589_v29 = vadd.f32 %v3588_v16, %v3587_v35  ;;  %v3590_v45 = vpop.f32.mrb[78].mxu1  ;;  %v1460_v32 = vadd.f32 %v5094_v22, %v1459_v49  ;;  %v3784_v44 = vpop.f32.mrb[78].mxu0 }
 0x1b5   : > { %v3591_v48 = vpop.f32.mrb[79].mxu1  ;;  %v5227_v13 = vadd.f32 %v5130_v36, %v1468_v2  ;;  %v1471_v56 = vadd.f32 %v3784_v44, %v5110_v7  ;;  %v1462_v33 = vpop.f32.mrb[79].mxu0 }
 0x1b6   : > { %v5230_v52 = vadd.f32 %v3589_v29, %v5154_v37  ;;  %v3592_v61 = vadd.f32 %v3591_v48, %v3590_v45  ;;  %v1765_v8 = vadd.f32 %v5126_v62, %v1460_v32  ;;  %v1463_v0 = vadd.f32 %v5098_v42, %v1462_v33 }
 0x1b7   : > { %v5236_v14 = vadd.f32 %v5132_v41, %v1471_v56 }
 0x1b8   : > { %v5239_v22 = vadd.f32 %v3592_v61, %v5158_v38  ;;  %v1768_v36 = vadd.f32 %v5128_v23, %v1463_v0 }
 0x1ba   : > { %v3633_v11 = vpop.f32.mrb[80].mxu0 }
 0x1bb   : > { %v3634_v20 = vpop.f32.mrb[81].mxu0 }
 0x1bc   : > { %v3635_v37 = vadd.f32 %v3634_v20, %v3633_v11  ;;  %v3636_v30 = vpop.f32.mrb[82].mxu0 }
 0x1bd   : > { %v3637_v17 = vpop.f32.mrb[83].mxu0 }
 0x1be   : > { %v3638_v7 = vadd.f32 %v3637_v17, %v3636_v30  ;;  %v5243_v21 = vadd.f32 %v3635_v37, %v5171_v15 }
 0x1c0   : > { %v5246_v62 = vadd.f32 %v3638_v7, %v5180_v9 }
 0x1c2   : > { %v3639_v42 = vpop.f32.mrb[84].mxu0 }
 0x1c3   : > { %v3640_v41 = vpop.f32.mrb[85].mxu0 }
 0x1c4   : > { %v3641_v24 = vadd.f32 %v3640_v41, %v3639_v42  ;;  %v3642_v39 = vpop.f32.mrb[86].mxu0 }
 0x1c5   : > { %v3643_v38 = vpop.f32.mrb[87].mxu0 }
 0x1c6   : > { %v3644_v18 = vadd.f32 %v3643_v38, %v3642_v39  ;;  %v3915_v23 = vadd.f32 %v3641_v24, %v5165_v55 }
 0x1c8   : > { %v3923_v40 = vadd.f32 %v3644_v18, %v5175_v53 }
 0x1ca   : > { %v3645_v51 = vpop.f32.mrb[88].mxu0 }
 0x1cb   : > { %v3646_v27 = vpop.f32.mrb[89].mxu0 }
 0x1cc   : > { %v3647_v28 = vadd.f32 %v3646_v27, %v3645_v51  ;;  %v3648_v1 = vpop.f32.mrb[90].mxu0 }
 0x1cd   : > { %v3649_v35 = vpop.f32.mrb[91].mxu0 }
 0x1ce   : > { %v3650_v15 = vadd.f32 %v3649_v35, %v3648_v1  ;;  %v5251_v4 = vadd.f32 %v3647_v28, %v5192_v57 }
 0x1d0   : > { %v5254_v9 = vadd.f32 %v3650_v15, %v5202_v34 }
 0x1d2   : > { %v3651_v16 = vpop.f32.mrb[92].mxu0 }
 0x1d3   : > { %v3652_v2 = vpop.f32.mrb[93].mxu0 }
 0x1d4   : > { %v3653_v49 = vadd.f32 %v3652_v2, %v3651_v16  ;;  %v3654_v29 = vpop.f32.mrb[94].mxu0 }
 0x1d5   : > { %v3655_v45 = vpop.f32.mrb[95].mxu0 }
 0x1d6   : > { %v3656_v55 = vadd.f32 %v3655_v45, %v3654_v29  ;;  %v5257_v53 = vadd.f32 %v3653_v49, %v5185_v63 }
 0x1d8   : > { %v5260_v32 = vadd.f32 %v3656_v55, %v5196_v59 }
 0x1da   : > { %v3657_v44 = vpop.f32.mrb[96].mxu0 }
 0x1db   : > { %v3658_v48 = vpop.f32.mrb[97].mxu0 }
 0x1dc   : > { %v3659_v56 = vadd.f32 %v3658_v48, %v3657_v44  ;;  %v3660_v57 = vpop.f32.mrb[98].mxu0 }
 0x1dd   : > { %v3661_v33 = vpop.f32.mrb[99].mxu0 }
 0x1de   : > { %v3662_v61 = vadd.f32 %v3661_v33, %v3660_v57  ;;  %v5263_v34 = vadd.f32 %v3659_v56, %v5214_v25 }
 0x1e0   : > { %v5265_v0 = vadd.f32 %v3662_v61, %v1752_v6 }
 0x1e2   : > { %v3663_v11 = vpop.f32.mrb[100].mxu0 }
 0x1e3   : > { %v3664_v20 = vpop.f32.mrb[101].mxu0 }
 0x1e4   : > { %v3665_v37 = vadd.f32 %v3664_v20, %v3663_v11  ;;  %v3666_v30 = vpop.f32.mrb[102].mxu0 }
 0x1e5   : > { %v3667_v63 = vpop.f32.mrb[103].mxu0 }
 0x1e6   : > { %v3668_v17 = vadd.f32 %v3667_v63, %v3666_v30  ;;  %v5268_v59 = vadd.f32 %v3665_v37, %v5207_v3 }
 0x1e8   : > { %v5271_v7 = vadd.f32 %v3668_v17, %v5218_v50 }
 0x1ea   : > { %v3669_v42 = vpop.f32.mrb[104].mxu0 }
 0x1eb   : > { %v3670_v41 = vpop.f32.mrb[105].mxu0 }
 0x1ec   : > { %v3671_v24 = vadd.f32 %v3670_v41, %v3669_v42  ;;  %v3672_v39 = vpop.f32.mrb[106].mxu0 }
 0x1ed   : > { %v3673_v25 = vpop.f32.mrb[107].mxu0 }
 0x1ee   : > { %v3674_v38 = vadd.f32 %v3673_v25, %v3672_v39  ;;  %v5273_v6 = vadd.f32 %v3671_v24, %v1765_v8 }
 0x1f0   : > { %v5275_v18 = vadd.f32 %v3674_v38, %v1768_v36 }
 0x1f2   : > { %v3675_v51 = vpop.f32.mrb[108].mxu0 }
 0x1f3   : > { %v3676_v27 = vpop.f32.mrb[109].mxu0 }
 0x1f4   : > { %v3677_v28 = vadd.f32 %v3676_v27, %v3675_v51  ;;  %v3678_v1 = vpop.f32.mrb[110].mxu0 }
 0x1f5   : > { %v3679_v3 = vpop.f32.mrb[111].mxu0 }
 0x1f6   : > { %v3680_v35 = vadd.f32 %v3679_v3, %v3678_v1  ;;  %v5278_v50 = vadd.f32 %v3677_v28, %v5227_v13 }
 0x1f8   : > { %v5281_v15 = vadd.f32 %v3680_v35, %v5236_v14 }
 0x1fa   : > { %v3867_v16 = vpop.f32.mrb[80].mxu1  ;;  %v3681_v2 = vpop.f32.mrb[112].mxu0 }
 0x1fb   : > { %v3916_v49 = vadd.f32 %v3915_v23, %v3867_v16  ;;  %v2392_v8 = vpop.f32.mrb[81].mxu1  ;;  %v3682_v29 = vpop.f32.mrb[113].mxu0 }
 0x1fc   : > { %v3920_v36 = vadd.f32 %v5243_v21, %v2392_v8  ;;  %v3868_v45 = vpop.f32.mrb[82].mxu1  ;;  %v3683_v55 = vadd.f32 %v3682_v29, %v3681_v2  ;;  %v3684_v44 = vpop.f32.mrb[114].mxu0 }
 0x1fd   : > { %v3924_v48 = vadd.f32 %v3923_v40, %v3868_v45  ;;  %v2395_v56 = vpop.f32.mrb[83].mxu1  ;;  %v3685_v13 = vpop.f32.mrb[115].mxu0  ;;  %v2751_v37 = vmul.f32 %v3916_v49, %v3916_v49 }
 0x1fe   : > { %v3928_v14 = vadd.f32 %v5246_v62, %v2395_v56  ;;  %v3686_v57 = vadd.f32 %v3685_v13, %v3684_v44  ;;  %v5293_v21 = vadd.f32 %v5134_v26, %v3683_v55  ;;  %v2749_v33 = vmul.f32 %v3920_v36, %v3920_v36 }
 0x1ff   : > { %v3243_v23 = vpack.c.bf16 %v3924_v48, %v3916_v49  ;;  %v2752_v24 = vmul.f32 %v3924_v48, %v3924_v48 }
 0x200   : > { %v3238_v61 = vpack.c.bf16 %v3928_v14, %v3920_v36  ;;  %v2711_v40 = vadd.f32 %v3928_v14, %v3920_v36  ;;  %v2750_v11 = vmul.f32 %v3928_v14, %v3928_v14  ;;  %v5297_v20 = vadd.f32 %v5136_v46, %v3686_v57 }
 0x201   : > { %3330 = vst [vmem:[%s5289_s30 + $0x8] sm:$0xff] %v3243_v23  }
 0x202   : > { %3239 = vst [vmem:[%s5289_s30] sm:$0xff] %v3238_v61   ;;  %v2712_v30 = vadd.f32 %v3916_v49, %v2711_v40  ;;  %v2781_v63 = vadd.f32 %v2750_v11, %v2749_v33  ;;  %v3871_v17 = vpop.f32.mrb[84].mxu1  ;;  %v3687_v42 = vpop.f32.mrb[116].mxu0 }
 0x203   : > { %v3932_v62 = vadd.f32 %v5257_v53, %v3871_v17  ;;  %v2408_v41 = vpop.f32.mrb[85].mxu1  ;;  %v3688_v39 = vpop.f32.mrb[117].mxu0 }
 0x204   : > { %v2782_v26 = vadd.f32 %v2781_v63, %v2751_v37  ;;  %v3936_v25 = vadd.f32 %v5251_v4, %v2408_v41  ;;  %v2713_v38 = vadd.f32 %v3924_v48, %v2712_v30  ;;  %v3872_v51 = vpop.f32.mrb[86].mxu1  ;;  %v3689_v27 = vadd.f32 %v3688_v39, %v3687_v42  ;;  %v3690_v46 = vpop.f32.mrb[118].mxu0  ;;  %v5395_v39 = vld [vmem:[#allocation2_spill] sm:$0xff] }
 0x205   : > { %v3940_v28 = vadd.f32 %v5260_v32, %v3872_v51  ;;  %v2411_v1 = vpop.f32.mrb[87].mxu1  ;;  %v3691_v2 = vpop.f32.mrb[119].mxu0  ;;  %v2755_v44 = vmul.f32 %v3932_v62, %v3932_v62 }
 0x206   : > { %v2714_v3 = vadd.f32 %v3936_v25, %v2713_v38  ;;  %v2753_v35 = vmul.f32 %v3936_v25, %v3936_v25  ;;  %v2783_v16 = vadd.f32 %v2782_v26, %v2752_v24  ;;  %v3944_v53 = vadd.f32 %v5254_v9, %v2411_v1 }
 0x207   : > { %v3253_v49 = vpack.c.bf16 %v3940_v28, %v3932_v62  ;;  %v3692_v8 = vadd.f32 %v3691_v2, %v3690_v46  ;;  %v5305_v29 = vadd.f32 %v5140_v58, %v3689_v27  ;;  %v2756_v57 = vmul.f32 %v3940_v28, %v3940_v28  ;;  %v5396_v46 = vld [vmem:[#allocation3_spill] sm:$0xff] }
 0x208   : > { %v2784_v4 = vadd.f32 %v2783_v16, %v2753_v35  ;;  %v3248_v36 = vpack.c.bf16 %v3944_v53, %v3936_v25  ;;  %v2715_v45 = vadd.f32 %v3944_v53, %v2714_v3  ;;  %v2754_v55 = vmul.f32 %v3944_v53, %v3944_v53 }
 0x209   : > { %3332 = vst [vmem:[%s5289_s30 + $0x18] sm:$0xff] %v3253_v49   ;;  %v5309_v32 = vadd.f32 %v5144_v12, %v3692_v8 }
 0x20a   : > { %3331 = vst [vmem:[%s5289_s30 + $0x10] sm:$0xff] %v3248_v36   ;;  %v2716_v48 = vadd.f32 %v3932_v62, %v2715_v45  ;;  %v2785_v56 = vadd.f32 %v2784_v4, %v2754_v55  ;;  %v3875_v13 = vpop.f32.mrb[88].mxu1  ;;  %v3693_v14 = vpop.f32.mrb[120].mxu0 }
 0x20b   : > { %v3948_v9 = vadd.f32 %v5268_v59, %v3875_v13  ;;  %v2424_v23 = vpop.f32.mrb[89].mxu1  ;;  %v3694_v33 = vpop.f32.mrb[121].mxu0 }
 0x20c   : > { %v2786_v58 = vadd.f32 %v2785_v56, %v2755_v44  ;;  %v3952_v61 = vadd.f32 %v5263_v34, %v2424_v23  ;;  %v2717_v40 = vadd.f32 %v3940_v28, %v2716_v48  ;;  %v3876_v11 = vpop.f32.mrb[90].mxu1  ;;  %v3695_v37 = vadd.f32 %v3694_v33, %v3693_v14  ;;  %v3696_v12 = vpop.f32.mrb[122].mxu0 }
 0x20d   : > { %v3956_v30 = vadd.f32 %v5271_v7, %v3876_v11  ;;  %v2427_v63 = vpop.f32.mrb[91].mxu1  ;;  %v3697_v41 = vpop.f32.mrb[123].mxu0  ;;  %v2759_v28 = vmul.f32 %v3948_v9, %v3948_v9 }
 0x20e   : > { %v2718_v17 = vadd.f32 %v3952_v61, %v2717_v40  ;;  %v2757_v42 = vmul.f32 %v3952_v61, %v3952_v61  ;;  %v2787_v62 = vadd.f32 %v2786_v58, %v2756_v57  ;;  %v3960_v59 = vadd.f32 %v5265_v0, %v2427_v63 }
 0x20f   : > { %v3263_v24 = vpack.c.bf16 %v3956_v30, %v3948_v9  ;;  %v3698_v26 = vadd.f32 %v3697_v41, %v3696_v12  ;;  %v5317_v25 = vadd.f32 %v5395_v39, %v3695_v37  ;;  %v2760_v53 = vmul.f32 %v3956_v30, %v3956_v30 }
 0x210   : > { %v2788_v34 = vadd.f32 %v2787_v62, %v2757_v42  ;;  %v3258_v38 = vpack.c.bf16 %v3960_v59, %v3952_v61  ;;  %v2719_v51 = vadd.f32 %v3960_v59, %v2718_v17  ;;  %v2758_v27 = vmul.f32 %v3960_v59, %v3960_v59 }
 0x211   : > { %3334 = vst [vmem:[%s5289_s30 + $0x28] sm:$0xff] %v3263_v24   ;;  %v5321_v7 = vadd.f32 %v5396_v46, %v3698_v26 }
 0x212   : > { %3333 = vst [vmem:[%s5289_s30 + $0x20] sm:$0xff] %v3258_v38   ;;  %v2720_v1 = vadd.f32 %v3948_v9, %v2719_v51  ;;  %v2789_v3 = vadd.f32 %v2788_v34, %v2758_v27  ;;  %v3879_v35 = vpop.f32.mrb[92].mxu1  ;;  %v3699_v16 = vpop.f32.mrb[124].mxu0 }
 0x213   : > { %v3964_v0 = vadd.f32 %v5278_v50, %v3879_v35  ;;  %v2440_v2 = vpop.f32.mrb[93].mxu1  ;;  %v3700_v8 = vpop.f32.mrb[125].mxu0 }
 0x214   : > { %v2790_v49 = vadd.f32 %v2789_v3, %v2759_v28  ;;  %v3968_v4 = vadd.f32 %v5273_v6, %v2440_v2  ;;  %v2721_v36 = vadd.f32 %v3956_v30, %v2720_v1  ;;  %v3880_v45 = vpop.f32.mrb[94].mxu1  ;;  %v3701_v55 = vadd.f32 %v3700_v8, %v3699_v16  ;;  %v3702_v44 = vpop.f32.mrb[126].mxu0 }
 0x215   : > { %v3972_v48 = vadd.f32 %v5281_v15, %v3880_v45  ;;  %v2443_v56 = vpop.f32.mrb[95].mxu1  ;;  %v3703_v23 = vpop.f32.mrb[127].mxu0  ;;  %v2763_v15 = vmul.f32 %v3964_v0, %v3964_v0 }
 0x216   : > { %v2722_v13 = vadd.f32 %v3968_v4, %v2721_v36  ;;  %v2761_v14 = vmul.f32 %v3968_v4, %v3968_v4  ;;  %v2791_v9 = vadd.f32 %v2790_v49, %v2760_v53  ;;  %v3976_v50 = vadd.f32 %v5275_v18, %v2443_v56 }
 0x217   : > { %v3273_v57 = vpack.c.bf16 %v3972_v48, %v3964_v0  ;;  %v3704_v58 = vadd.f32 %v3703_v23, %v3702_v44  ;;  %v3990_v33 = vadd.f32 %v5156_v10, %v3701_v55  ;;  %v2764_v62 = vmul.f32 %v3972_v48, %v3972_v48 }
 0x218   : > { %v2792_v6 = vadd.f32 %v2791_v9, %v2761_v14  ;;  %v3268_v61 = vpack.c.bf16 %v3976_v50, %v3968_v4  ;;  %v2723_v40 = vadd.f32 %v3976_v50, %v2722_v13  ;;  %v2762_v11 = vmul.f32 %v3976_v50, %v3976_v50 }
 0x219   : > { %3336 = vst [vmem:[%s5289_s30 + $0x38] sm:$0xff] %v3273_v57   ;;  %v3996_v37 = vadd.f32 %v5160_v19, %v3704_v58 }
 0x21a   : > { %3335 = vst [vmem:[%s5289_s30 + $0x30] sm:$0xff] %v3268_v61   ;;  %v2724_v12 = vadd.f32 %v3964_v0, %v2723_v40  ;;  %v2793_v30 = vadd.f32 %v2792_v6, %v2762_v11  ;;  %v3883_v63 = vpop.f32.mrb[0].mxu1  ;;  %v3705_v17 = vpop.f32.mrb[128].mxu0 }
 0x21b   : > { %v3979_v42 = vadd.f32 %v5305_v29, %v3883_v63  ;;  %v2456_v18 = vpop.f32.mrb[1].mxu1  ;;  %v3706_v59 = vpop.f32.mrb[129].mxu0 }
 0x21c   : > { %v2794_v41 = vadd.f32 %v2793_v30, %v2763_v15  ;;  %v3982_v10 = vadd.f32 %v5293_v21, %v2456_v18  ;;  %v2725_v24 = vadd.f32 %v3972_v48, %v2724_v12  ;;  %v3884_v26 = vpop.f32.mrb[2].mxu1  ;;  %v3707_v39 = vadd.f32 %v3706_v59, %v3705_v17  ;;  %v3708_v34 = vpop.f32.mrb[130].mxu0 }
 0x21d   : > { %v3985_v19 = vadd.f32 %v5309_v32, %v3884_v26  ;;  %v2459_v38 = vpop.f32.mrb[3].mxu1  ;;  %v3709_v28 = vpop.f32.mrb[131].mxu0  ;;  %v2767_v32 = vmul.f32 %v3979_v42, %v3979_v42 }
 0x21e   : > { %v2726_v51 = vadd.f32 %v3982_v10, %v2725_v24  ;;  %v2765_v27 = vmul.f32 %v3982_v10, %v3982_v10  ;;  %v2795_v46 = vadd.f32 %v2794_v41, %v2764_v62  ;;  %v3988_v29 = vadd.f32 %v5297_v20, %v2459_v38 }
 0x21f   : > { %v3283_v1 = vpack.c.bf16 %v3985_v19, %v3979_v42  ;;  %v3710_v3 = vadd.f32 %v3709_v28, %v3708_v34  ;;  %v4005_v35 = vadd.f32 %v5167_v60, %v3707_v39  ;;  %v2768_v20 = vmul.f32 %v3985_v19, %v3985_v19 }
 0x220   : > { %v2796_v21 = vadd.f32 %v2795_v46, %v2765_v27  ;;  %v3278_v16 = vpack.c.bf16 %v3988_v29, %v3982_v10  ;;  %v2727_v0 = vadd.f32 %v3988_v29, %v2726_v51  ;;  %v2766_v2 = vmul.f32 %v3988_v29, %v3988_v29 }
 0x221   : > { %3338 = vst [vmem:[%s5289_s30 + $0x48] sm:$0xff] %v3283_v1   ;;  %v4011_v53 = vadd.f32 %v5177_v47, %v3710_v3 }
 0x222   : > { %3337 = vst [vmem:[%s5289_s30 + $0x40] sm:$0xff] %v3278_v16   ;;  %v2728_v49 = vadd.f32 %v3979_v42, %v2727_v0  ;;  %v2797_v8 = vadd.f32 %v2796_v21, %v2766_v2  ;;  %v3887_v4 = vpop.f32.mrb[4].mxu1  ;;  %v3711_v36 = vpop.f32.mrb[132].mxu0 }
 0x223   : > { %v3991_v45 = vadd.f32 %v3990_v33, %v3887_v4  ;;  %v2472_v55 = vpop.f32.mrb[5].mxu1  ;;  %v3712_v48 = vpop.f32.mrb[133].mxu0 }
 0x224   : > { %v2798_v44 = vadd.f32 %v2797_v8, %v2767_v32  ;;  %v3994_v60 = vadd.f32 %v5317_v25, %v2472_v55  ;;  %v2729_v56 = vadd.f32 %v3985_v19, %v2728_v49  ;;  %v3888_v13 = vpop.f32.mrb[6].mxu1  ;;  %v3713_v14 = vadd.f32 %v3712_v48, %v3711_v36  ;;  %v3714_v9 = vpop.f32.mrb[134].mxu0 }
 0x225   : > { %v3997_v23 = vadd.f32 %v3996_v37, %v3888_v13  ;;  %v2475_v47 = vpop.f32.mrb[7].mxu1  ;;  %v3715_v6 = vpop.f32.mrb[135].mxu0  ;;  %v2771_v37 = vmul.f32 %v3991_v45, %v3991_v45 }
 0x226   : > { %v2730_v50 = vadd.f32 %v3994_v60, %v2729_v56  ;;  %v2769_v57 = vmul.f32 %v3994_v60, %v3994_v60  ;;  %v2799_v58 = vadd.f32 %v2798_v44, %v2768_v20  ;;  %v4000_v33 = vadd.f32 %v5321_v7, %v2475_v47 }
 0x227   : > { %v3293_v61 = vpack.c.bf16 %v3997_v23, %v3991_v45  ;;  %v3716_v40 = vadd.f32 %v3715_v6, %v3714_v9  ;;  %v4002_v11 = vadd.f32 %v5188_v43, %v3713_v14  ;;  %v2772_v7 = vmul.f32 %v3997_v23, %v3997_v23 }
 0x228   : > { %v2800_v15 = vadd.f32 %v2799_v58, %v2769_v57  ;;  %v3288_v25 = vpack.c.bf16 %v4000_v33, %v3994_v60  ;;  %v2731_v12 = vadd.f32 %v4000_v33, %v2730_v50  ;;  %v2770_v30 = vmul.f32 %v4000_v33, %v4000_v33 }
 0x229   : > { %3340 = vst [vmem:[%s5289_s30 + $0x58] sm:$0xff] %v3293_v61   ;;  %v4008_v63 = vadd.f32 %v5199_v5, %v3716_v40 }
 0x22a   : > { %3339 = vst [vmem:[%s5289_s30 + $0x50] sm:$0xff] %v3288_v25   ;;  %v2732_v17 = vadd.f32 %v3991_v45, %v2731_v12  ;;  %v2801_v42 = vadd.f32 %v2800_v15, %v2770_v30  ;;  %v3891_v18 = vpop.f32.mrb[8].mxu1  ;;  %v3717_v62 = vpop.f32.mrb[136].mxu0 }
 0x22b   : > { %v4003_v41 = vadd.f32 %v4002_v11, %v3891_v18  ;;  %v2488_v59 = vpop.f32.mrb[9].mxu1  ;;  %v3718_v24 = vpop.f32.mrb[137].mxu0 }
 0x22c   : > { %v2802_v10 = vadd.f32 %v2801_v42, %v2771_v37  ;;  %v4006_v26 = vadd.f32 %v4005_v35, %v2488_v59  ;;  %v2733_v43 = vadd.f32 %v3997_v23, %v2732_v17  ;;  %v3892_v39 = vpop.f32.mrb[10].mxu1  ;;  %v3719_v34 = vadd.f32 %v3718_v24, %v3717_v62  ;;  %v3720_v19 = vpop.f32.mrb[138].mxu0 }
 0x22d   : > { %v4009_v38 = vadd.f32 %v4008_v63, %v3892_v39  ;;  %v2491_v51 = vpop.f32.mrb[11].mxu1  ;;  %v3721_v28 = vpop.f32.mrb[139].mxu0  ;;  %v2775_v49 = vmul.f32 %v4003_v41, %v4003_v41 }
 0x22e   : > { %v2734_v5 = vadd.f32 %v4006_v26, %v2733_v43  ;;  %v2773_v27 = vmul.f32 %v4006_v26, %v4006_v26  ;;  %v2803_v46 = vadd.f32 %v2802_v10, %v2772_v7  ;;  %v4012_v29 = vadd.f32 %v4011_v53, %v2491_v51 }
 0x22f   : > { %v3303_v1 = vpack.c.bf16 %v4009_v38, %v4003_v41  ;;  %v3722_v3 = vadd.f32 %v3721_v28, %v3720_v19  ;;  %v4017_v21 = vadd.f32 %v5210_v54, %v3719_v34  ;;  %v2776_v20 = vmul.f32 %v4009_v38, %v4009_v38 }
 0x230   : > { %v2804_v16 = vadd.f32 %v2803_v46, %v2773_v27  ;;  %v3298_v0 = vpack.c.bf16 %v4012_v29, %v4006_v26  ;;  %v2735_v35 = vadd.f32 %v4012_v29, %v2734_v5  ;;  %v2774_v2 = vmul.f32 %v4012_v29, %v4012_v29 }
 0x231   : > { %3342 = vst [vmem:[%s5289_s30 + $0x68] sm:$0xff] %v3303_v1   ;;  %v4023_v32 = vadd.f32 %v5221_v31, %v3722_v3 }
 0x232   : > { %3341 = vst [vmem:[%s5289_s30 + $0x60] sm:$0xff] %v3298_v0   ;;  %v2736_v8 = vadd.f32 %v4003_v41, %v2735_v35  ;;  %v2805_v4 = vadd.f32 %v2804_v16, %v2774_v2  ;;  %v3895_v36 = vpop.f32.mrb[12].mxu1  ;;  %v3723_v45 = vpop.f32.mrb[140].mxu0 }
 0x233   : > { %v2504_v55 = vpop.f32.mrb[13].mxu1  ;;  %v3724_v44 = vpop.f32.mrb[141].mxu0 }
 0x234   : > { %v2806_v53 = vadd.f32 %v2805_v4, %v2775_v49  ;;  %v4018_v48 = vadd.f32 %v4017_v21, %v2504_v55  ;;  %v2737_v60 = vadd.f32 %v4009_v38, %v2736_v8  ;;  %v3896_v54 = vpop.f32.mrb[14].mxu1  ;;  %v3725_v56 = vadd.f32 %v3724_v44, %v3723_v45  ;;  %v3726_v13 = vpop.f32.mrb[142].mxu0 }
 0x235   : > { %v2507_v14 = vpop.f32.mrb[15].mxu1  ;;  %v3727_v47 = vpop.f32.mrb[143].mxu0 }
 0x236   : > { %v2738_v9 = vadd.f32 %v4018_v48, %v2737_v60  ;;  %v2777_v23 = vmul.f32 %v4018_v48, %v4018_v48  ;;  %v2807_v31 = vadd.f32 %v2806_v53, %v2776_v20  ;;  %v4024_v50 = vadd.f32 %v4023_v32, %v2507_v14 }
 0x237   : > { %v4014_v57 = vadd.f32 %v5230_v52, %v3725_v56  ;;  %v3728_v58 = vadd.f32 %v3727_v47, %v3726_v13 }
 0x238   : > { %v2808_v6 = vadd.f32 %v2807_v31, %v2777_v23  ;;  %v3308_v33 = vpack.c.bf16 %v4024_v50, %v4018_v48  ;;  %v2739_v61 = vadd.f32 %v4024_v50, %v2738_v9  ;;  %v2778_v40 = vmul.f32 %v4024_v50, %v4024_v50 }
 0x239   : > { %v4015_v11 = vadd.f32 %v4014_v57, %v3895_v36  ;;  %v4020_v15 = vadd.f32 %v5239_v22, %v3728_v58 }
 0x23a   : > { %3343 = vst [vmem:[%s5289_s30 + $0x70] sm:$0xff] %v3308_v33   ;;  %v2809_v25 = vadd.f32 %v2808_v6, %v2778_v40 }
 0x23b   : > { %v2779_v12 = vmul.f32 %v4015_v11, %v4015_v11  ;;  %v4021_v30 = vadd.f32 %v4020_v15, %v3896_v54  ;;  %v2740_v63 = vadd.f32 %v4015_v11, %v2739_v61 }
 0x23d   : > { %v3313_v37 = vpack.c.bf16 %v4021_v30, %v4015_v11  ;;  %v2780_v17 = vmul.f32 %v4021_v30, %v4021_v30  ;;  %v2741_v42 = vadd.f32 %v4021_v30, %v2740_v63  ;;  %v2810_v52 = vadd.f32 %v2809_v25, %v2779_v12 }
 0x23f   : > { %3344 = vst [vmem:[%s5289_s30 + $0x78] sm:$0xff] %v3313_v37   ;;  %v2742_v18 = vrot.slane %v2741_v42, 4  ;;  %v2811_v62 = vadd.f32 %v2810_v52, %v2780_v17 }
 0x241   : > { %v2743_v41 = vadd.f32 %v2742_v18, %v2741_v42  ;;  %v2812_v59 = vrot.slane %v2811_v62, 4 }
 0x243   : > { %v2744_v7 = vrot.slane %v2743_v41, 2  ;;  %v2813_v10 = vadd.f32 %v2812_v59, %v2811_v62 }
 0x245   : > { %v2745_v24 = vadd.f32 %v2744_v7, %v2743_v41  ;;  %v2814_v22 = vrot.slane %v2813_v10, 2 }
 0x247   : > { %v2746_v26 = vrot.slane %v2745_v24, 1  ;;  %v2815_v43 = vadd.f32 %v2814_v22, %v2813_v10 }
 0x249   : > { %v2747_v39 = vadd.f32 %v2746_v26, %v2745_v24  ;;  %v2816_v34 = vrot.slane %v2815_v43, 1 }
 0x24b   : > { %2748 = vst [vmem:[%s265_s7] sm:$0x1] %v2747_v39  ;;  %v2817_v19 = vadd.f32 %v2816_v34, %v2815_v43 }
 0x24d   : > { %2818 = vst [vmem:[%s268_s10] sm:$0x1] %v2817_v19 }
 0x24e PF: > { %s17_s21 = sadd.s32 1, %s4160_s21  }
 0x24f   : > { %p14_p4 = scmp.ge.s32.totalorder %s17_s21, 4  }
 0x251   :  { %16 = sbr.rel (!%p14_p4) target bundleno = 1 (0x1), region = 92 }

</bundles_post_ra>
